<compile_context>
chip_gen: v6e
topology: v6e:2x2x1
jax: 0.10.0
libtpu: 0.0.40
codegen_flags: <defaults>
</compile_context>

<pallas_src>
import functools

import jax
import jax.numpy as jnp
from jax.experimental import pallas as pl
from jax.experimental.pallas import tpu as pltpu


def _gin_fused_kernel(y1_ref, at_ref, w2_ref, b1_ref, b2_ref, o_ref, g_ref, *, tn):
    """Fused 2-layer GIN in feature-major layout.

    grid = (2, num_node_tiles); phase 0 = layer 1, phase 1 = layer 2.
      y1_ref : [dim_h, n_pad]   bf16  W1 @ X^T (Linear-1 hoisted), VMEM resident
      at_ref : [n_pad, n_pad]   bf16  A_hat^T[src, dst], VMEM resident
      w2_ref : [dim_out, dim_h] bf16  Linear-2 weight, resident
      b1_ref : [dim_h, 1]       f32   Linear-1 bias (column)
      b2_ref : [dim_out, 1]     f32   Linear-2 bias (column)
      o_ref  : [dim_out, tn]    f32   log-probabilities for this node tile
      g_ref  : [dim_out, n_pad] bf16  VMEM scratch: G = W2 @ relu(layer-1)
    """
    phase = pl.program_id(0)
    i = pl.program_id(1)
    col0 = pl.multiple_of(i * tn, tn)
    a_blk = at_ref[:, pl.ds(col0, tn)]              # [n_pad, tn] bf16

    @pl.when(phase == 0)
    def _():
        # Layer 1: H = relu((W1 @ X) @ A_hat^T + b1); fold Linear 2: G = W2 @ H.
        z1 = jnp.dot(y1_ref[...], a_blk,
                     preferred_element_type=jnp.float32) + b1_ref[...]
        h = jnp.maximum(z1, 0.0).astype(y1_ref.dtype)
        g = jnp.dot(w2_ref[...], h, preferred_element_type=jnp.float32)
        g_ref[:, pl.ds(col0, tn)] = g.astype(g_ref.dtype)
        # The output buffer is written back after every grid step; store the
        # (pre-aggregation) logits so nothing uninitialized reaches HBM.
        # Phase 1 overwrites these locations with the real result.
        o_ref[...] = g.astype(o_ref.dtype)

    @pl.when(phase == 1)
    def _():
        # Layer 2: Z = G @ A_hat^T + b2, then log_softmax over the class axis.
        z2 = jnp.dot(g_ref[...], a_blk,
                     preferred_element_type=jnp.float32) + b2_ref[...]
        m = jnp.max(z2, axis=0, keepdims=True)
        s = z2 - m
        lse = jnp.log(jnp.sum(jnp.exp(s), axis=0, keepdims=True))
        o_ref[...] = (s - lse).astype(o_ref.dtype)


def gin_forward(x, a_t_pad, w1, b1, w2, b2, *, tn=512):
    """x: [N, dim_in] f32; a_t_pad: [n_pad, n_pad] bf16 with
    a_t_pad[src, dst] = edge multiplicity + (1+eps) on the diagonal (zero in
    padded rows/cols); weights in torch nn.Linear layout ([out, in]); biases
    [out].  Returns [N, dim_out] f32 log-probabilities."""
    n, _ = x.shape
    n_pad = a_t_pad.shape[0]
    assert a_t_pad.shape == (n_pad, n_pad) and n_pad % tn == 0 and n_pad >= n
    dim_h = w1.shape[0]
    dim_out = w2.shape[0]
    bf = jnp.bfloat16

    # Hoisted Linear 1 (tiny XLA matmul), feature-major, zero-padded node axis.
    y1 = jnp.zeros((dim_h, n_pad), bf).at[:, :n].set(
        jnp.dot(w1, x.T, preferred_element_type=jnp.float32).astype(bf))

    # VMEM budget check against the v7x-safe ceiling (64 MiB physical).
    a_bytes = 2 * n_pad * n_pad                      # bf16 A_hat^T
    vmem_needed = (2 * a_bytes                       # A^T (double-buffer slack)
                   + 2 * 2 * dim_h * n_pad           # Y1
                   + 2 * dim_out * n_pad             # G scratch
                   + 2 * 4 * dim_out * tn            # output blocks
                   + (1 << 22))                      # misc headroom
    vmem_limit = max(int(vmem_needed), 32 * 1024 * 1024)
    assert vmem_limit <= 48 * 1024 * 1024, (
        "resident A_hat^T exceeds the v7x-safe VMEM budget; "
        "use a tiled streaming variant for graphs this large")

    grid = (2, n_pad // tn)
    kernel = functools.partial(_gin_fused_kernel, tn=tn)

    z_fm = pl.pallas_call(
        kernel,
        out_shape=jax.ShapeDtypeStruct((dim_out, n_pad), jnp.float32),
        grid_spec=pltpu.PrefetchScalarGridSpec(
            num_scalar_prefetch=0,
            grid=grid,
            in_specs=[
                pl.BlockSpec((dim_h, n_pad), lambda p, i: (0, 0)),    # Y1 resident
                pl.BlockSpec((n_pad, n_pad), lambda p, i: (0, 0)),    # A^T resident
                pl.BlockSpec((dim_out, dim_h), lambda p, i: (0, 0)),  # W2 resident
                pl.BlockSpec((dim_h, 1), lambda p, i: (0, 0)),        # b1
                pl.BlockSpec((dim_out, 1), lambda p, i: (0, 0)),      # b2
            ],
            out_specs=pl.BlockSpec((dim_out, tn), lambda p, i: (0, i)),
            scratch_shapes=[pltpu.VMEM((dim_out, n_pad), bf)],
        ),
        compiler_params=pltpu.CompilerParams(
            # Phase 1 consumes the whole VMEM scratch written in phase 0, so
            # both grid axes must run sequentially on a single core.
            dimension_semantics=("arbitrary", "arbitrary"),
            vmem_limit_bytes=vmem_limit,
        ),
    )(y1, a_t_pad, w2.astype(bf),
      b1.reshape(-1, 1).astype(jnp.float32),
      b2.reshape(-1, 1).astype(jnp.float32))

    return z_fm[:, :n].T


def build_a_hat_t(edge_index, num_nodes, n_pad, eps=0.0, dtype=jnp.bfloat16):
    """A_hat^T[src, dst] = multiplicity of edge (src -> dst), plus (1 + eps) on
    the diagonal (GINConv: (1+eps)*x_i + sum_{j->i} x_j), built directly in the
    padded, transposed, MXU-ready dtype.  bf16 is exact for integer edge
    multiplicities <= 256 and eps values representable in bf16."""
    src, dst = edge_index[0], edge_index[1]
    a_t = jnp.zeros((n_pad, n_pad), dtype)
    a_t = a_t.at[src, dst].add(jnp.ones(src.shape, dtype))
    diag = jnp.arange(num_nodes)
    a_t = a_t.at[diag, diag].add(jnp.asarray(1.0 + eps, dtype))
    return a_t


def reference_forward_mixed(x, a_t, w1, b1, w2, b2):
    """Reference mirroring the kernel numerics (hoisted Linears, bf16 MXU
    operands, f32 accumulation)."""
    bf = jnp.bfloat16
    at = a_t.astype(bf)
    y1 = jnp.dot(w1, x.T, preferred_element_type=jnp.float32).astype(bf)
    h = jnp.maximum(
        jnp.dot(y1, at, preferred_element_type=jnp.float32) + b1[:, None],
        0.0).astype(bf)
    g = jnp.dot(w2.astype(bf), h, preferred_element_type=jnp.float32).astype(bf)
    z = jnp.dot(g, at, preferred_element_type=jnp.float32) + b2[:, None]
    return jax.nn.log_softmax(z, axis=0).T


def reference_forward_f32(x, edge_index, w1, b1, w2, b2, eps=0.0):
    """Pure-f32 reference in the torch op order (aggregate, then Linear)."""
    n = x.shape[0]
    src, dst = edge_index[0], edge_index[1]
    a_hat = jnp.zeros((n, n), jnp.float32).at[dst, src].add(1.0)
    a_hat = a_hat + (1.0 + eps) * jnp.eye(n, dtype=jnp.float32)
    h = jnp.maximum(jnp.dot(a_hat, x) @ w1.T + b1, 0.0)
    z = jnp.dot(a_hat, h) @ w2.T + b2
    return jax.nn.log_softmax(z, axis=1)


if __name__ == "__main__":
    key = jax.random.PRNGKey(0)
    N, E = 1024, 4096                       # nodes, edges (small demo graph)
    dim_in, dim_h, dim_out = 32, 32, 16
    TN = 512                                # node tile (lane axis)

    k_x, k_e, k_w1, k_b1, k_w2, k_b2 = jax.random.split(key, 6)

    x = jax.random.normal(k_x, (N, dim_in), jnp.float32)
    edge_index = jax.random.randint(k_e, (2, E), 0, N, jnp.int32)

    # torch nn.Linear layout: weight [out, in], bias [out]
    w1 = jax.random.normal(k_w1, (dim_h, dim_in), jnp.float32) * 0.1
    b1 = jax.random.normal(k_b1, (dim_h,), jnp.float32) * 0.1
    w2 = jax.random.normal(k_w2, (dim_out, dim_h), jnp.float32) * 0.1
    b2 = jax.random.normal(k_b2, (dim_out,), jnp.float32) * 0.1

    n_pad = ((N + TN - 1) // TN) * TN
    a_t = build_a_hat_t(edge_index, N, n_pad)     # A^T + I, built once per graph

    out = gin_forward(x, a_t, w1, b1, w2, b2, tn=TN)
    out = jax.block_until_ready(out)

    assert out.shape == (N, dim_out)
    assert bool(jnp.all(jnp.isfinite(out)))

    # Tight check against a reference with identical numerics/op order.
    ref_mixed = reference_forward_mixed(x, a_t[:N, :N], w1, b1, w2, b2)
    assert jnp.allclose(out, ref_mixed, atol=2e-2, rtol=2e-2)

    # Loose sanity check against the pure-f32 torch-order semantics
    # (difference is bf16 operand rounding + Linear/aggregation reassociation).
    ref_f32 = reference_forward_f32(x, edge_index, w1, b1, w2, b2)
    assert jnp.allclose(out, ref_f32, atol=2.5e-1, rtol=1e-1)

    print("KERNEL_OK")
</pallas_src>

<mosaic_0001>
module attributes {stable_mosaic.version = 11 : i64} {
  func.func @_gin_fused_kernel(%arg0: i32, %arg1: i32, %arg2: memref<32x1024xbf16, #tpu.memory_space<vmem>>, %arg3: memref<1024x1024xbf16, #tpu.memory_space<vmem>>, %arg4: memref<16x32xbf16, #tpu.memory_space<vmem>>, %arg5: memref<32x1xf32, #tpu.memory_space<vmem>>, %arg6: memref<16x1xf32, #tpu.memory_space<vmem>>, %arg7: memref<16x512xf32, #tpu.memory_space<vmem>>, %arg8: memref<16x1024xbf16, #tpu.memory_space<vmem>>) attributes {dimension_semantics = [#tpu.dimension_semantics<arbitrary>, #tpu.dimension_semantics<arbitrary>], iteration_bounds = array<i64: 2, 2>, scalar_prefetch = 0 : i64, scratch_operands = 1 : i64, tpu.core_type = #tpu.core_type<tc>, window_params = [{pipeline_mode = #tpu.pipeline_mode<synchronous>, transform_indices = @transform_0, window_bounds = array<i64: 32, 1024>}, {pipeline_mode = #tpu.pipeline_mode<synchronous>, transform_indices = @transform_1, window_bounds = array<i64: 1024, 1024>}, {pipeline_mode = #tpu.pipeline_mode<synchronous>, transform_indices = @transform_2, window_bounds = array<i64: 16, 32>}, {pipeline_mode = #tpu.pipeline_mode<synchronous>, transform_indices = @transform_3, window_bounds = array<i64: 32, 1>}, {pipeline_mode = #tpu.pipeline_mode<synchronous>, transform_indices = @transform_4, window_bounds = array<i64: 16, 1>}, {transform_indices = @transform_5, window_bounds = array<i64: 16, 512>}]} {
    %c512_i32 = arith.constant 512 : i32
    %0 = arith.muli %arg1, %c512_i32 : i32
    %1 = tpu.assume_multiple %0, 512 : i32
    %c0 = arith.constant 0 : index
    %2 = arith.index_cast %1 : i32 to index
    %3 = vector.load %arg3[%c0, %2] : memref<1024x1024xbf16, #tpu.memory_space<vmem>>, vector<1024x512xbf16>
    %c0_i32 = arith.constant 0 : i32
    %4 = arith.cmpi eq, %arg0, %c0_i32 : i32
    %5 = arith.extui %4 : i1 to i32
    %c0_i32_0 = arith.constant 0 : i32
    %6 = arith.cmpi ne, %5, %c0_i32_0 : i32
    scf.if %6 {
      %c0_2 = arith.constant 0 : index
      %c0_3 = arith.constant 0 : index
      %10 = vector.load %arg2[%c0_2, %c0_3] : memref<32x1024xbf16, #tpu.memory_space<vmem>>, vector<32x1024xbf16>
      %cst = arith.constant dense<0.000000e+00> : vector<32x512xf32>
      %11 = tpu.matmul %10, %3, %cst {dimension_numbers = #tpu.dot_dimension_numbers<[1], [0], [0], [1], [0, 0, 1, 1], [], []>} : vector<32x1024xbf16>, vector<1024x512xbf16>, vector<32x512xf32> -> vector<32x512xf32>
      %c0_4 = arith.constant 0 : index
      %c0_5 = arith.constant 0 : index
      %12 = vector.load %arg5[%c0_4, %c0_5] : memref<32x1xf32, #tpu.memory_space<vmem>>, vector<32x1xf32>
      %13 = vector.broadcast %12 : vector<32x1xf32> to vector<32x512xf32>
      %14 = arith.addf %11, %13 : vector<32x512xf32>
      %cst_6 = arith.constant 0.000000e+00 : f32
      %15 = vector.broadcast %cst_6 : f32 to vector<32x512xf32>
      %16 = arith.maximumf %14, %15 : vector<32x512xf32>
      %17 = arith.truncf %16 : vector<32x512xf32> to vector<32x512xbf16>
      %c0_7 = arith.constant 0 : index
      %c0_8 = arith.constant 0 : index
      %18 = vector.load %arg4[%c0_7, %c0_8] : memref<16x32xbf16, #tpu.memory_space<vmem>>, vector<16x32xbf16>
      %cst_9 = arith.constant dense<0.000000e+00> : vector<16x512xf32>
      %19 = tpu.matmul %18, %17, %cst_9 {dimension_numbers = #tpu.dot_dimension_numbers<[1], [0], [0], [1], [0, 0, 1, 1], [], []>} : vector<16x32xbf16>, vector<32x512xbf16>, vector<16x512xf32> -> vector<16x512xf32>
      %20 = arith.truncf %19 : vector<16x512xf32> to vector<16x512xbf16>
      %c0_10 = arith.constant 0 : index
      %21 = arith.index_cast %1 : i32 to index
      %22 = vector.load %arg8[%c0_10, %21] : memref<16x1024xbf16, #tpu.memory_space<vmem>>, vector<16x512xbf16>
      tpu.vector_store %arg8[%c0_10, %21], %20 {strides = array<i32>} : memref<16x1024xbf16, #tpu.memory_space<vmem>>, vector<16x512xbf16>,
      %c0_11 = arith.constant 0 : index
      %c0_12 = arith.constant 0 : index
      %23 = vector.load %arg7[%c0_11, %c0_12] : memref<16x512xf32, #tpu.memory_space<vmem>>, vector<16x512xf32>
      tpu.vector_store %arg7[%c0_11, %c0_12], %19 {strides = array<i32>} : memref<16x512xf32, #tpu.memory_space<vmem>>, vector<16x512xf32>,
    } else {
    }
    %c1_i32 = arith.constant 1 : i32
    %7 = arith.cmpi eq, %arg0, %c1_i32 : i32
    %8 = arith.extui %7 : i1 to i32
    %c0_i32_1 = arith.constant 0 : i32
    %9 = arith.cmpi ne, %8, %c0_i32_1 : i32
    scf.if %9 {
      %c0_2 = arith.constant 0 : index
      %c0_3 = arith.constant 0 : index
      %10 = vector.load %arg8[%c0_2, %c0_3] : memref<16x1024xbf16, #tpu.memory_space<vmem>>, vector<16x1024xbf16>
      %cst = arith.constant dense<0.000000e+00> : vector<16x512xf32>
      %11 = tpu.matmul %10, %3, %cst {dimension_numbers = #tpu.dot_dimension_numbers<[1], [0], [0], [1], [0, 0, 1, 1], [], []>} : vector<16x1024xbf16>, vector<1024x512xbf16>, vector<16x512xf32> -> vector<16x512xf32>
      %c0_4 = arith.constant 0 : index
      %c0_5 = arith.constant 0 : index
      %12 = vector.load %arg6[%c0_4, %c0_5] : memref<16x1xf32, #tpu.memory_space<vmem>>, vector<16x1xf32>
      %13 = vector.broadcast %12 : vector<16x1xf32> to vector<16x512xf32>
      %14 = arith.addf %11, %13 : vector<16x512xf32>
      %cst_6 = arith.constant dense<0xFF800000> : vector<512xf32>
      %15 = vector.multi_reduction <maximumf>, %14, %cst_6 [0] : vector<16x512xf32> to vector<512xf32>
      %16 = vector.shape_cast %15 : vector<512xf32> to vector<1x512xf32>
      %17 = vector.broadcast %16 : vector<1x512xf32> to vector<16x512xf32>
      %18 = arith.subf %14, %17 : vector<16x512xf32>
      %19 = math.exp %18 : vector<16x512xf32>
      %cst_7 = arith.constant dense<0.000000e+00> : vector<512xf32>
      %20 = vector.multi_reduction <add>, %19, %cst_7 [0] : vector<16x512xf32> to vector<512xf32>
      %21 = vector.shape_cast %20 : vector<512xf32> to vector<1x512xf32>
      %22 = math.log %21 : vector<1x512xf32>
      %23 = vector.broadcast %22 : vector<1x512xf32> to vector<16x512xf32>
      %24 = arith.subf %18, %23 : vector<16x512xf32>
      %c0_8 = arith.constant 0 : index
      %c0_9 = arith.constant 0 : index
      %25 = vector.load %arg7[%c0_8, %c0_9] : memref<16x512xf32, #tpu.memory_space<vmem>>, vector<16x512xf32>
      tpu.vector_store %arg7[%c0_8, %c0_9], %24 {strides = array<i32>} : memref<16x512xf32, #tpu.memory_space<vmem>>, vector<16x512xf32>,
    } else {
    }
    return
  }
  func.func @transform_0(%arg0: i32, %arg1: i32) -> (i32, i32) {
    %c0_i32 = arith.constant 0 : i32
    %c0_i32_0 = arith.constant 0 : i32
    %c0_i32_1 = arith.constant 0 : i32
    return %c0_i32, %c0_i32_0 : i32, i32
  }
  func.func @transform_1(%arg0: i32, %arg1: i32) -> (i32, i32) {
    %c0_i32 = arith.constant 0 : i32
    %c0_i32_0 = arith.constant 0 : i32
    %c0_i32_1 = arith.constant 0 : i32
    return %c0_i32, %c0_i32_0 : i32, i32
  }
  func.func @transform_2(%arg0: i32, %arg1: i32) -> (i32, i32) {
    %c0_i32 = arith.constant 0 : i32
    %c0_i32_0 = arith.constant 0 : i32
    %c0_i32_1 = arith.constant 0 : i32
    return %c0_i32, %c0_i32_0 : i32, i32
  }
  func.func @transform_3(%arg0: i32, %arg1: i32) -> (i32, i32) {
    %c0_i32 = arith.constant 0 : i32
    %c0_i32_0 = arith.constant 0 : i32
    %c0_i32_1 = arith.constant 0 : i32
    return %c0_i32, %c0_i32_0 : i32, i32
  }
  func.func @transform_4(%arg0: i32, %arg1: i32) -> (i32, i32) {
    %c0_i32 = arith.constant 0 : i32
    %c0_i32_0 = arith.constant 0 : i32
    %c0_i32_1 = arith.constant 0 : i32
    return %c0_i32, %c0_i32_0 : i32, i32
  }
  func.func @transform_5(%arg0: i32, %arg1: i32) -> (i32, i32) {
    %c0_i32 = arith.constant 0 : i32
    %c0_i32_0 = arith.constant 0 : i32
    return %c0_i32, %arg1 : i32, i32
  }
}

</mosaic_0001>

<bundles_post_ra>
// kernel: tpu_custom_call.1
= control target key start
LH: loop header
LB: loop body
LE: loop exit
PB: predicated region body
PF: predicated region fallthrough
CT: control target
= control target key end

     0   :  { %s7580_s0 = inlined_call_operand.hbm [shape: bf16[32,1024], index: 0, kind: input, shape index: {}]   ;;  %s7581_s1 = inlined_call_operand.hbm [shape: bf16[1024,1024], index: 1, kind: input, shape index: {}]   ;;  %s7582_s2 = inlined_call_operand.hbm [shape: bf16[16,32], index: 2, kind: input, shape index: {}]   ;;  %s7583_s3 = inlined_call_operand.vmem [shape: f32[32,1], index: 3, kind: input, shape index: {}]   ;;  %s7584_s4 = inlined_call_operand.vmem [shape: f32[16,1], index: 4, kind: input, shape index: {}]   ;;  %s7585_s5 = inlined_call_operand.hbm [shape: f32[16,1024], index: 5, kind: output, shape index: {}]  }
   0x1   :  { %8070 = sst [smem:[#allocation254_spill]] %s7581_s1 }
   0x2   :  { %10 = vsyncpa [#allocation4], 0 }
   0x3   :  { %11 = vsyncpa [#allocation7], 0 }
   0x4   :  { %12 = vsyncpa [#allocation5], 0 }
   0x5   :  { %14 = vsyncpa [#allocation5 + $0x1], 0  ;;  %s5342_s18 = smov 0   ;;  %s5344_s19 = smov 0  }
   0x6   :  { %s5346_s20 = smov 0   ;;  %s5348_s21 = smov 0  }
   0x7   :  { %s5350_s22 = smov 0   ;;  %s5352_s23 = smov 0  }
   0x8   :  { %s5354_s24 = smov 0   ;;  %s5356_s25 = smov 0  }
   0x9 LB: > { %s4411_s26 = sadd.s32 4294967295, %s5297_s25   ;;  %s4412_s27 = sadd.s32 4294967294, %s5297_s25   ;;  %s5297_s25 = sphi %s5356_s25, %s20_s25   ;;  %s5293_s24 = sphi %s5354_s24, %s8767_s24   ;;  %s5289_s23 = sphi %s5352_s23, %s8766_s23   ;;  %s5285_s22 = sphi %s5350_s22, %s8765_s22   ;;  %s5281_s21 = sphi %s5348_s21, %s8764_s21   ;;  %s5277_s20 = sphi %s5346_s20, %s8763_s20   ;;  %s5273_s19 = sphi %s5344_s19, %s8762_s19   ;;  %s5269_s18 = sphi %s5342_s18, %s8761_s18  }
   0xa   : > { %s29_s28 = sadd.s32 1, %s5289_s23  ;;  %s32_s29 = sadd.s32 1, %s5293_s24 }
   0xb   : > { %p30_p0 = scmp.ge.s32.totalorder %s29_s28, 2  ;;  %s144_s30 = sadd.s32 1, %s5277_s20 }
   0xc   : > { %p154_p1 = scmp.ne.s32.totalorder %s5277_s20, %s5273_s19  ;;  %p155_p2 = scmp.eq.s32.totalorder %s4411_s26, 3 }
   0xd   : > { %s8769_s28 = smov (%p30_p0, %s29_s28), 0  ;;  %s8771_s29 = smov (!%p30_p0, %s32_s29), %s5293_s24 }
   0xe   : > { %s141_s6 = ssub.s32 %s5289_s23, %s8769_s28  ;;  %p5394_p3 = por %p155_p2, %p154_p1 }
   0xf   : > { %p34_p4 = scmp.ge.s32.totalorder %s8771_s29, 2  ;;  %p142_p5 = scmp.eq.s32.totalorder %s141_s6, 0 }
  0x10   : > { %p160_p6 = scmp.ne.s32.totalorder %s5273_s19, %s5269_s18  ;;  %p161_p7 = scmp.eq.s32.totalorder %s4412_s27, 3 }
  0x11   : > { %s8773_s29 = smov (%p34_p4, %s8771_s29), 0  ;;  %p4413_p9 = scmp.ge.s32.totalorder %s5297_s25, 1 }
  0x12   : > { %s5403_s8 = scalar_select %p142_p5, %s5277_s20, %s144_s30  }
  0x13   : > { %p5405_p8 = por %p161_p7, %p160_p6  ;;  %p168_p10 = scmp.lt.s32.totalorder %s5297_s25, 5 }
  0x14   : > { %p5411_p11 = scmp.eq.s32.totalorder %s4411_s26, 0  ;;  %s5299_s12 = smov [#allocation6]  }
  0x15   : > { %s8072_s9 = scalar_select %p5405_p8, 1, 0 }
  0x16   : > { %p5415_p12 = pnand %p4413_p9, %p168_p10  ;;  %s193_s13 = sshll.u32 %s5299_s12, 4  ;;  %s194_s13 = int_to_ptr.vmem [resolvable:$true] %s193_s13 }
  0x17   : > { %s5300_s15 = smov [#allocation3]   ;;  %s5130_s17 = scalar_lea.vmem %s194_s13, 65536 }
  0x18   : > { %p4994_p13 = pneg %p5415_p12  ;;  %s180_s16 = sshll.u32 %s5300_s15, 4  ;;  %s181_s16 = int_to_ptr.vmem [resolvable:$true] %s180_s16 }
  0x19   : > { %p5131_p2 = scmp.ne.s32.totalorder %s194_s13, %s5130_s17  ;;  %p5138_p6 = scmp.lt.s32.totalorder %s194_s13, %s194_s13 }
  0x1a   : > { %p5423_p0 = pnand %p5411_p11, %p4994_p13  ;;  %p5139_p7 = scmp.lt.s32.totalorder %s5130_s17, %s5130_s17 }
  0x1c   : > { %p5121_p1 = pneg %p5423_p0  ;;  %p5140_p9 = por %p5139_p7, %p5138_p6 }
  0x1e   : > { %p5133_p4 = pnand %p5131_p2, %p5121_p1 }
  0x20   : > { %p5134_p5 = pneg %p5133_p4 }
  0x22   : > { %p5141_p10 = pnand %p5140_p9, %p5134_p5 }
  0x24   : > { %5144 = shalt.err (!%p5141_p10)
}
  0x25   : > { %s5301_s26 = smov 512   ;;  %s5302_s27 = smov 32  }
  0x26   : > { %s8076_s1 = sld [smem:[#allocation254_spill]]  ;;  %s5156_s12 = scalar_lea.vmem %s181_s16, 2048 }
  0x27   : > { %p5157_p13 = scmp.ne.s32.totalorder %s181_s16, %s5156_s12  ;;  %p5164_p8 = scmp.lt.s32.totalorder %s181_s16, %s181_s16 }
  0x28   : > { %p5165_p6 = scmp.lt.s32.totalorder %s5156_s12, %s5156_s12 }
  0x29   : > { %p5159_p2 = pnand %p5157_p13, %p5121_p1 }
  0x2a   : > { %p5166_p5 = por %p5165_p6, %p5164_p8 }
  0x2b   : > { %p5160_p4 = pneg %p5159_p2 }
  0x2c   : > { %5000 = dma.hbm_to_vmem [thread:$0]  (!%p5423_p0), %s8076_s1, 65536, %s194_s13, [#allocation7], %s5301_s26, %s5301_s26, %s5302_s27  }
  0x2d   : > { %p5167_p7 = pnand %p5166_p5, %p5160_p4 }
  0x2f   : > { %5170 = shalt.err (!%p5167_p7)
}
  0x30   : > { %4997 = dma.hbm_to_vmem [thread:$0]  (!%p5423_p0), %s7580_s0, 2048, %s181_s16, [#allocation4], %s5301_s26, %s5301_s26, %s5302_s27  }
  0x31   : > { %s5303_s13 = smov [#allocation8]  }
  0x32   : > { %s206_s30 = sshll.u32 %s5303_s13, 4  ;;  %s207_s30 = int_to_ptr.vmem [resolvable:$true] %s206_s30 }
  0x33   : > { %s5182_s6 = scalar_lea.vmem %s207_s30, 128  ;;  %p5190_p2 = scmp.lt.s32.totalorder %s207_s30, %s207_s30 }
  0x34   : > { %p5183_p9 = scmp.ne.s32.totalorder %s207_s30, %s5182_s6  ;;  %p5191_p8 = scmp.lt.s32.totalorder %s5182_s6, %s5182_s6 }
  0x36   : > { %p5185_p10 = pnand %p5183_p9, %p5121_p1  ;;  %p5192_p4 = por %p5191_p8, %p5190_p2 }
  0x38   : > { %p5186_p13 = pneg %p5185_p10 }
  0x3a   : > { %p5193_p6 = pnand %p5192_p4, %p5186_p13 }
  0x3c   : > { %5196 = shalt.err (!%p5193_p6)
}
  0x3d   : > { %s5304_s12 = smov 64   ;;  %s5305_s1 = smov 4  }
  0x3e   : > { %5003 = dma.hbm_to_vmem [thread:$0]  (!%p5423_p0), %s7582_s2, 128, %s207_s30, [#allocation7], %s5304_s12, %s5304_s12, %s5305_s1  }
  0x3f   : > { %228 = sbr.rel (%p5415_p12) target bundleno = 1446 (0x5a6), region = 40 }
  0x44   : > { %5256 = dma.done.wait (%p5411_p11), [#allocation4], 2048  }
  0x45   : > { %5258 = vsyncadd (%p5411_p11), [#allocation4], 4294965248 }
  0x46   : > { %5260 = dma.done.wait (%p5411_p11), [#allocation7], 65664  }
  0x47   : > { %5262 = vsyncadd (%p5411_p11), [#allocation7], 4294901632  ;;  %s256_s1 = sand.u32 1, %s5273_s19   ;;  %s4422_s14 = sshll.u32 %s5281_s21, 9 }
  0x48   : > { %s5467_s11 = sshll.u32 %s256_s1, 6  ;;  %s5471_s26 = sshra.s32 %s4422_s14, 7 }
  0x49   : > { %s4423_s27 = sshll.u32 %s5471_s26, 2  ;;  %s6247_s10 = scalar_lea.vmem [#allocation9], %s5467_s11 }
  0x4a   : > { %s5476_s17 = scalar_lea.vmem [#allocation6], %s4423_s27  ;;  %p4424_p11 = scmp.ne.s32.totalorder %s5285_s22, 0 }
  0x4b   : > { %v5479_v0 = vld [vmem:[%s5476_s17] sm:$0xff]  ;;  %v5482_v1 = vld [vmem:[%s5476_s17 + $0x8] sm:$0xff]  ;;  %s2496_s13 = scalar_lea.vmem (!%p4424_p11), [#allocation2], %s4423_s27 }
  0x4c   : > { %8077 = vst [vmem:[#allocation13_spill] sm:$0xff] %v5479_v0  ;;  %8078 = vst [vmem:[#allocation14_spill] sm:$0xff] %v5482_v1  ;;  %v5485_v2 = vld [vmem:[%s5476_s17 + $0x20] sm:$0xff]  ;;  %v5488_v3 = vld [vmem:[%s5476_s17 + $0x28] sm:$0xff] }
  0x4d   : > { %8079 = vst [vmem:[#allocation15_spill] sm:$0xff] %v5485_v2  ;;  %8080 = vst [vmem:[#allocation16_spill] sm:$0xff] %v5488_v3  ;;  %v5491_v4 = vld [vmem:[%s5476_s17 + $0x40] sm:$0xff]  ;;  %v5494_v5 = vld [vmem:[%s5476_s17 + $0x48] sm:$0xff] }
  0x4e   : > { %8081 = vst [vmem:[#allocation17_spill] sm:$0xff] %v5491_v4  ;;  %8082 = vst [vmem:[#allocation18_spill] sm:$0xff] %v5494_v5  ;;  %v5497_v6 = vld [vmem:[%s5476_s17 + $0x60] sm:$0xff]  ;;  %v5500_v7 = vld [vmem:[%s5476_s17 + $0x68] sm:$0xff] }
  0x4f   : > { %8083 = vst [vmem:[#allocation19_spill] sm:$0xff] %v5497_v6  ;;  %8084 = vst [vmem:[#allocation20_spill] sm:$0xff] %v5500_v7  ;;  %v5503_v8 = vld [vmem:[%s5476_s17 + $0x80] sm:$0xff]  ;;  %v5506_v9 = vld [vmem:[%s5476_s17 + $0x88] sm:$0xff] }
  0x50   : > { %8085 = vst [vmem:[#allocation21_spill] sm:$0xff] %v5503_v8  ;;  %8086 = vst [vmem:[#allocation22_spill] sm:$0xff] %v5506_v9  ;;  %v5509_v10 = vld [vmem:[%s5476_s17 + $0xa0] sm:$0xff]  ;;  %v5512_v11 = vld [vmem:[%s5476_s17 + $0xa8] sm:$0xff] }
  0x51   : > { %8087 = vst [vmem:[#allocation23_spill] sm:$0xff] %v5512_v11  ;;  %v5515_v12 = vld [vmem:[%s5476_s17 + $0xc0] sm:$0xff]  ;;  %v5518_v13 = vld [vmem:[%s5476_s17 + $0xc8] sm:$0xff] }
  0x52   : > { %8088 = vst [vmem:[#allocation24_spill] sm:$0xff] %v5515_v12  ;;  %8089 = vst [vmem:[#allocation25_spill] sm:$0xff] %v5518_v13  ;;  %v5521_v14 = vld [vmem:[%s5476_s17 + $0xe0] sm:$0xff]  ;;  %v5524_v15 = vld [vmem:[%s5476_s17 + $0xe8] sm:$0xff] }
  0x53   : > { %8090 = vst [vmem:[#allocation26_spill] sm:$0xff] %v5524_v15  ;;  %v5527_v16 = vld [vmem:[%s5476_s17 + $0x100] sm:$0xff]  ;;  %v5530_v17 = vld [vmem:[%s5476_s17 + $0x108] sm:$0xff] }
  0x54   : > { %8091 = vst [vmem:[#allocation27_spill] sm:$0xff] %v5530_v17  ;;  %v5533_v18 = vld [vmem:[%s5476_s17 + $0x120] sm:$0xff]  ;;  %v5536_v19 = vld [vmem:[%s5476_s17 + $0x128] sm:$0xff] }
  0x55   : > { %8092 = vst [vmem:[#allocation28_spill] sm:$0xff] %v5536_v19  ;;  %v5539_v20 = vld [vmem:[%s5476_s17 + $0x140] sm:$0xff]  ;;  %v5542_v21 = vld [vmem:[%s5476_s17 + $0x148] sm:$0xff] }
  0x56   : > { %8093 = vst [vmem:[#allocation29_spill] sm:$0xff] %v5542_v21  ;;  %v5545_v22 = vld [vmem:[%s5476_s17 + $0x160] sm:$0xff]  ;;  %v5548_v23 = vld [vmem:[%s5476_s17 + $0x168] sm:$0xff] }
  0x57   : > { %8094 = vst [vmem:[#allocation30_spill] sm:$0xff] %v5548_v23  ;;  %v5551_v24 = vld [vmem:[%s5476_s17 + $0x180] sm:$0xff]  ;;  %v5554_v25 = vld [vmem:[%s5476_s17 + $0x188] sm:$0xff] }
  0x58   : > { %8095 = vst [vmem:[#allocation31_spill] sm:$0xff] %v5554_v25  ;;  %v5557_v26 = vld [vmem:[%s5476_s17 + $0x1a0] sm:$0xff]  ;;  %v5560_v27 = vld [vmem:[%s5476_s17 + $0x1a8] sm:$0xff] }
  0x59   : > { %8096 = vst [vmem:[#allocation32_spill] sm:$0xff] %v5560_v27  ;;  %v5563_v28 = vld [vmem:[%s5476_s17 + $0x1c0] sm:$0xff]  ;;  %v5566_v29 = vld [vmem:[%s5476_s17 + $0x1c8] sm:$0xff] }
  0x5a   : > { %8097 = vst [vmem:[#allocation33_spill] sm:$0xff] %v5566_v29  ;;  %v5569_v30 = vld [vmem:[%s5476_s17 + $0x1e0] sm:$0xff]  ;;  %v5572_v31 = vld [vmem:[%s5476_s17 + $0x1e8] sm:$0xff] }
  0x5b   : > { %8098 = vst [vmem:[#allocation34_spill] sm:$0xff] %v5572_v31  ;;  %v5575_v32 = vld [vmem:[%s5476_s17 + $0x200] sm:$0xff]  ;;  %v5578_v33 = vld [vmem:[%s5476_s17 + $0x208] sm:$0xff] }
  0x5c   : > { %8099 = vst [vmem:[#allocation35_spill] sm:$0xff] %v5575_v32  ;;  %8100 = vst [vmem:[#allocation36_spill] sm:$0xff] %v5578_v33  ;;  %v5581_v34 = vld [vmem:[%s5476_s17 + $0x220] sm:$0xff]  ;;  %v5584_v35 = vld [vmem:[%s5476_s17 + $0x228] sm:$0xff] }
  0x5d   : > { %8101 = vst [vmem:[#allocation37_spill] sm:$0xff] %v5581_v34  ;;  %8102 = vst [vmem:[#allocation38_spill] sm:$0xff] %v5584_v35  ;;  %v5587_v36 = vld [vmem:[%s5476_s17 + $0x240] sm:$0xff]  ;;  %v5590_v37 = vld [vmem:[%s5476_s17 + $0x248] sm:$0xff] }
  0x5e   : > { %8103 = vst [vmem:[#allocation39_spill] sm:$0xff] %v5587_v36  ;;  %8104 = vst [vmem:[#allocation40_spill] sm:$0xff] %v5590_v37  ;;  %v5593_v38 = vld [vmem:[%s5476_s17 + $0x260] sm:$0xff]  ;;  %v5596_v39 = vld [vmem:[%s5476_s17 + $0x268] sm:$0xff] }
  0x5f   : > { %8105 = vst [vmem:[#allocation41_spill] sm:$0xff] %v5593_v38  ;;  %8106 = vst [vmem:[#allocation42_spill] sm:$0xff] %v5596_v39  ;;  %v5599_v40 = vld [vmem:[%s5476_s17 + $0x280] sm:$0xff]  ;;  %v5602_v41 = vld [vmem:[%s5476_s17 + $0x288] sm:$0xff] }
  0x60   : > { %8107 = vst [vmem:[#allocation43_spill] sm:$0xff] %v5599_v40  ;;  %8108 = vst [vmem:[#allocation44_spill] sm:$0xff] %v5602_v41  ;;  %v5605_v42 = vld [vmem:[%s5476_s17 + $0x2a0] sm:$0xff]  ;;  %v5608_v43 = vld [vmem:[%s5476_s17 + $0x2a8] sm:$0xff] }
  0x61   : > { %8109 = vst [vmem:[#allocation45_spill] sm:$0xff] %v5605_v42  ;;  %8110 = vst [vmem:[#allocation46_spill] sm:$0xff] %v5608_v43  ;;  %v5611_v44 = vld [vmem:[%s5476_s17 + $0x2c0] sm:$0xff]  ;;  %v5614_v45 = vld [vmem:[%s5476_s17 + $0x2c8] sm:$0xff] }
  0x62   : > { %8111 = vst [vmem:[#allocation47_spill] sm:$0xff] %v5611_v44  ;;  %8112 = vst [vmem:[#allocation48_spill] sm:$0xff] %v5614_v45  ;;  %v5617_v46 = vld [vmem:[%s5476_s17 + $0x2e0] sm:$0xff]  ;;  %v5620_v47 = vld [vmem:[%s5476_s17 + $0x2e8] sm:$0xff] }
  0x63   : > { %8113 = vst [vmem:[#allocation49_spill] sm:$0xff] %v5617_v46  ;;  %8114 = vst [vmem:[#allocation50_spill] sm:$0xff] %v5620_v47  ;;  %v5623_v48 = vld [vmem:[%s5476_s17 + $0x300] sm:$0xff]  ;;  %v5626_v49 = vld [vmem:[%s5476_s17 + $0x308] sm:$0xff] }
  0x64   : > { %8115 = vst [vmem:[#allocation51_spill] sm:$0xff] %v5623_v48  ;;  %8116 = vst [vmem:[#allocation52_spill] sm:$0xff] %v5626_v49  ;;  %v5629_v50 = vld [vmem:[%s5476_s17 + $0x320] sm:$0xff]  ;;  %v5632_v51 = vld [vmem:[%s5476_s17 + $0x328] sm:$0xff] }
  0x65   : > { %8117 = vst [vmem:[#allocation53_spill] sm:$0xff] %v5629_v50  ;;  %8118 = vst [vmem:[#allocation54_spill] sm:$0xff] %v5632_v51  ;;  %v5635_v52 = vld [vmem:[%s5476_s17 + $0x340] sm:$0xff]  ;;  %v5638_v53 = vld [vmem:[%s5476_s17 + $0x348] sm:$0xff] }
  0x66   : > { %8119 = vst [vmem:[#allocation55_spill] sm:$0xff] %v5635_v52  ;;  %8120 = vst [vmem:[#allocation56_spill] sm:$0xff] %v5638_v53  ;;  %v5641_v54 = vld [vmem:[%s5476_s17 + $0x360] sm:$0xff]  ;;  %v5644_v55 = vld [vmem:[%s5476_s17 + $0x368] sm:$0xff] }
  0x67   : > { %8121 = vst [vmem:[#allocation57_spill] sm:$0xff] %v5641_v54  ;;  %8122 = vst [vmem:[#allocation58_spill] sm:$0xff] %v5644_v55  ;;  %v5647_v56 = vld [vmem:[%s5476_s17 + $0x380] sm:$0xff]  ;;  %v5650_v57 = vld [vmem:[%s5476_s17 + $0x388] sm:$0xff] }
  0x68   : > { %8123 = vst [vmem:[#allocation59_spill] sm:$0xff] %v5647_v56  ;;  %8124 = vst [vmem:[#allocation60_spill] sm:$0xff] %v5650_v57  ;;  %v5653_v58 = vld [vmem:[%s5476_s17 + $0x3a0] sm:$0xff]  ;;  %v5656_v59 = vld [vmem:[%s5476_s17 + $0x3a8] sm:$0xff] }
  0x69   : > { %8125 = vst [vmem:[#allocation61_spill] sm:$0xff] %v5653_v58  ;;  %8126 = vst [vmem:[#allocation62_spill] sm:$0xff] %v5656_v59  ;;  %v5659_v60 = vld [vmem:[%s5476_s17 + $0x3c0] sm:$0xff]  ;;  %v5662_v61 = vld [vmem:[%s5476_s17 + $0x3c8] sm:$0xff] }
  0x6a   : > { %8127 = vst [vmem:[#allocation63_spill] sm:$0xff] %v5659_v60  ;;  %8128 = vst [vmem:[#allocation64_spill] sm:$0xff] %v5662_v61  ;;  %v5665_v62 = vld [vmem:[%s5476_s17 + $0x3e0] sm:$0xff]  ;;  %v5668_v63 = vld [vmem:[%s5476_s17 + $0x3e8] sm:$0xff] }
  0x6b   : > { %8129 = vst [vmem:[#allocation65_spill] sm:$0xff] %v5665_v62  ;;  %8130 = vst [vmem:[#allocation66_spill] sm:$0xff] %v5668_v63  ;;  %v5671_v33 = vld [vmem:[%s5476_s17 + $0x400] sm:$0xff]  ;;  %v5674_v35 = vld [vmem:[%s5476_s17 + $0x408] sm:$0xff] }
  0x6c   : > { %8131 = vst [vmem:[#allocation67_spill] sm:$0xff] %v5671_v33  ;;  %8132 = vst [vmem:[#allocation68_spill] sm:$0xff] %v5674_v35  ;;  %v5677_v37 = vld [vmem:[%s5476_s17 + $0x420] sm:$0xff]  ;;  %v5680_v39 = vld [vmem:[%s5476_s17 + $0x428] sm:$0xff] }
  0x6d   : > { %8133 = vst [vmem:[#allocation69_spill] sm:$0xff] %v5677_v37  ;;  %8134 = vst [vmem:[#allocation70_spill] sm:$0xff] %v5680_v39  ;;  %v5683_v41 = vld [vmem:[%s5476_s17 + $0x440] sm:$0xff]  ;;  %v5686_v43 = vld [vmem:[%s5476_s17 + $0x448] sm:$0xff] }
  0x6e   : > { %8135 = vst [vmem:[#allocation71_spill] sm:$0xff] %v5683_v41  ;;  %8136 = vst [vmem:[#allocation72_spill] sm:$0xff] %v5686_v43  ;;  %v5689_v45 = vld [vmem:[%s5476_s17 + $0x460] sm:$0xff]  ;;  %v5692_v47 = vld [vmem:[%s5476_s17 + $0x468] sm:$0xff] }
  0x6f   : > { %8137 = vst [vmem:[#allocation73_spill] sm:$0xff] %v5689_v45  ;;  %8138 = vst [vmem:[#allocation74_spill] sm:$0xff] %v5692_v47  ;;  %v5695_v49 = vld [vmem:[%s5476_s17 + $0x480] sm:$0xff]  ;;  %v5698_v51 = vld [vmem:[%s5476_s17 + $0x488] sm:$0xff] }
  0x70   : > { %8139 = vst [vmem:[#allocation75_spill] sm:$0xff] %v5695_v49  ;;  %8140 = vst [vmem:[#allocation76_spill] sm:$0xff] %v5698_v51  ;;  %v5701_v53 = vld [vmem:[%s5476_s17 + $0x4a0] sm:$0xff]  ;;  %v5704_v55 = vld [vmem:[%s5476_s17 + $0x4a8] sm:$0xff] }
  0x71   : > { %8141 = vst [vmem:[#allocation77_spill] sm:$0xff] %v5701_v53  ;;  %8142 = vst [vmem:[#allocation78_spill] sm:$0xff] %v5704_v55  ;;  %v5707_v57 = vld [vmem:[%s5476_s17 + $0x4c0] sm:$0xff]  ;;  %v5710_v59 = vld [vmem:[%s5476_s17 + $0x4c8] sm:$0xff] }
  0x72   : > { %8143 = vst [vmem:[#allocation79_spill] sm:$0xff] %v5707_v57  ;;  %8144 = vst [vmem:[#allocation80_spill] sm:$0xff] %v5710_v59  ;;  %v5713_v61 = vld [vmem:[%s5476_s17 + $0x4e0] sm:$0xff]  ;;  %v5716_v63 = vld [vmem:[%s5476_s17 + $0x4e8] sm:$0xff] }
  0x73   : > { %8145 = vst [vmem:[#allocation81_spill] sm:$0xff] %v5713_v61  ;;  %8146 = vst [vmem:[#allocation82_spill] sm:$0xff] %v5716_v63  ;;  %v5719_v35 = vld [vmem:[%s5476_s17 + $0x500] sm:$0xff]  ;;  %v5722_v39 = vld [vmem:[%s5476_s17 + $0x508] sm:$0xff] }
  0x74   : > { %8147 = vst [vmem:[#allocation83_spill] sm:$0xff] %v5719_v35  ;;  %8148 = vst [vmem:[#allocation84_spill] sm:$0xff] %v5722_v39  ;;  %v5725_v1 = vld [vmem:[%s5476_s17 + $0x520] sm:$0xff]  ;;  %v5728_v3 = vld [vmem:[%s5476_s17 + $0x528] sm:$0xff] }
  0x75   : > { %8149 = vst [vmem:[#allocation85_spill] sm:$0xff] %v5728_v3  ;;  %v5731_v43 = vld [vmem:[%s5476_s17 + $0x540] sm:$0xff]  ;;  %v5734_v47 = vld [vmem:[%s5476_s17 + $0x548] sm:$0xff] }
  0x76   : > { %8150 = vst [vmem:[#allocation86_spill] sm:$0xff] %v5734_v47  ;;  %v5737_v5 = vld [vmem:[%s5476_s17 + $0x560] sm:$0xff]  ;;  %v5740_v7 = vld [vmem:[%s5476_s17 + $0x568] sm:$0xff] }
  0x77   : > { %8151 = vst [vmem:[#allocation87_spill] sm:$0xff] %v5740_v7  ;;  %v5743_v51 = vld [vmem:[%s5476_s17 + $0x580] sm:$0xff]  ;;  %v5746_v55 = vld [vmem:[%s5476_s17 + $0x588] sm:$0xff] }
  0x78   : > { %8152 = vst [vmem:[#allocation88_spill] sm:$0xff] %v5746_v55  ;;  %v5749_v9 = vld [vmem:[%s5476_s17 + $0x5a0] sm:$0xff]  ;;  %v5752_v11 = vld [vmem:[%s5476_s17 + $0x5a8] sm:$0xff] }
  0x79   : > { %8153 = vst [vmem:[#allocation89_spill] sm:$0xff] %v5752_v11  ;;  %v5755_v59 = vld [vmem:[%s5476_s17 + $0x5c0] sm:$0xff]  ;;  %v5758_v63 = vld [vmem:[%s5476_s17 + $0x5c8] sm:$0xff] }
  0x7a   : > { %8154 = vst [vmem:[#allocation90_spill] sm:$0xff] %v5755_v59  ;;  %8155 = vst [vmem:[#allocation91_spill] sm:$0xff] %v5758_v63  ;;  %v5761_v13 = vld [vmem:[%s5476_s17 + $0x5e0] sm:$0xff]  ;;  %v5764_v15 = vld [vmem:[%s5476_s17 + $0x5e8] sm:$0xff] }
  0x7b   : > { %8156 = vst [vmem:[#allocation92_spill] sm:$0xff] %v5761_v13  ;;  %8157 = vst [vmem:[#allocation93_spill] sm:$0xff] %v5764_v15  ;;  %v5767_v39 = vld [vmem:[%s5476_s17 + $0x600] sm:$0xff]  ;;  %v5770_v3 = vld [vmem:[%s5476_s17 + $0x608] sm:$0xff] }
  0x7c   : > { %8158 = vst [vmem:[#allocation94_spill] sm:$0xff] %v5767_v39  ;;  %8159 = vst [vmem:[#allocation95_spill] sm:$0xff] %v5770_v3  ;;  %v5773_v17 = vld [vmem:[%s5476_s17 + $0x620] sm:$0xff]  ;;  %v5776_v19 = vld [vmem:[%s5476_s17 + $0x628] sm:$0xff] }
  0x7d   : > { %8160 = vst [vmem:[#allocation96_spill] sm:$0xff] %v5773_v17  ;;  %8161 = vst [vmem:[#allocation97_spill] sm:$0xff] %v5776_v19  ;;  %v5779_v47 = vld [vmem:[%s5476_s17 + $0x640] sm:$0xff]  ;;  %v5782_v7 = vld [vmem:[%s5476_s17 + $0x648] sm:$0xff] }
  0x7e   : > { %8162 = vst [vmem:[#allocation98_spill] sm:$0xff] %v5779_v47  ;;  %8163 = vst [vmem:[#allocation99_spill] sm:$0xff] %v5782_v7  ;;  %v5785_v21 = vld [vmem:[%s5476_s17 + $0x660] sm:$0xff]  ;;  %v5788_v23 = vld [vmem:[%s5476_s17 + $0x668] sm:$0xff] }
  0x7f   : > { %8164 = vst [vmem:[#allocation100_spill] sm:$0xff] %v5785_v21  ;;  %8165 = vst [vmem:[#allocation101_spill] sm:$0xff] %v5788_v23  ;;  %v5791_v3 = vld [vmem:[%s5476_s17 + $0x680] sm:$0xff]  ;;  %v5794_v55 = vld [vmem:[%s5476_s17 + $0x688] sm:$0xff] }
  0x80   : > { %8166 = vst [vmem:[#allocation102_spill] sm:$0xff] %v5791_v3  ;;  %8167 = vst [vmem:[#allocation103_spill] sm:$0xff] %v5794_v55  ;;  %v5797_v19 = vld [vmem:[%s5476_s17 + $0x6a0] sm:$0xff]  ;;  %v5800_v11 = vld [vmem:[%s5476_s17 + $0x6a8] sm:$0xff] }
  0x81   : > { %8168 = vst [vmem:[#allocation104_spill] sm:$0xff] %v5797_v19  ;;  %8169 = vst [vmem:[#allocation105_spill] sm:$0xff] %v5800_v11  ;;  %v5803_v7 = vld [vmem:[%s5476_s17 + $0x6c0] sm:$0xff]  ;;  %v5806_v25 = vld [vmem:[%s5476_s17 + $0x6c8] sm:$0xff] }
  0x82   : > { %8170 = vst [vmem:[#allocation106_spill] sm:$0xff] %v5803_v7  ;;  %8171 = vst [vmem:[#allocation107_spill] sm:$0xff] %v5806_v25  ;;  %v5809_v23 = vld [vmem:[%s5476_s17 + $0x6e0] sm:$0xff]  ;;  %v5812_v27 = vld [vmem:[%s5476_s17 + $0x6e8] sm:$0xff] }
  0x83   : > { %8172 = vst [vmem:[#allocation108_spill] sm:$0xff] %v5809_v23  ;;  %8173 = vst [vmem:[#allocation109_spill] sm:$0xff] %v5812_v27  ;;  %v5815_v55 = vld [vmem:[%s5476_s17 + $0x700] sm:$0xff]  ;;  %v5818_v63 = vld [vmem:[%s5476_s17 + $0x708] sm:$0xff] }
  0x84   : > { %8174 = vst [vmem:[#allocation110_spill] sm:$0xff] %v5815_v55  ;;  %8175 = vst [vmem:[#allocation111_spill] sm:$0xff] %v5818_v63  ;;  %v5821_v11 = vld [vmem:[%s5476_s17 + $0x720] sm:$0xff]  ;;  %v5824_v15 = vld [vmem:[%s5476_s17 + $0x728] sm:$0xff] }
  0x85   : > { %8176 = vst [vmem:[#allocation112_spill] sm:$0xff] %v5821_v11  ;;  %8177 = vst [vmem:[#allocation113_spill] sm:$0xff] %v5824_v15  ;;  %v5827_v25 = vld [vmem:[%s5476_s17 + $0x740] sm:$0xff]  ;;  %v5830_v29 = vld [vmem:[%s5476_s17 + $0x748] sm:$0xff] }
  0x86   : > { %8178 = vst [vmem:[#allocation114_spill] sm:$0xff] %v5827_v25  ;;  %8179 = vst [vmem:[#allocation115_spill] sm:$0xff] %v5830_v29  ;;  %v5833_v27 = vld [vmem:[%s5476_s17 + $0x760] sm:$0xff]  ;;  %v5836_v31 = vld [vmem:[%s5476_s17 + $0x768] sm:$0xff] }
  0x87   : > { %8180 = vst [vmem:[#allocation116_spill] sm:$0xff] %v5833_v27  ;;  %8181 = vst [vmem:[#allocation117_spill] sm:$0xff] %v5836_v31  ;;  %v5839_v63 = vld [vmem:[%s5476_s17 + $0x780] sm:$0xff]  ;;  %v5842_v39 = vld [vmem:[%s5476_s17 + $0x788] sm:$0xff] }
  0x88   : > { %8182 = vst [vmem:[#allocation118_spill] sm:$0xff] %v5839_v63  ;;  %8183 = vst [vmem:[#allocation119_spill] sm:$0xff] %v5842_v39  ;;  %v5845_v15 = vld [vmem:[%s5476_s17 + $0x7a0] sm:$0xff]  ;;  %v5848_v17 = vld [vmem:[%s5476_s17 + $0x7a8] sm:$0xff] }
  0x89   : > { %8184 = vst [vmem:[#allocation120_spill] sm:$0xff] %v5845_v15  ;;  %8185 = vst [vmem:[#allocation121_spill] sm:$0xff] %v5848_v17  ;;  %v5851_v29 = vld [vmem:[%s5476_s17 + $0x7c0] sm:$0xff]  ;;  %v5854_v32 = vld [vmem:[%s5476_s17 + $0x7c8] sm:$0xff] }
  0x8a   : > { %8186 = vst [vmem:[#allocation122_spill] sm:$0xff] %v5851_v29  ;;  %8187 = vst [vmem:[#allocation123_spill] sm:$0xff] %v5854_v32  ;;  %v5857_v31 = vld [vmem:[%s5476_s17 + $0x7e0] sm:$0xff]  ;;  %v5860_v34 = vld [vmem:[%s5476_s17 + $0x7e8] sm:$0xff] }
  0x8b   : > { %8188 = vst [vmem:[#allocation124_spill] sm:$0xff] %v5857_v31  ;;  %8189 = vst [vmem:[#allocation125_spill] sm:$0xff] %v5860_v34  ;;  %v5863_v39 = vld [vmem:[%s5476_s17 + $0x800] sm:$0xff]  ;;  %v5866_v47 = vld [vmem:[%s5476_s17 + $0x808] sm:$0xff] }
  0x8c   : > { %8190 = vst [vmem:[#allocation126_spill] sm:$0xff] %v5863_v39  ;;  %8191 = vst [vmem:[#allocation127_spill] sm:$0xff] %v5866_v47  ;;  %v5869_v17 = vld [vmem:[%s5476_s17 + $0x820] sm:$0xff]  ;;  %v5872_v21 = vld [vmem:[%s5476_s17 + $0x828] sm:$0xff] }
  0x8d   : > { %8192 = vst [vmem:[#allocation128_spill] sm:$0xff] %v5869_v17  ;;  %8193 = vst [vmem:[#allocation129_spill] sm:$0xff] %v5872_v21  ;;  %v5875_v32 = vld [vmem:[%s5476_s17 + $0x840] sm:$0xff]  ;;  %v5878_v36 = vld [vmem:[%s5476_s17 + $0x848] sm:$0xff] }
  0x8e   : > { %8194 = vst [vmem:[#allocation130_spill] sm:$0xff] %v5875_v32  ;;  %8195 = vst [vmem:[#allocation131_spill] sm:$0xff] %v5878_v36  ;;  %v5881_v34 = vld [vmem:[%s5476_s17 + $0x860] sm:$0xff]  ;;  %v5884_v39 = vld [vmem:[%s5476_s17 + $0x868] sm:$0xff] }
  0x8f   : > { %8196 = vst [vmem:[#allocation132_spill] sm:$0xff] %v5881_v34  ;;  %8197 = vst [vmem:[#allocation133_spill] sm:$0xff] %v5884_v39  ;;  %v5887_v47 = vld [vmem:[%s5476_s17 + $0x880] sm:$0xff]  ;;  %v5890_v17 = vld [vmem:[%s5476_s17 + $0x888] sm:$0xff] }
  0x90   : > { %8198 = vst [vmem:[#allocation134_spill] sm:$0xff] %v5887_v47  ;;  %8199 = vst [vmem:[#allocation135_spill] sm:$0xff] %v5890_v17  ;;  %v5893_v21 = vld [vmem:[%s5476_s17 + $0x8a0] sm:$0xff]  ;;  %v5896_v32 = vld [vmem:[%s5476_s17 + $0x8a8] sm:$0xff] }
  0x91   : > { %8200 = vst [vmem:[#allocation136_spill] sm:$0xff] %v5893_v21  ;;  %8201 = vst [vmem:[#allocation137_spill] sm:$0xff] %v5896_v32  ;;  %v5899_v36 = vld [vmem:[%s5476_s17 + $0x8c0] sm:$0xff]  ;;  %v5902_v34 = vld [vmem:[%s5476_s17 + $0x8c8] sm:$0xff] }
  0x92   : > { %8202 = vst [vmem:[#allocation138_spill] sm:$0xff] %v5899_v36  ;;  %8203 = vst [vmem:[#allocation139_spill] sm:$0xff] %v5902_v34  ;;  %v5905_v39 = vld [vmem:[%s5476_s17 + $0x8e0] sm:$0xff]  ;;  %v5908_v47 = vld [vmem:[%s5476_s17 + $0x8e8] sm:$0xff] }
  0x93   : > { %8204 = vst [vmem:[#allocation140_spill] sm:$0xff] %v5905_v39  ;;  %8205 = vst [vmem:[#allocation141_spill] sm:$0xff] %v5908_v47  ;;  %v5911_v17 = vld [vmem:[%s5476_s17 + $0x900] sm:$0xff]  ;;  %v5914_v21 = vld [vmem:[%s5476_s17 + $0x908] sm:$0xff] }
  0x94   : > { %8206 = vst [vmem:[#allocation142_spill] sm:$0xff] %v5911_v17  ;;  %8207 = vst [vmem:[#allocation143_spill] sm:$0xff] %v5914_v21  ;;  %v5917_v32 = vld [vmem:[%s5476_s17 + $0x920] sm:$0xff]  ;;  %v5920_v36 = vld [vmem:[%s5476_s17 + $0x928] sm:$0xff] }
  0x95   : > { %8208 = vst [vmem:[#allocation144_spill] sm:$0xff] %v5917_v32  ;;  %8209 = vst [vmem:[#allocation145_spill] sm:$0xff] %v5920_v36  ;;  %v5923_v34 = vld [vmem:[%s5476_s17 + $0x940] sm:$0xff]  ;;  %v5926_v39 = vld [vmem:[%s5476_s17 + $0x948] sm:$0xff] }
  0x96   : > { %8210 = vst [vmem:[#allocation146_spill] sm:$0xff] %v5923_v34  ;;  %8211 = vst [vmem:[#allocation147_spill] sm:$0xff] %v5926_v39  ;;  %v5929_v47 = vld [vmem:[%s5476_s17 + $0x960] sm:$0xff]  ;;  %v5932_v17 = vld [vmem:[%s5476_s17 + $0x968] sm:$0xff] }
  0x97   : > { %8212 = vst [vmem:[#allocation148_spill] sm:$0xff] %v5929_v47  ;;  %8213 = vst [vmem:[#allocation149_spill] sm:$0xff] %v5932_v17  ;;  %v5935_v21 = vld [vmem:[%s5476_s17 + $0x980] sm:$0xff]  ;;  %v5938_v32 = vld [vmem:[%s5476_s17 + $0x988] sm:$0xff] }
  0x98   : > { %8214 = vst [vmem:[#allocation150_spill] sm:$0xff] %v5935_v21  ;;  %8215 = vst [vmem:[#allocation151_spill] sm:$0xff] %v5938_v32  ;;  %v5941_v36 = vld [vmem:[%s5476_s17 + $0x9a0] sm:$0xff]  ;;  %v5944_v34 = vld [vmem:[%s5476_s17 + $0x9a8] sm:$0xff] }
  0x99   : > { %8216 = vst [vmem:[#allocation152_spill] sm:$0xff] %v5941_v36  ;;  %8217 = vst [vmem:[#allocation153_spill] sm:$0xff] %v5944_v34  ;;  %v5947_v39 = vld [vmem:[%s5476_s17 + $0x9c0] sm:$0xff]  ;;  %v5950_v47 = vld [vmem:[%s5476_s17 + $0x9c8] sm:$0xff] }
  0x9a   : > { %8218 = vst [vmem:[#allocation154_spill] sm:$0xff] %v5947_v39  ;;  %8219 = vst [vmem:[#allocation155_spill] sm:$0xff] %v5950_v47  ;;  %v5953_v17 = vld [vmem:[%s5476_s17 + $0x9e0] sm:$0xff]  ;;  %v5956_v21 = vld [vmem:[%s5476_s17 + $0x9e8] sm:$0xff] }
  0x9b   : > { %8220 = vst [vmem:[#allocation156_spill] sm:$0xff] %v5953_v17  ;;  %8221 = vst [vmem:[#allocation157_spill] sm:$0xff] %v5956_v21  ;;  %v5959_v32 = vld [vmem:[%s5476_s17 + $0xa00] sm:$0xff]  ;;  %v5962_v36 = vld [vmem:[%s5476_s17 + $0xa08] sm:$0xff] }
  0x9c   : > { %8222 = vst [vmem:[#allocation158_spill] sm:$0xff] %v5959_v32  ;;  %8223 = vst [vmem:[#allocation159_spill] sm:$0xff] %v5962_v36  ;;  %v5965_v34 = vld [vmem:[%s5476_s17 + $0xa20] sm:$0xff]  ;;  %v5968_v39 = vld [vmem:[%s5476_s17 + $0xa28] sm:$0xff] }
  0x9d   : > { %8224 = vst [vmem:[#allocation160_spill] sm:$0xff] %v5965_v34  ;;  %8225 = vst [vmem:[#allocation161_spill] sm:$0xff] %v5968_v39  ;;  %v5971_v47 = vld [vmem:[%s5476_s17 + $0xa40] sm:$0xff]  ;;  %v5974_v17 = vld [vmem:[%s5476_s17 + $0xa48] sm:$0xff] }
  0x9e   : > { %8226 = vst [vmem:[#allocation162_spill] sm:$0xff] %v5971_v47  ;;  %8227 = vst [vmem:[#allocation163_spill] sm:$0xff] %v5974_v17  ;;  %v5977_v21 = vld [vmem:[%s5476_s17 + $0xa60] sm:$0xff]  ;;  %v5980_v32 = vld [vmem:[%s5476_s17 + $0xa68] sm:$0xff] }
  0x9f   : > { %8228 = vst [vmem:[#allocation164_spill] sm:$0xff] %v5977_v21  ;;  %8229 = vst [vmem:[#allocation165_spill] sm:$0xff] %v5980_v32  ;;  %v5983_v36 = vld [vmem:[%s5476_s17 + $0xa80] sm:$0xff]  ;;  %v5986_v34 = vld [vmem:[%s5476_s17 + $0xa88] sm:$0xff] }
  0xa0   : > { %8230 = vst [vmem:[#allocation166_spill] sm:$0xff] %v5983_v36  ;;  %8231 = vst [vmem:[#allocation167_spill] sm:$0xff] %v5986_v34  ;;  %v5989_v39 = vld [vmem:[%s5476_s17 + $0xaa0] sm:$0xff]  ;;  %v5992_v47 = vld [vmem:[%s5476_s17 + $0xaa8] sm:$0xff] }
  0xa1   : > { %8232 = vst [vmem:[#allocation168_spill] sm:$0xff] %v5989_v39  ;;  %8233 = vst [vmem:[#allocation169_spill] sm:$0xff] %v5992_v47  ;;  %v5995_v17 = vld [vmem:[%s5476_s17 + $0xac0] sm:$0xff]  ;;  %v5998_v21 = vld [vmem:[%s5476_s17 + $0xac8] sm:$0xff] }
  0xa2   : > { %8234 = vst [vmem:[#allocation170_spill] sm:$0xff] %v5995_v17  ;;  %8235 = vst [vmem:[#allocation171_spill] sm:$0xff] %v5998_v21  ;;  %v6001_v32 = vld [vmem:[%s5476_s17 + $0xae0] sm:$0xff]  ;;  %v6004_v36 = vld [vmem:[%s5476_s17 + $0xae8] sm:$0xff] }
  0xa3   : > { %8236 = vst [vmem:[#allocation172_spill] sm:$0xff] %v6001_v32  ;;  %8237 = vst [vmem:[#allocation173_spill] sm:$0xff] %v6004_v36  ;;  %v6007_v34 = vld [vmem:[%s5476_s17 + $0xb00] sm:$0xff]  ;;  %v6010_v39 = vld [vmem:[%s5476_s17 + $0xb08] sm:$0xff] }
  0xa4   : > { %8238 = vst [vmem:[#allocation174_spill] sm:$0xff] %v6007_v34  ;;  %8239 = vst [vmem:[#allocation175_spill] sm:$0xff] %v6010_v39  ;;  %v6013_v47 = vld [vmem:[%s5476_s17 + $0xb20] sm:$0xff]  ;;  %v6016_v17 = vld [vmem:[%s5476_s17 + $0xb28] sm:$0xff] }
  0xa5   : > { %8240 = vst [vmem:[#allocation176_spill] sm:$0xff] %v6013_v47  ;;  %8241 = vst [vmem:[#allocation177_spill] sm:$0xff] %v6016_v17  ;;  %v6019_v21 = vld [vmem:[%s5476_s17 + $0xb40] sm:$0xff]  ;;  %v6022_v32 = vld [vmem:[%s5476_s17 + $0xb48] sm:$0xff] }
  0xa6   : > { %8242 = vst [vmem:[#allocation178_spill] sm:$0xff] %v6019_v21  ;;  %8243 = vst [vmem:[#allocation179_spill] sm:$0xff] %v6022_v32  ;;  %v6025_v36 = vld [vmem:[%s5476_s17 + $0xb60] sm:$0xff]  ;;  %v6028_v34 = vld [vmem:[%s5476_s17 + $0xb68] sm:$0xff] }
  0xa7   : > { %8244 = vst [vmem:[#allocation180_spill] sm:$0xff] %v6025_v36  ;;  %8245 = vst [vmem:[#allocation181_spill] sm:$0xff] %v6028_v34  ;;  %v6031_v39 = vld [vmem:[%s5476_s17 + $0xb80] sm:$0xff]  ;;  %v6034_v47 = vld [vmem:[%s5476_s17 + $0xb88] sm:$0xff] }
  0xa8   : > { %8246 = vst [vmem:[#allocation182_spill] sm:$0xff] %v6031_v39  ;;  %8247 = vst [vmem:[#allocation183_spill] sm:$0xff] %v6034_v47  ;;  %v6037_v17 = vld [vmem:[%s5476_s17 + $0xba0] sm:$0xff]  ;;  %v6040_v21 = vld [vmem:[%s5476_s17 + $0xba8] sm:$0xff] }
  0xa9   : > { %8248 = vst [vmem:[#allocation184_spill] sm:$0xff] %v6037_v17  ;;  %8249 = vst [vmem:[#allocation185_spill] sm:$0xff] %v6040_v21  ;;  %v6043_v32 = vld [vmem:[%s5476_s17 + $0xbc0] sm:$0xff]  ;;  %v6046_v36 = vld [vmem:[%s5476_s17 + $0xbc8] sm:$0xff] }
  0xaa   : > { %8250 = vst [vmem:[#allocation186_spill] sm:$0xff] %v6043_v32  ;;  %8251 = vst [vmem:[#allocation187_spill] sm:$0xff] %v6046_v36  ;;  %v6049_v34 = vld [vmem:[%s5476_s17 + $0xbe0] sm:$0xff]  ;;  %v6052_v39 = vld [vmem:[%s5476_s17 + $0xbe8] sm:$0xff] }
  0xab   : > { %8252 = vst [vmem:[#allocation188_spill] sm:$0xff] %v6049_v34  ;;  %8253 = vst [vmem:[#allocation189_spill] sm:$0xff] %v6052_v39  ;;  %v6055_v47 = vld [vmem:[%s5476_s17 + $0xc00] sm:$0xff]  ;;  %v6058_v17 = vld [vmem:[%s5476_s17 + $0xc08] sm:$0xff] }
  0xac   : > { %8254 = vst [vmem:[#allocation190_spill] sm:$0xff] %v6055_v47  ;;  %8255 = vst [vmem:[#allocation191_spill] sm:$0xff] %v6058_v17  ;;  %v6061_v21 = vld [vmem:[%s5476_s17 + $0xc20] sm:$0xff]  ;;  %v6064_v32 = vld [vmem:[%s5476_s17 + $0xc28] sm:$0xff] }
  0xad   : > { %8256 = vst [vmem:[#allocation192_spill] sm:$0xff] %v6061_v21  ;;  %8257 = vst [vmem:[#allocation193_spill] sm:$0xff] %v6064_v32  ;;  %v6067_v36 = vld [vmem:[%s5476_s17 + $0xc40] sm:$0xff]  ;;  %v6070_v34 = vld [vmem:[%s5476_s17 + $0xc48] sm:$0xff] }
  0xae   : > { %8258 = vst [vmem:[#allocation194_spill] sm:$0xff] %v6067_v36  ;;  %8259 = vst [vmem:[#allocation195_spill] sm:$0xff] %v6070_v34  ;;  %v6073_v39 = vld [vmem:[%s5476_s17 + $0xc60] sm:$0xff]  ;;  %v6076_v47 = vld [vmem:[%s5476_s17 + $0xc68] sm:$0xff] }
  0xaf   : > { %8260 = vst [vmem:[#allocation196_spill] sm:$0xff] %v6073_v39  ;;  %8261 = vst [vmem:[#allocation197_spill] sm:$0xff] %v6076_v47  ;;  %v6079_v17 = vld [vmem:[%s5476_s17 + $0xc80] sm:$0xff]  ;;  %v6082_v21 = vld [vmem:[%s5476_s17 + $0xc88] sm:$0xff] }
  0xb0   : > { %8262 = vst [vmem:[#allocation198_spill] sm:$0xff] %v6079_v17  ;;  %8263 = vst [vmem:[#allocation199_spill] sm:$0xff] %v6082_v21  ;;  %v6085_v32 = vld [vmem:[%s5476_s17 + $0xca0] sm:$0xff]  ;;  %v6088_v36 = vld [vmem:[%s5476_s17 + $0xca8] sm:$0xff] }
  0xb1   : > { %8264 = vst [vmem:[#allocation200_spill] sm:$0xff] %v6085_v32  ;;  %8265 = vst [vmem:[#allocation201_spill] sm:$0xff] %v6088_v36  ;;  %v6091_v34 = vld [vmem:[%s5476_s17 + $0xcc0] sm:$0xff]  ;;  %v6094_v39 = vld [vmem:[%s5476_s17 + $0xcc8] sm:$0xff] }
  0xb2   : > { %8266 = vst [vmem:[#allocation202_spill] sm:$0xff] %v6091_v34  ;;  %8267 = vst [vmem:[#allocation203_spill] sm:$0xff] %v6094_v39  ;;  %v6097_v47 = vld [vmem:[%s5476_s17 + $0xce0] sm:$0xff]  ;;  %v6100_v17 = vld [vmem:[%s5476_s17 + $0xce8] sm:$0xff] }
  0xb3   : > { %8268 = vst [vmem:[#allocation204_spill] sm:$0xff] %v6097_v47  ;;  %8269 = vst [vmem:[#allocation205_spill] sm:$0xff] %v6100_v17  ;;  %v6103_v21 = vld [vmem:[%s5476_s17 + $0xd00] sm:$0xff]  ;;  %v6106_v32 = vld [vmem:[%s5476_s17 + $0xd08] sm:$0xff] }
  0xb4   : > { %8270 = vst [vmem:[#allocation206_spill] sm:$0xff] %v6103_v21  ;;  %8271 = vst [vmem:[#allocation207_spill] sm:$0xff] %v6106_v32  ;;  %v6109_v36 = vld [vmem:[%s5476_s17 + $0xd20] sm:$0xff]  ;;  %v6112_v34 = vld [vmem:[%s5476_s17 + $0xd28] sm:$0xff] }
  0xb5   : > { %8272 = vst [vmem:[#allocation208_spill] sm:$0xff] %v6109_v36  ;;  %8273 = vst [vmem:[#allocation209_spill] sm:$0xff] %v6112_v34  ;;  %v6115_v39 = vld [vmem:[%s5476_s17 + $0xd40] sm:$0xff]  ;;  %v6118_v47 = vld [vmem:[%s5476_s17 + $0xd48] sm:$0xff] }
  0xb6   : > { %8274 = vst [vmem:[#allocation210_spill] sm:$0xff] %v6115_v39  ;;  %8275 = vst [vmem:[#allocation211_spill] sm:$0xff] %v6118_v47  ;;  %v6121_v17 = vld [vmem:[%s5476_s17 + $0xd60] sm:$0xff]  ;;  %v6124_v21 = vld [vmem:[%s5476_s17 + $0xd68] sm:$0xff] }
  0xb7   : > { %8276 = vst [vmem:[#allocation212_spill] sm:$0xff] %v6121_v17  ;;  %8277 = vst [vmem:[#allocation213_spill] sm:$0xff] %v6124_v21  ;;  %v6127_v32 = vld [vmem:[%s5476_s17 + $0xd80] sm:$0xff]  ;;  %v6130_v36 = vld [vmem:[%s5476_s17 + $0xd88] sm:$0xff] }
  0xb8   : > { %8278 = vst [vmem:[#allocation214_spill] sm:$0xff] %v6127_v32  ;;  %8279 = vst [vmem:[#allocation215_spill] sm:$0xff] %v6130_v36  ;;  %v6133_v34 = vld [vmem:[%s5476_s17 + $0xda0] sm:$0xff]  ;;  %v6136_v39 = vld [vmem:[%s5476_s17 + $0xda8] sm:$0xff] }
  0xb9   : > { %8280 = vst [vmem:[#allocation216_spill] sm:$0xff] %v6133_v34  ;;  %8281 = vst [vmem:[#allocation217_spill] sm:$0xff] %v6136_v39  ;;  %v6139_v47 = vld [vmem:[%s5476_s17 + $0xdc0] sm:$0xff]  ;;  %v6142_v17 = vld [vmem:[%s5476_s17 + $0xdc8] sm:$0xff] }
  0xba   : > { %8282 = vst [vmem:[#allocation218_spill] sm:$0xff] %v6139_v47  ;;  %8283 = vst [vmem:[#allocation219_spill] sm:$0xff] %v6142_v17  ;;  %v6145_v21 = vld [vmem:[%s5476_s17 + $0xde0] sm:$0xff]  ;;  %v6148_v32 = vld [vmem:[%s5476_s17 + $0xde8] sm:$0xff] }
  0xbb   : > { %8284 = vst [vmem:[#allocation220_spill] sm:$0xff] %v6145_v21  ;;  %8285 = vst [vmem:[#allocation221_spill] sm:$0xff] %v6148_v32  ;;  %v6151_v36 = vld [vmem:[%s5476_s17 + $0xe00] sm:$0xff]  ;;  %v6154_v34 = vld [vmem:[%s5476_s17 + $0xe08] sm:$0xff] }
  0xbc   : > { %8286 = vst [vmem:[#allocation222_spill] sm:$0xff] %v6151_v36  ;;  %8287 = vst [vmem:[#allocation223_spill] sm:$0xff] %v6154_v34  ;;  %v6157_v39 = vld [vmem:[%s5476_s17 + $0xe20] sm:$0xff]  ;;  %v6160_v47 = vld [vmem:[%s5476_s17 + $0xe28] sm:$0xff] }
  0xbd   : > { %8288 = vst [vmem:[#allocation224_spill] sm:$0xff] %v6157_v39  ;;  %8289 = vst [vmem:[#allocation225_spill] sm:$0xff] %v6160_v47  ;;  %v6163_v17 = vld [vmem:[%s5476_s17 + $0xe40] sm:$0xff]  ;;  %v6166_v21 = vld [vmem:[%s5476_s17 + $0xe48] sm:$0xff] }
  0xbe   : > { %8290 = vst [vmem:[#allocation226_spill] sm:$0xff] %v6163_v17  ;;  %8291 = vst [vmem:[#allocation227_spill] sm:$0xff] %v6166_v21  ;;  %v6169_v32 = vld [vmem:[%s5476_s17 + $0xe60] sm:$0xff]  ;;  %v6172_v36 = vld [vmem:[%s5476_s17 + $0xe68] sm:$0xff] }
  0xbf   : > { %8292 = vst [vmem:[#allocation228_spill] sm:$0xff] %v6169_v32  ;;  %8293 = vst [vmem:[#allocation229_spill] sm:$0xff] %v6172_v36  ;;  %v6175_v34 = vld [vmem:[%s5476_s17 + $0xe80] sm:$0xff]  ;;  %v6178_v39 = vld [vmem:[%s5476_s17 + $0xe88] sm:$0xff] }
  0xc0   : > { %8294 = vst [vmem:[#allocation230_spill] sm:$0xff] %v6175_v34  ;;  %8295 = vst [vmem:[#allocation231_spill] sm:$0xff] %v6178_v39  ;;  %v6181_v47 = vld [vmem:[%s5476_s17 + $0xea0] sm:$0xff]  ;;  %v6184_v17 = vld [vmem:[%s5476_s17 + $0xea8] sm:$0xff] }
  0xc1   : > { %8296 = vst [vmem:[#allocation232_spill] sm:$0xff] %v6181_v47  ;;  %8297 = vst [vmem:[#allocation233_spill] sm:$0xff] %v6184_v17  ;;  %v6187_v21 = vld [vmem:[%s5476_s17 + $0xec0] sm:$0xff]  ;;  %v6190_v32 = vld [vmem:[%s5476_s17 + $0xec8] sm:$0xff] }
  0xc2   : > { %8298 = vst [vmem:[#allocation234_spill] sm:$0xff] %v6187_v21  ;;  %8299 = vst [vmem:[#allocation235_spill] sm:$0xff] %v6190_v32  ;;  %v6193_v36 = vld [vmem:[%s5476_s17 + $0xee0] sm:$0xff]  ;;  %v6196_v34 = vld [vmem:[%s5476_s17 + $0xee8] sm:$0xff] }
  0xc3   : > { %8300 = vst [vmem:[#allocation236_spill] sm:$0xff] %v6193_v36  ;;  %8301 = vst [vmem:[#allocation237_spill] sm:$0xff] %v6196_v34  ;;  %v6199_v39 = vld [vmem:[%s5476_s17 + $0xf00] sm:$0xff]  ;;  %v6202_v47 = vld [vmem:[%s5476_s17 + $0xf08] sm:$0xff] }
  0xc4   : > { %8302 = vst [vmem:[#allocation238_spill] sm:$0xff] %v6199_v39  ;;  %8303 = vst [vmem:[#allocation239_spill] sm:$0xff] %v6202_v47  ;;  %v6205_v38 = vld [vmem:[%s5476_s17 + $0xf20] sm:$0xff]  ;;  %v6208_v17 = vld [vmem:[%s5476_s17 + $0xf28] sm:$0xff] }
  0xc5   : > { %8304 = vst [vmem:[#allocation240_spill] sm:$0xff] %v6205_v38  ;;  %8305 = vst [vmem:[#allocation241_spill] sm:$0xff] %v6208_v17  ;;  %v6211_v21 = vld [vmem:[%s5476_s17 + $0xf40] sm:$0xff]  ;;  %v6214_v3 = vld [vmem:[%s5476_s17 + $0xf48] sm:$0xff] }
  0xc6   : > { %8306 = vst [vmem:[#allocation242_spill] sm:$0xff] %v6211_v21  ;;  %8307 = vst [vmem:[#allocation243_spill] sm:$0xff] %v6214_v3  ;;  %v6217_v32 = vld [vmem:[%s5476_s17 + $0xf60] sm:$0xff]  ;;  %v6220_v36 = vld [vmem:[%s5476_s17 + $0xf68] sm:$0xff] }
  0xc7   : > { %8308 = vst [vmem:[#allocation244_spill] sm:$0xff] %v6217_v32  ;;  %8309 = vst [vmem:[#allocation245_spill] sm:$0xff] %v6220_v36  ;;  %v6223_v19 = vld [vmem:[%s5476_s17 + $0xf80] sm:$0xff]  ;;  %v6226_v34 = vld [vmem:[%s5476_s17 + $0xf88] sm:$0xff]  ;;  %525 = sbr.rel (%p4424_p11) target bundleno = 887 (0x377), region = 56 }
  0xc8   : > { %8310 = vst [vmem:[#allocation246_spill] sm:$0xff] %v6223_v19  ;;  %8311 = vst [vmem:[#allocation247_spill] sm:$0xff] %v6226_v34  ;;  %v6229_v39 = vld [vmem:[%s5476_s17 + $0xfa0] sm:$0xff]  ;;  %v6232_v40 = vld [vmem:[%s5476_s17 + $0xfa8] sm:$0xff] }
  0xc9   : > { %8312 = vst [vmem:[#allocation248_spill] sm:$0xff] %v6229_v39  ;;  %8313 = vst [vmem:[#allocation249_spill] sm:$0xff] %v6232_v40  ;;  %v6235_v47 = vld [vmem:[%s5476_s17 + $0xfc0] sm:$0xff]  ;;  %v6238_v38 = vld [vmem:[%s5476_s17 + $0xfc8] sm:$0xff] }
  0xca   : > { %8314 = vst [vmem:[#allocation250_spill] sm:$0xff] %v6235_v47  ;;  %8315 = vst [vmem:[#allocation251_spill] sm:$0xff] %v6238_v38  ;;  %v6241_v17 = vld [vmem:[%s5476_s17 + $0xfe0] sm:$0xff]  ;;  %v6244_v21 = vld [vmem:[%s5476_s17 + $0xfe8] sm:$0xff] }
  0xcb   : > { %8316 = vst [vmem:[#allocation252_spill] sm:$0xff] %v6241_v17  ;;  %8317 = vst [vmem:[#allocation253_spill] sm:$0xff] %v6244_v21 }
  0xcc   : > { %v4470_v3 = vcombine.high %v5563_v28, %v5569_v30  ;;  %v4534_v36 = vcombine.high %v5755_v59, %v5761_v13  ;;  %v4469_v34 = vcombine.low %v5563_v28, %v5569_v30  ;;  %v4533_v40 = vcombine.low %v5755_v59, %v5761_v13 }
  0xcd   : > { %v4466_v38 = vcombine.high %v5551_v24, %v5557_v26  ;;  %v4530_v21 = vcombine.high %v5743_v51, %v5749_v9  ;;  %v4465_v32 = vcombine.low %v5551_v24, %v5557_v26  ;;  %v4529_v19 = vcombine.low %v5743_v51, %v5749_v9 }
  0xce   : > { %1926 = vmatprep.subr.bf16.mxu0 %v4470_v3  ;;  %1979 = vmatprep.subr.bf16.mxu1 %v4534_v36  ;;  %v4462_v59 = vcombine.high %v5539_v20, %v5545_v22  ;;  %v4526_v13 = vcombine.high %v5731_v43, %v5737_v5  ;;  %v542_v3 = vld [vmem:[%s7583_s3] sm:$0xff]  ;;  %v4461_v36 = vcombine.low %v5539_v20, %v5545_v22  ;;  %vm2381_vm0 = vcmask 261120  }
  0xcf   : > { %1927 = vmatpush1.bf16.msra.mxu0 %v4469_v34  ;;  %1980 = vmatpush1.bf16.msra.mxu1 %v4533_v40  ;;  %v7990_v34 = vmov 0   ;;  %v4522_v40 = vcombine.high %v5719_v35, %v5725_v1 }
  0xd0   : > { %1928 = vmatprep.subr.bf16.mxu0 %v4466_v38  ;;  %1981 = vmatprep.subr.bf16.mxu1 %v4530_v21  ;;  %v4525_v21 = vcombine.low %v5731_v43, %v5737_v5  ;;  %v4458_v38 = vcombine.high %v5527_v16, %v5533_v18 }
  0xd1   : > { %5092 = vset.pattern.permute.xlu1 %v7990_v34  ;;  %5091 = vset.pattern.permute.xlu0 %v7990_v34  ;;  %v6298_v34 = vld [vmem:[#allocation3] sm:$0xff] }
  0xd2   : > { %548 = vperm.xlu1 %5092, %v542_v3   ;;  %v4518_v3 = vcombine.high %v5707_v57, %v5713_v61 }
  0xd3   : > { %1929 = vmatpush1.bf16.msra.mxu0 %v4465_v32  ;;  %1982 = vmatpush1.bf16.msra.mxu1 %v4529_v19  ;;  %v543_v19 = vld [vmem:[%s7583_s3 + $0x8] sm:$0xff]  ;;  %v4457_v32 = vcombine.low %v5527_v16, %v5533_v18 }
  0xd4   : > { %1930 = vmatprep.subr.bf16.mxu0 %v4462_v59  ;;  %1983 = vmatprep.subr.bf16.mxu1 %v4526_v13  ;;  %v4521_v13 = vcombine.low %v5719_v35, %v5725_v1  ;;  %v4454_v59 = vcombine.high %v5515_v12, %v5521_v14  ;;  %v6300_v35 = vld [vmem:[#allocation3 + $0x20] sm:$0xff] }
  0xd6   : > { %553 = vperm.xlu1 %5092, %v543_v19   ;;  %v6306_v19 = vld [vmem:[#allocation3 + $0x8] sm:$0xff] }
  0xd7   : > { %1931 = vmatpush1.bf16.msra.mxu0 %v4461_v36  ;;  %1984 = vmatpush1.bf16.msra.mxu1 %v4525_v21  ;;  %v4453_v36 = vcombine.low %v5515_v12, %v5521_v14  ;;  %v4517_v21 = vcombine.low %v5707_v57, %v5713_v61  ;;  %v4446_v61 = vcombine.high %v5491_v4, %v5497_v6 }
  0xd8   : > { %1932 = vmatprep.subr.bf16.mxu0 %v4458_v38  ;;  %1985 = vmatprep.subr.bf16.mxu1 %v4522_v40  ;;  %v4450_v38 = vcombine.high %v5503_v8, %v5509_v10  ;;  %v4514_v40 = vcombine.high %v5695_v49, %v5701_v53  ;;  %v4510_v12 = vcombine.high %v5683_v41, %v5689_v45 }
  0xdb   : > { %1933 = vmatpush1.bf16.msra.mxu0 %v4457_v32  ;;  %1986 = vmatpush1.bf16.msra.mxu1 %v4521_v13  ;;  %v6308_v32 = vld [vmem:[#allocation3 + $0x28] sm:$0xff]  ;;  %v6312_v13 = vcombine.high %v6298_v34, %v6300_v35 }
  0xdc   : > { %1934 = vmatprep.subr.bf16.mxu0 %v4454_v59  ;;  %1987 = vmatprep.subr.bf16.mxu1 %v4518_v3  ;;  %v4449_v59 = vcombine.low %v5503_v8, %v5509_v10  ;;  %v4513_v3 = vcombine.low %v5695_v49, %v5701_v53  ;;  %v6320_v57 = vcombine.high %v6306_v19, %v6308_v32 }
  0xdd   : > { %1958 = vmatprep.mubr.bf16.mxu0 %v6312_v13 }
  0xde   : > { %2011 = vmatprep.mubr.bf16.mxu1 %v6320_v57 }
  0xdf   : > { %1935 = vmatpush1.bf16.msra.mxu0 %v4453_v36  ;;  %1988 = vmatpush1.bf16.msra.mxu1 %v4517_v21  ;;  %v4445_v36 = vcombine.low %v5491_v4, %v5497_v6  ;;  %v4509_v21 = vcombine.low %v5683_v41, %v5689_v45 }
  0xe0   : > { %1936 = vmatprep.subr.bf16.mxu0 %v4450_v38  ;;  %1989 = vmatprep.subr.bf16.mxu1 %v4514_v40  ;;  %v4442_v38 = vcombine.high %v5479_v0, %v5485_v2  ;;  %v4506_v40 = vcombine.high %v5671_v33, %v5677_v37 }
  0xe3   : > { %1937 = vmatpush1.bf16.msra.mxu0 %v4449_v59  ;;  %1990 = vmatpush1.bf16.msra.mxu1 %v4513_v3  ;;  %v4441_v59 = vcombine.low %v5479_v0, %v5485_v2  ;;  %v4505_v3 = vcombine.low %v5671_v33, %v5677_v37 }
  0xe4   : > { %1938 = vmatprep.subr.bf16.mxu0 %v4446_v61  ;;  %1991 = vmatprep.subr.bf16.mxu1 %v4510_v12  ;;  %v4502_v61 = vcombine.high %v5659_v60, %v5665_v62  ;;  %v4566_v12 = vcombine.high %v5851_v29, %v5857_v31 }
  0xe7   : > { %1939 = vmatpush1.bf16.msra.mxu0 %v4445_v36  ;;  %1992 = vmatpush1.bf16.msra.mxu1 %v4509_v21  ;;  %v4501_v36 = vcombine.low %v5659_v60, %v5665_v62  ;;  %v4565_v21 = vcombine.low %v5851_v29, %v5857_v31  ;;  %v8405_v29 = vld [vmem:[#allocation84_spill] sm:$0xff] }
  0xe8   : > { %1940 = vmatprep.subr.bf16.mxu0 %v4442_v38  ;;  %1993 = vmatprep.subr.bf16.mxu1 %v4506_v40  ;;  %v4498_v38 = vcombine.high %v5647_v56, %v5653_v58  ;;  %v4562_v40 = vcombine.high %v5839_v63, %v5845_v15 }
  0xeb   : > { %1941 = vmatpush1.bf16.msra.mxu0 %v4441_v59  ;;  %1994 = vmatpush1.bf16.msra.mxu1 %v4505_v3  ;;  %v4497_v59 = vcombine.low %v5647_v56, %v5653_v58  ;;  %v4561_v3 = vcombine.low %v5839_v63, %v5845_v15 }
  0xec   : > { %1942 = vmatprep.subr.bf16.mxu0 %v4502_v61  ;;  %1995 = vmatprep.subr.bf16.mxu1 %v4566_v12  ;;  %v4494_v61 = vcombine.high %v5635_v52, %v5641_v54  ;;  %v4558_v12 = vcombine.high %v5827_v25, %v5833_v27 }
  0xef   : > { %1943 = vmatpush2.bf16.msra.mxu0 %v4501_v36  ;;  %1996 = vmatpush2.bf16.msra.mxu1 %v4565_v21  ;;  %v4493_v36 = vcombine.low %v5635_v52, %v5641_v54  ;;  %v4557_v21 = vcombine.low %v5827_v25, %v5833_v27  ;;  %v8336_v25 = vld [vmem:[#allocation214_spill] sm:$0xff] }
  0xf0   : > { %1944 = vmatprep.subr.bf16.mxu0 %v4498_v38  ;;  %1997 = vmatprep.subr.bf16.mxu1 %v4562_v40  ;;  %v4490_v38 = vcombine.high %v5623_v48, %v5629_v50  ;;  %v4554_v40 = vcombine.high %v5815_v55, %v5821_v11  ;;  %v8340_v52 = vld [vmem:[#allocation210_spill] sm:$0xff] }
  0xf1   : > { %v8344_v54 = vld [vmem:[#allocation206_spill] sm:$0xff] }
  0xf3   : > { %1945 = vmatpush2.bf16.msra.mxu0 %v4497_v59  ;;  %1998 = vmatpush2.bf16.msra.mxu1 %v4561_v3  ;;  %v4489_v59 = vcombine.low %v5623_v48, %v5629_v50  ;;  %v4553_v3 = vcombine.low %v5815_v55, %v5821_v11  ;;  %v8318_v55 = vld [vmem:[#allocation43_spill] sm:$0xff]  ;;  %v8320_v11 = vld [vmem:[#allocation102_spill] sm:$0xff] }
  0xf4   : > { %1946 = vmatprep.subr.bf16.mxu0 %v4494_v61  ;;  %1999 = vmatprep.subr.bf16.mxu1 %v4558_v12  ;;  %v4486_v61 = vcombine.high %v5611_v44, %v5617_v46  ;;  %v4550_v12 = vcombine.high %v5803_v7, %v5809_v23 }
  0xf7   : > { %1947 = vmatpush2.bf16.msra.mxu0 %v4493_v36  ;;  %2000 = vmatpush2.bf16.msra.mxu1 %v4557_v21  ;;  %v4485_v36 = vcombine.low %v5611_v44, %v5617_v46  ;;  %v4549_v21 = vcombine.low %v5803_v7, %v5809_v23  ;;  %v8321_v44 = vld [vmem:[#allocation41_spill] sm:$0xff]  ;;  %v8322_v7 = vld [vmem:[#allocation39_spill] sm:$0xff]  ;;  %v8324_v23 = vld [vmem:[#allocation98_spill] sm:$0xff] }
  0xf8   : > { %1948 = vmatprep.subr.bf16.mxu0 %v4490_v38  ;;  %2001 = vmatprep.subr.bf16.mxu1 %v4554_v40  ;;  %v4482_v38 = vcombine.high %v8318_v55, %v5605_v42  ;;  %v8319_v40 = vld [vmem:[#allocation104_spill] sm:$0xff] }
  0xf9   : > { %v4546_v48 = vcombine.high %v8320_v11, %v8319_v40 }
  0xfb   : > { %1949 = vmatpush2.bf16.msra.mxu0 %v4489_v59  ;;  %2002 = vmatpush2.bf16.msra.mxu1 %v4553_v3  ;;  %v4481_v59 = vcombine.low %v8318_v55, %v5605_v42  ;;  %v4545_v3 = vcombine.low %v8320_v11, %v8319_v40  ;;  %v8325_v55 = vld [vmem:[#allocation37_spill] sm:$0xff]  ;;  %v8326_v11 = vld [vmem:[#allocation35_spill] sm:$0xff]  ;;  %v8328_v40 = vld [vmem:[#allocation94_spill] sm:$0xff] }
  0xfc   : > { %1950 = vmatprep.subr.bf16.mxu0 %v4486_v61  ;;  %2003 = vmatprep.subr.bf16.mxu1 %v4550_v12  ;;  %v4478_v61 = vcombine.high %v8322_v7, %v8321_v44  ;;  %v8323_v12 = vld [vmem:[#allocation100_spill] sm:$0xff] }
  0xfd   : > { %v4542_v46 = vcombine.high %v8324_v23, %v8323_v12 }
  0xff   : > { %1951 = vmatpush2.bf16.msra.mxu0 %v4485_v36  ;;  %2004 = vmatpush2.bf16.msra.mxu1 %v4549_v21  ;;  %v4477_v36 = vcombine.low %v8322_v7, %v8321_v44  ;;  %v4541_v21 = vcombine.low %v8324_v23, %v8323_v12  ;;  %v544_v7 = vld [vmem:[%s7583_s3 + $0x10] sm:$0xff]  ;;  %v8329_v23 = vld [vmem:[#allocation156_spill] sm:$0xff] }
 0x100   : > { %1952 = vmatprep.subr.bf16.mxu0 %v4482_v38  ;;  %2005 = vmatprep.subr.bf16.mxu1 %v4546_v48  ;;  %v4474_v38 = vcombine.high %v8326_v11, %v8325_v55  ;;  %v8327_v48 = vld [vmem:[#allocation96_spill] sm:$0xff]  ;;  %v8330_v44 = vld [vmem:[#allocation154_spill] sm:$0xff] }
 0x101   : > { %v4538_v42 = vcombine.high %v8328_v40, %v8327_v48  ;;  %v8332_v12 = vld [vmem:[#allocation218_spill] sm:$0xff]  ;;  %558 = vperm.xlu0 %5091, %v544_v7   ;;  %v8335_v7 = vld [vmem:[#allocation216_spill] sm:$0xff] }
 0x102   : > { %v4658_v27 = vcombine.high %v8336_v25, %v8335_v7 }
 0x103   : > { %1953 = vmatpush2.bf16.msra.mxu0 %v4481_v59  ;;  %2006 = vmatpush2.bf16.msra.mxu1 %v4545_v3  ;;  %v4473_v59 = vcombine.low %v8326_v11, %v8325_v55  ;;  %v4537_v3 = vcombine.low %v8328_v40, %v8327_v48  ;;  %v6417_v55 = vcombine.low %v6306_v19, %v6308_v32  ;;  %v538_v11 = vld [vmem:[#allocation3 + $0x60] sm:$0xff]  ;;  %v535_v48 = vld [vmem:[#allocation3 + $0x48] sm:$0xff]  ;;  %v8334_v19 = vld [vmem:[#allocation150_spill] sm:$0xff] }
 0x104   : > { %1954 = vmatprep.subr.bf16.mxu0 %v4478_v61  ;;  %2007 = vmatprep.subr.bf16.mxu1 %v4542_v46  ;;  %v4598_v46 = vcombine.high %v8330_v44, %v8329_v23  ;;  %v8331_v61 = vld [vmem:[#allocation220_spill] sm:$0xff] }
 0x105   : > { %v4662_v50 = vcombine.high %v8332_v12, %v8331_v61  ;;  %v4661_v40 = vcombine.low %v8332_v12, %v8331_v61  ;;  %v8339_v12 = vld [vmem:[#allocation212_spill] sm:$0xff] }
 0x107   : > { %1955 = vmatpush2.bf16.msra.mxu0 %v4477_v36  ;;  %2008 = vmatpush2.bf16.msra.mxu1 %v4541_v21  ;;  %v534_v36 = vld [vmem:[#allocation3 + $0x40] sm:$0xff]  ;;  %v6413_v21 = vcombine.low %v6298_v34, %v6300_v35  ;;  %v545_v35 = vld [vmem:[%s7583_s3 + $0x18] sm:$0xff] }
 0x108   : > { %1956 = vmatprep.subr.bf16.mxu0 %v4474_v38  ;;  %2009 = vmatprep.subr.bf16.mxu1 %v4538_v42  ;;  %v539_v38 = vld [vmem:[#allocation3 + $0x68] sm:$0xff]  ;;  %v4597_v42 = vcombine.low %v8330_v44, %v8329_v23  ;;  %v8333_v34 = vld [vmem:[#allocation152_spill] sm:$0xff]  ;;  %v4657_v23 = vcombine.low %v8336_v25, %v8335_v7  ;;  %v6454_v25 = vld [vmem:[#allocation3 + $0x18] sm:$0xff]  ;;  %v4653_v7 = vcombine.low %v8340_v52, %v8339_v12 }
 0x109   : > { %v4594_v32 = vcombine.high %v8334_v19, %v8333_v34  ;;  %563 = vperm.xlu0 %5091, %v545_v35   ;;  %v8337_v44 = vld [vmem:[#allocation148_spill] sm:$0xff]  ;;  %v4654_v35 = vcombine.high %v8340_v52, %v8339_v12 }
 0x10a   : > { %v8347_v12 = vld [vmem:[#allocation204_spill] sm:$0xff] }
 0x10b   : > { %1957 = vmatpush2.bf16.msra.mxu0 %v4473_v59  ;;  %2010 = vmatpush2.bf16.msra.mxu1 %v4537_v3  ;;  %v6430_v59 = vcombine.high %v534_v36, %v538_v11  ;;  %v6432_v3 = vcombine.high %v535_v48, %v539_v38 }
 0x10c   : > { %2032 = vmatprep.subr.bf16.mxu0 %v4598_v46  ;;  %2085 = vmatprep.subr.bf16.mxu1 %v4662_v50  ;;  %v4593_v50 = vcombine.low %v8334_v19, %v8333_v34  ;;  %v8338_v46 = vld [vmem:[#allocation146_spill] sm:$0xff]  ;;  %v6450_v34 = vcombine.low %v535_v48, %v539_v38  ;;  %v8343_v38 = vld [vmem:[#allocation208_spill] sm:$0xff] }
 0x10d   : > { %v4590_v61 = vcombine.high %v8338_v46, %v8337_v44  ;;  %v6452_v19 = vld [vmem:[#allocation3 + $0x30] sm:$0xff]  ;;  %v4650_v63 = vcombine.high %v8344_v54, %v8343_v38 }
 0x10e   : > { %1959 = vmatmul.mubr.bf16.vlgmr.msra.gmra.mxu0 %v6413_v21  ;;  %2012 = vmatmul.mubr.bf16.vlgmr.msra.gmra.mxu1 %v6417_v55 }
 0x10f   : > { %2033 = vmatpush1.bf16.msra.mxu0 %v4597_v42  ;;  %2086 = vmatpush1.bf16.msra.mxu1 %v4661_v40  ;;  %v6446_v42 = vld [vmem:[#allocation3 + $0x10] sm:$0xff]  ;;  %v6448_v40 = vcombine.low %v534_v36, %v538_v11  ;;  %v8341_v36 = vld [vmem:[#allocation144_spill] sm:$0xff] }
 0x110   : > { %2034 = vmatprep.subr.bf16.mxu0 %v4594_v32  ;;  %2087 = vmatprep.subr.bf16.mxu1 %v4658_v27  ;;  %v6456_v27 = vld [vmem:[#allocation3 + $0x38] sm:$0xff]  ;;  %v4589_v32 = vcombine.low %v8338_v46, %v8337_v44  ;;  %v8342_v11 = vld [vmem:[#allocation142_spill] sm:$0xff]  ;;  %v6468_v15 = vcombine.high %v6446_v42, %v6452_v19  ;;  %v8345_v44 = vld [vmem:[#allocation140_spill] sm:$0xff] }
 0x111   : > { %1968 = vmatprep.mubr.bf16.mxu0 %v6430_v59  ;;  %2021 = vmatprep.mubr.bf16.mxu1 %v6432_v3  ;;  %v4586_v48 = vcombine.high %v8342_v11, %v8341_v36  ;;  %v4585_v52 = vcombine.low %v8342_v11, %v8341_v36  ;;  %v8346_v46 = vld [vmem:[#allocation138_spill] sm:$0xff]  ;;  %v8351_v11 = vld [vmem:[#allocation200_spill] sm:$0xff] }
 0x113   : > { %2035 = vmatpush1.bf16.msra.mxu0 %v4593_v50  ;;  %2088 = vmatpush1.bf16.msra.mxu1 %v4657_v23  ;;  %v6472_v50 = vcombine.high %v6454_v25, %v6456_v27  ;;  %v4649_v23 = vcombine.low %v8344_v54, %v8343_v38 }
 0x114   : > { %2036 = vmatprep.subr.bf16.mxu0 %v4590_v61  ;;  %2089 = vmatprep.subr.bf16.mxu1 %v4654_v35  ;;  %v4582_v61 = vcombine.high %v8346_v46, %v8345_v44  ;;  %v8348_v35 = vld [vmem:[#allocation202_spill] sm:$0xff] }
 0x115   : > { %v4646_v56 = vcombine.high %v8348_v35, %v8347_v12  ;;  %v4645_v54 = vcombine.low %v8348_v35, %v8347_v12  ;;  %v8356_v12 = vld [vmem:[#allocation194_spill] sm:$0xff] }
 0x116   : > { %1969 = vmatmul.mubr.bf16.gmra.mxu0 %v6448_v40  ;;  %2022 = vmatmul.mubr.bf16.gmra.mxu1 %v6450_v34 }
 0x117   : > { %2037 = vmatpush1.bf16.msra.mxu0 %v4589_v32  ;;  %2090 = vmatpush1.bf16.msra.mxu1 %v4653_v7  ;;  %v4581_v32 = vcombine.low %v8346_v46, %v8345_v44  ;;  %v8350_v7 = vld [vmem:[#allocation134_spill] sm:$0xff]  ;;  %v8353_v44 = vld [vmem:[#allocation132_spill] sm:$0xff] }
 0x118   : > { %2038 = vmatprep.subr.bf16.mxu0 %v4586_v48  ;;  %2091 = vmatprep.subr.bf16.mxu1 %v4650_v63  ;;  %v8349_v63 = vld [vmem:[#allocation136_spill] sm:$0xff]  ;;  %v8352_v48 = vld [vmem:[#allocation198_spill] sm:$0xff] }
 0x119   : > { %2064 = vmatprep.mubr.bf16.mxu0 %v6468_v15  ;;  %2117 = vmatprep.mubr.bf16.mxu1 %v6472_v50  ;;  %v4578_v36 = vcombine.high %v8350_v7, %v8349_v63  ;;  %v4642_v38 = vcombine.high %v8352_v48, %v8351_v11  ;;  %v8354_v46 = vld [vmem:[#allocation130_spill] sm:$0xff] }
 0x11b   : > { %2039 = vmatpush1.bf16.msra.mxu0 %v4585_v52  ;;  %2092 = vmatpush1.bf16.msra.mxu1 %v4649_v23  ;;  %v4577_v52 = vcombine.low %v8350_v7, %v8349_v63  ;;  %v4641_v23 = vcombine.low %v8352_v48, %v8351_v11  ;;  %v8357_v63 = vld [vmem:[#allocation128_spill] sm:$0xff]  ;;  %v8358_v7 = vld [vmem:[#allocation126_spill] sm:$0xff] }
 0x11c   : > { %2040 = vmatprep.subr.bf16.mxu0 %v4582_v61  ;;  %2093 = vmatprep.subr.bf16.mxu1 %v4646_v56  ;;  %v4574_v61 = vcombine.high %v8354_v46, %v8353_v44  ;;  %v8355_v56 = vld [vmem:[#allocation196_spill] sm:$0xff]  ;;  %v8360_v48 = vld [vmem:[#allocation190_spill] sm:$0xff] }
 0x11d   : > { %v4638_v35 = vcombine.high %v8356_v12, %v8355_v56  ;;  %v8359_v11 = vld [vmem:[#allocation192_spill] sm:$0xff] }
 0x11f   : > { %2041 = vmatpush1.bf16.msra.mxu0 %v4581_v32  ;;  %2094 = vmatpush1.bf16.msra.mxu1 %v4645_v54  ;;  %v4573_v32 = vcombine.low %v8354_v46, %v8353_v44  ;;  %v4637_v54 = vcombine.low %v8356_v12, %v8355_v56  ;;  %v8361_v44 = vld [vmem:[#allocation188_spill] sm:$0xff]  ;;  %v8362_v46 = vld [vmem:[#allocation186_spill] sm:$0xff]  ;;  %v4694_v56 = vcombine.high %v6235_v47, %v6241_v17 }
 0x120   : > { %2042 = vmatprep.subr.bf16.mxu0 %v4578_v36  ;;  %2095 = vmatprep.subr.bf16.mxu1 %v4642_v38  ;;  %v4570_v36 = vcombine.high %v8358_v7, %v8357_v63  ;;  %v4634_v38 = vcombine.high %v8360_v48, %v8359_v11  ;;  %v4629_v12 = vcombine.low %v8362_v46, %v8361_v44 }
 0x123   : > { %2043 = vmatpush1.bf16.msra.mxu0 %v4577_v52  ;;  %2096 = vmatpush1.bf16.msra.mxu1 %v4641_v23  ;;  %v4569_v52 = vcombine.low %v8358_v7, %v8357_v63  ;;  %v4633_v23 = vcombine.low %v8360_v48, %v8359_v11  ;;  %v8365_v7 = vld [vmem:[#allocation246_spill] sm:$0xff] }
 0x124   : > { %2044 = vmatprep.subr.bf16.mxu0 %v4574_v61  ;;  %2097 = vmatprep.subr.bf16.mxu1 %v4638_v35  ;;  %v4630_v61 = vcombine.high %v8362_v46, %v8361_v44  ;;  %v4693_v35 = vcombine.low %v6235_v47, %v6241_v17  ;;  %v4689_v48 = vcombine.low %v8365_v7, %v6229_v39  ;;  %v8368_v44 = vld [vmem:[#allocation244_spill] sm:$0xff]  ;;  %v8369_v46 = vld [vmem:[#allocation242_spill] sm:$0xff] }
 0x125   : > { %v6584_v47 = vcombine.low %v6446_v42, %v6452_v19  ;;  %v8395_v42 = vld [vmem:[#allocation31_spill] sm:$0xff]  ;;  %v8397_v17 = vld [vmem:[#allocation88_spill] sm:$0xff] }
 0x127   : > { %2045 = vmatpush1.bf16.msra.mxu0 %v4573_v32  ;;  %2098 = vmatpush1.bf16.msra.mxu1 %v4637_v54  ;;  %v8363_v32 = vld [vmem:[#allocation184_spill] sm:$0xff]  ;;  %v8364_v54 = vld [vmem:[#allocation182_spill] sm:$0xff] }
 0x128   : > { %2046 = vmatprep.subr.bf16.mxu0 %v4570_v36  ;;  %2099 = vmatprep.subr.bf16.mxu1 %v4634_v38  ;;  %v4626_v63 = vcombine.high %v8364_v54, %v8363_v32  ;;  %v4690_v36 = vcombine.high %v8365_v7, %v6229_v39  ;;  %v4625_v11 = vcombine.low %v8364_v54, %v8363_v32  ;;  %v8366_v38 = vld [vmem:[#allocation180_spill] sm:$0xff]  ;;  %v8371_v32 = vld [vmem:[#allocation174_spill] sm:$0xff] }
 0x129   : > { %v8373_v7 = vld [vmem:[#allocation238_spill] sm:$0xff] }
 0x12a   : > { %v536_v39 = vld [vmem:[#allocation3 + $0x50] sm:$0xff] }
 0x12b   : > { %2047 = vmatpush1.bf16.msra.mxu0 %v4569_v52  ;;  %2100 = vmatpush1.bf16.msra.mxu1 %v4633_v23  ;;  %v8367_v52 = vld [vmem:[#allocation178_spill] sm:$0xff] }
 0x12c   : > { %2048 = vmatprep.subr.bf16.mxu0 %v4630_v61  ;;  %2101 = vmatprep.subr.bf16.mxu1 %v4694_v56  ;;  %v4622_v23 = vcombine.high %v8367_v52, %v8366_v38  ;;  %v4686_v61 = vcombine.high %v8369_v46, %v8368_v44  ;;  %v4621_v56 = vcombine.low %v8367_v52, %v8366_v38  ;;  %v8374_v38 = vld [vmem:[#allocation172_spill] sm:$0xff]  ;;  %v8375_v52 = vld [vmem:[#allocation170_spill] sm:$0xff] }
 0x12f   : > { %2049 = vmatpush2.bf16.msra.mxu0 %v4629_v12  ;;  %2102 = vmatpush2.bf16.msra.mxu1 %v4693_v35  ;;  %v4685_v12 = vcombine.low %v8369_v46, %v8368_v44  ;;  %v8370_v35 = vld [vmem:[#allocation176_spill] sm:$0xff]  ;;  %v8377_v46 = vld [vmem:[#allocation234_spill] sm:$0xff] }
 0x130   : > { %2050 = vmatprep.subr.bf16.mxu0 %v4626_v63  ;;  %2103 = vmatprep.subr.bf16.mxu1 %v4690_v36  ;;  %v4618_v54 = vcombine.high %v8371_v32, %v8370_v35  ;;  %v8372_v63 = vld [vmem:[#allocation240_spill] sm:$0xff] }
 0x131   : > { %v4682_v36 = vcombine.high %v8373_v7, %v8372_v63  ;;  %v8376_v44 = vld [vmem:[#allocation236_spill] sm:$0xff] }
 0x133   : > { %2051 = vmatpush2.bf16.msra.mxu0 %v4625_v11  ;;  %2104 = vmatpush2.bf16.msra.mxu1 %v4689_v48  ;;  %v4617_v11 = vcombine.low %v8371_v32, %v8370_v35  ;;  %v4681_v48 = vcombine.low %v8373_v7, %v8372_v63  ;;  %v8378_v35 = vld [vmem:[#allocation168_spill] sm:$0xff]  ;;  %v8379_v32 = vld [vmem:[#allocation166_spill] sm:$0xff] }
 0x134   : > { %2052 = vmatprep.subr.bf16.mxu0 %v4622_v23  ;;  %2105 = vmatprep.subr.bf16.mxu1 %v4686_v61  ;;  %v4614_v23 = vcombine.high %v8375_v52, %v8374_v38  ;;  %v4678_v61 = vcombine.high %v8377_v46, %v8376_v44  ;;  %v8380_v63 = vld [vmem:[#allocation232_spill] sm:$0xff]  ;;  %v8381_v7 = vld [vmem:[#allocation230_spill] sm:$0xff] }
 0x137   : > { %2053 = vmatpush2.bf16.msra.mxu0 %v4621_v56  ;;  %2106 = vmatpush2.bf16.msra.mxu1 %v4685_v12  ;;  %v4613_v56 = vcombine.low %v8375_v52, %v8374_v38  ;;  %v4677_v12 = vcombine.low %v8377_v46, %v8376_v44  ;;  %v8382_v38 = vld [vmem:[#allocation164_spill] sm:$0xff]  ;;  %v8383_v52 = vld [vmem:[#allocation162_spill] sm:$0xff] }
 0x138   : > { %2054 = vmatprep.subr.bf16.mxu0 %v4618_v54  ;;  %2107 = vmatprep.subr.bf16.mxu1 %v4682_v36  ;;  %v4610_v54 = vcombine.high %v8379_v32, %v8378_v35  ;;  %v4674_v36 = vcombine.high %v8381_v7, %v8380_v63  ;;  %v8384_v44 = vld [vmem:[#allocation228_spill] sm:$0xff]  ;;  %v8385_v46 = vld [vmem:[#allocation226_spill] sm:$0xff] }
 0x13b   : > { %2055 = vmatpush2.bf16.msra.mxu0 %v4617_v11  ;;  %2108 = vmatpush2.bf16.msra.mxu1 %v4681_v48  ;;  %v4609_v11 = vcombine.low %v8379_v32, %v8378_v35  ;;  %v4673_v48 = vcombine.low %v8381_v7, %v8380_v63  ;;  %v8386_v35 = vld [vmem:[#allocation160_spill] sm:$0xff]  ;;  %v8387_v32 = vld [vmem:[#allocation158_spill] sm:$0xff] }
 0x13c   : > { %2056 = vmatprep.subr.bf16.mxu0 %v4614_v23  ;;  %2109 = vmatprep.subr.bf16.mxu1 %v4678_v61  ;;  %v4606_v23 = vcombine.high %v8383_v52, %v8382_v38  ;;  %v4670_v61 = vcombine.high %v8385_v46, %v8384_v44  ;;  %v8388_v63 = vld [vmem:[#allocation224_spill] sm:$0xff]  ;;  %v8389_v7 = vld [vmem:[#allocation222_spill] sm:$0xff] }
 0x13f   : > { %2057 = vmatpush2.bf16.msra.mxu0 %v4613_v56  ;;  %2110 = vmatpush2.bf16.msra.mxu1 %v4677_v12  ;;  %v4605_v56 = vcombine.low %v8383_v52, %v8382_v38  ;;  %v4669_v12 = vcombine.low %v8385_v46, %v8384_v44  ;;  %v8390_v38 = vld [vmem:[#allocation34_spill] sm:$0xff]  ;;  %v8391_v52 = vld [vmem:[#allocation33_spill] sm:$0xff]  ;;  %v8393_v46 = vld [vmem:[#allocation91_spill] sm:$0xff] }
 0x140   : > { %2058 = vmatprep.subr.bf16.mxu0 %v4610_v54  ;;  %2111 = vmatprep.subr.bf16.mxu1 %v4674_v36  ;;  %v4602_v54 = vcombine.high %v8387_v32, %v8386_v35  ;;  %v4666_v36 = vcombine.high %v8389_v7, %v8388_v63  ;;  %v8392_v44 = vld [vmem:[#allocation93_spill] sm:$0xff] }
 0x143   : > { %2059 = vmatpush2.bf16.msra.mxu0 %v4609_v11  ;;  %2112 = vmatpush2.bf16.msra.mxu1 %v4673_v48  ;;  %v4601_v11 = vcombine.low %v8387_v32, %v8386_v35  ;;  %v4665_v48 = vcombine.low %v8389_v7, %v8388_v63  ;;  %v537_v35 = vld [vmem:[#allocation3 + $0x58] sm:$0xff]  ;;  %v4535_v63 = vcombine.low %v8393_v46, %v8392_v44  ;;  %v8394_v7 = vld [vmem:[#allocation32_spill] sm:$0xff] }
 0x144   : > { %2060 = vmatprep.subr.bf16.mxu0 %v4606_v23  ;;  %2113 = vmatprep.subr.bf16.mxu1 %v4670_v61  ;;  %v4472_v23 = vcombine.high %v8391_v52, %v8390_v38  ;;  %v4536_v61 = vcombine.high %v8393_v46, %v8392_v44  ;;  %v541_v32 = vld [vmem:[#allocation3 + $0x78] sm:$0xff]  ;;  %v4468_v19 = vcombine.high %v8395_v42, %v8394_v7  ;;  %v8401_v46 = vld [vmem:[#allocation86_spill] sm:$0xff] }
 0x145   : > { %v6600_v58 = vcombine.high %v537_v35, %v541_v32  ;;  %v8400_v44 = vld [vmem:[#allocation87_spill] sm:$0xff] }
 0x147   : > { %2061 = vmatpush2.bf16.msra.mxu0 %v4605_v56  ;;  %2114 = vmatpush2.bf16.msra.mxu1 %v4669_v12  ;;  %v6588_v56 = vcombine.low %v6454_v25, %v6456_v27  ;;  %v540_v12 = vld [vmem:[#allocation3 + $0x70] sm:$0xff] }
 0x148   : > { %2062 = vmatprep.subr.bf16.mxu0 %v4602_v54  ;;  %2115 = vmatprep.subr.bf16.mxu1 %v4666_v36  ;;  %v4471_v54 = vcombine.low %v8391_v52, %v8390_v38  ;;  %v8396_v36 = vld [vmem:[#allocation89_spill] sm:$0xff]  ;;  %v6598_v27 = vcombine.high %v536_v39, %v540_v12  ;;  %v8398_v38 = vld [vmem:[#allocation30_spill] sm:$0xff] }
 0x149   : > { %v4532_v25 = vcombine.high %v8397_v17, %v8396_v36  ;;  %v8399_v52 = vld [vmem:[#allocation29_spill] sm:$0xff] }
 0x14b   : > { %2063 = vmatpush2.bf16.msra.mxu0 %v4601_v11  ;;  %2116 = vmatpush2.bf16.msra.mxu1 %v4665_v48  ;;  %v4467_v11 = vcombine.low %v8395_v42, %v8394_v7  ;;  %v4531_v48 = vcombine.low %v8397_v17, %v8396_v36  ;;  %v4463_v17 = vcombine.low %v8399_v52, %v8398_v38  ;;  %v8402_v42 = vld [vmem:[#allocation28_spill] sm:$0xff] }
 0x14c   : > { %2138 = vmatprep.subr.bf16.mxu0 %v4472_v23  ;;  %2191 = vmatprep.subr.bf16.mxu1 %v4536_v61  ;;  %v4464_v23 = vcombine.high %v8399_v52, %v8398_v38  ;;  %v4528_v61 = vcombine.high %v8401_v46, %v8400_v44  ;;  %v4527_v7 = vcombine.low %v8401_v46, %v8400_v44  ;;  %v8409_v38 = vld [vmem:[#allocation80_spill] sm:$0xff]  ;;  %v8411_v44 = vld [vmem:[#allocation22_spill] sm:$0xff] }
 0x14e   : > { %2065 = vmatmul.mubr.bf16.vlgmr.msra.gmra.mxu0 %v6584_v47  ;;  %2118 = vmatmul.mubr.bf16.vlgmr.msra.gmra.mxu1 %v6588_v56 }
 0x14f   : > { %2139 = vmatpush1.bf16.msra.mxu0 %v4471_v54  ;;  %2192 = vmatpush1.bf16.msra.mxu1 %v4535_v63  ;;  %v6614_v54 = vcombine.low %v536_v39, %v540_v12  ;;  %v6616_v63 = vcombine.low %v537_v35, %v541_v32  ;;  %v8406_v35 = vld [vmem:[#allocation26_spill] sm:$0xff]  ;;  %v8407_v32 = vld [vmem:[#allocation25_spill] sm:$0xff] }
 0x150   : > { %2140 = vmatprep.subr.bf16.mxu0 %v4468_v19  ;;  %2193 = vmatprep.subr.bf16.mxu1 %v4532_v25  ;;  %v8403_v19 = vld [vmem:[#allocation27_spill] sm:$0xff]  ;;  %v8404_v25 = vld [vmem:[#allocation85_spill] sm:$0xff] }
 0x151   : > { %2074 = vmatprep.mubr.bf16.mxu0 %v6598_v27  ;;  %2127 = vmatprep.mubr.bf16.mxu1 %v6600_v58  ;;  %v4460_v36 = vcombine.high %v8403_v19, %v8402_v42  ;;  %v4524_v31 = vcombine.high %v8405_v29, %v8404_v25  ;;  %v4459_v39 = vcombine.low %v8403_v19, %v8402_v42  ;;  %v8414_v42 = vld [vmem:[#allocation20_spill] sm:$0xff]  ;;  %v8415_v19 = vld [vmem:[#allocation18_spill] sm:$0xff] }
 0x152   : > { %v4523_v12 = vcombine.low %v8405_v29, %v8404_v25  ;;  %v8416_v25 = vld [vmem:[#allocation74_spill] sm:$0xff] }
 0x153   : > { %2141 = vmatpush1.bf16.msra.mxu0 %v4467_v11  ;;  %2194 = vmatpush1.bf16.msra.mxu1 %v4531_v48  ;;  %v4456_v11 = vcombine.high %v8407_v32, %v8406_v35  ;;  %v8408_v48 = vld [vmem:[#allocation82_spill] sm:$0xff] }
 0x154   : > { %2142 = vmatprep.subr.bf16.mxu0 %v4464_v23  ;;  %2195 = vmatprep.subr.bf16.mxu1 %v4528_v61  ;;  %v4520_v52 = vcombine.high %v8409_v38, %v8408_v48  ;;  %v4455_v23 = vcombine.low %v8407_v32, %v8406_v35  ;;  %v4519_v29 = vcombine.low %v8409_v38, %v8408_v48  ;;  %v8412_v61 = vld [vmem:[#allocation78_spill] sm:$0xff] }
 0x155   : > { %v4447_v35 = vcombine.low %v8415_v19, %v8414_v42  ;;  %v8419_v48 = vld [vmem:[#allocation14_spill] sm:$0xff] }
 0x156   : > { %2075 = vmatmul.mubr.bf16.gmra.mxu0 %v6614_v54  ;;  %2128 = vmatmul.mubr.bf16.gmra.mxu1 %v6616_v63 }
 0x157   : > { %2143 = vmatpush1.bf16.msra.mxu0 %v4463_v17  ;;  %2196 = vmatpush1.bf16.msra.mxu1 %v4527_v7  ;;  %v8413_v17 = vld [vmem:[#allocation76_spill] sm:$0xff] }
 0x158   : > { %2144 = vmatprep.subr.bf16.mxu0 %v4460_v36  ;;  %2197 = vmatprep.subr.bf16.mxu1 %v4524_v31  ;;  %v8410_v31 = vld [vmem:[#allocation23_spill] sm:$0xff]  ;;  %v4516_v7 = vcombine.high %v8413_v17, %v8412_v61  ;;  %v4448_v36 = vcombine.high %v8415_v19, %v8414_v42 }
 0x159   : > { %2170 = vmatprep.mubr.bf16.mxu0 %v6312_v13  ;;  %2223 = vmatprep.mubr.bf16.mxu1 %v6320_v57  ;;  %v4452_v46 = vcombine.high %v8411_v44, %v8410_v31  ;;  %v4451_v57 = vcombine.low %v8411_v44, %v8410_v31  ;;  %v4515_v13 = vcombine.low %v8413_v17, %v8412_v61  ;;  %v8423_v61 = vld [vmem:[#allocation64_spill] sm:$0xff] }
 0x15b   : > { %2145 = vmatpush1.bf16.msra.mxu0 %v4459_v39  ;;  %2198 = vmatpush1.bf16.msra.mxu1 %v4523_v12  ;;  %v8417_v39 = vld [vmem:[#allocation72_spill] sm:$0xff] }
 0x15c   : > { %2146 = vmatprep.subr.bf16.mxu0 %v4456_v11  ;;  %2199 = vmatprep.subr.bf16.mxu1 %v4520_v52  ;;  %v4512_v12 = vcombine.high %v8417_v39, %v8416_v25  ;;  %v4511_v32 = vcombine.low %v8417_v39, %v8416_v25  ;;  %v8418_v11 = vld [vmem:[#allocation16_spill] sm:$0xff]  ;;  %v8420_v52 = vld [vmem:[#allocation70_spill] sm:$0xff] }
 0x15d   : > { %v4444_v38 = vcombine.high %v8419_v48, %v8418_v11  ;;  %v4443_v31 = vcombine.low %v8419_v48, %v8418_v11  ;;  %v8427_v25 = vld [vmem:[#allocation60_spill] sm:$0xff] }
 0x15f   : > { %2147 = vmatpush1.bf16.msra.mxu0 %v4455_v23  ;;  %2200 = vmatpush1.bf16.msra.mxu1 %v4519_v29  ;;  %v8421_v23 = vld [vmem:[#allocation68_spill] sm:$0xff] }
 0x160   : > { %2148 = vmatprep.subr.bf16.mxu0 %v4452_v46  ;;  %2201 = vmatprep.subr.bf16.mxu1 %v4516_v7  ;;  %v4508_v29 = vcombine.high %v8421_v23, %v8420_v52  ;;  %v4507_v44 = vcombine.low %v8421_v23, %v8420_v52  ;;  %v8422_v46 = vld [vmem:[#allocation66_spill] sm:$0xff]  ;;  %v8424_v7 = vld [vmem:[#allocation125_spill] sm:$0xff]  ;;  %v8431_v52 = vld [vmem:[#allocation56_spill] sm:$0xff] }
 0x161   : > { %v4504_v17 = vcombine.high %v8423_v61, %v8422_v46  ;;  %v4503_v42 = vcombine.low %v8423_v61, %v8422_v46 }
 0x163   : > { %2149 = vmatpush1.bf16.msra.mxu0 %v4451_v57  ;;  %2202 = vmatpush1.bf16.msra.mxu1 %v4515_v13  ;;  %v8425_v57 = vld [vmem:[#allocation123_spill] sm:$0xff] }
 0x164   : > { %2150 = vmatprep.subr.bf16.mxu0 %v4448_v36  ;;  %2203 = vmatprep.subr.bf16.mxu1 %v4512_v12  ;;  %v4568_v13 = vcombine.high %v8425_v57, %v8424_v7  ;;  %v4567_v19 = vcombine.low %v8425_v57, %v8424_v7  ;;  %v8426_v36 = vld [vmem:[#allocation62_spill] sm:$0xff]  ;;  %v8428_v12 = vld [vmem:[#allocation121_spill] sm:$0xff]  ;;  %v8435_v7 = vld [vmem:[#allocation52_spill] sm:$0xff] }
 0x165   : > { %v4500_v39 = vcombine.high %v8427_v25, %v8426_v36  ;;  %v4499_v11 = vcombine.low %v8427_v25, %v8426_v36 }
 0x167   : > { %2151 = vmatpush1.bf16.msra.mxu0 %v4447_v35  ;;  %2204 = vmatpush1.bf16.msra.mxu1 %v4511_v32  ;;  %v8429_v35 = vld [vmem:[#allocation119_spill] sm:$0xff] }
 0x168   : > { %2152 = vmatprep.subr.bf16.mxu0 %v4444_v38  ;;  %2205 = vmatprep.subr.bf16.mxu1 %v4508_v29  ;;  %v4564_v32 = vcombine.high %v8429_v35, %v8428_v12  ;;  %v4563_v48 = vcombine.low %v8429_v35, %v8428_v12  ;;  %v8430_v38 = vld [vmem:[#allocation58_spill] sm:$0xff]  ;;  %v8432_v29 = vld [vmem:[#allocation117_spill] sm:$0xff]  ;;  %v8439_v12 = vld [vmem:[#allocation48_spill] sm:$0xff] }
 0x169   : > { %v4496_v23 = vcombine.high %v8431_v52, %v8430_v38  ;;  %v4495_v46 = vcombine.low %v8431_v52, %v8430_v38 }
 0x16b   : > { %2153 = vmatpush1.bf16.msra.mxu0 %v4443_v31  ;;  %2206 = vmatpush1.bf16.msra.mxu1 %v4507_v44  ;;  %v8433_v31 = vld [vmem:[#allocation115_spill] sm:$0xff] }
 0x16c   : > { %2154 = vmatprep.subr.bf16.mxu0 %v4504_v17  ;;  %2207 = vmatprep.subr.bf16.mxu1 %v4568_v13  ;;  %v4560_v44 = vcombine.high %v8433_v31, %v8432_v29  ;;  %v4559_v61 = vcombine.low %v8433_v31, %v8432_v29  ;;  %v8434_v17 = vld [vmem:[#allocation54_spill] sm:$0xff]  ;;  %v8436_v13 = vld [vmem:[#allocation113_spill] sm:$0xff]  ;;  %v8443_v29 = vld [vmem:[#allocation44_spill] sm:$0xff] }
 0x16d   : > { %v4492_v57 = vcombine.high %v8435_v7, %v8434_v17  ;;  %v4491_v36 = vcombine.low %v8435_v7, %v8434_v17 }
 0x16f   : > { %2155 = vmatpush2.bf16.msra.mxu0 %v4503_v42  ;;  %2208 = vmatpush2.bf16.msra.mxu1 %v4567_v19  ;;  %v8437_v42 = vld [vmem:[#allocation111_spill] sm:$0xff] }
 0x170   : > { %2156 = vmatprep.subr.bf16.mxu0 %v4500_v39  ;;  %2209 = vmatprep.subr.bf16.mxu1 %v4564_v32  ;;  %v4556_v19 = vcombine.high %v8437_v42, %v8436_v13  ;;  %v4555_v25 = vcombine.low %v8437_v42, %v8436_v13  ;;  %v8438_v39 = vld [vmem:[#allocation50_spill] sm:$0xff]  ;;  %v8440_v32 = vld [vmem:[#allocation109_spill] sm:$0xff]  ;;  %v8447_v13 = vld [vmem:[#allocation40_spill] sm:$0xff] }
 0x171   : > { %v4488_v35 = vcombine.high %v8439_v12, %v8438_v39  ;;  %v4487_v38 = vcombine.low %v8439_v12, %v8438_v39 }
 0x173   : > { %2157 = vmatpush2.bf16.msra.mxu0 %v4499_v11  ;;  %2210 = vmatpush2.bf16.msra.mxu1 %v4563_v48  ;;  %v8441_v11 = vld [vmem:[#allocation107_spill] sm:$0xff] }
 0x174   : > { %2158 = vmatprep.subr.bf16.mxu0 %v4496_v23  ;;  %2211 = vmatprep.subr.bf16.mxu1 %v4560_v44  ;;  %v4552_v48 = vcombine.high %v8441_v11, %v8440_v32  ;;  %v4551_v52 = vcombine.low %v8441_v11, %v8440_v32  ;;  %v8442_v23 = vld [vmem:[#allocation46_spill] sm:$0xff]  ;;  %v8444_v44 = vld [vmem:[#allocation105_spill] sm:$0xff]  ;;  %v8451_v32 = vld [vmem:[#allocation36_spill] sm:$0xff] }
 0x175   : > { %v4484_v31 = vcombine.high %v8443_v29, %v8442_v23  ;;  %v4483_v17 = vcombine.low %v8443_v29, %v8442_v23 }
 0x177   : > { %2159 = vmatpush2.bf16.msra.mxu0 %v4495_v46  ;;  %2212 = vmatpush2.bf16.msra.mxu1 %v4559_v61  ;;  %v8445_v46 = vld [vmem:[#allocation103_spill] sm:$0xff] }
 0x178   : > { %2160 = vmatprep.subr.bf16.mxu0 %v4492_v57  ;;  %2213 = vmatprep.subr.bf16.mxu1 %v4556_v19  ;;  %v4548_v61 = vcombine.high %v8445_v46, %v8444_v44  ;;  %v4547_v7 = vcombine.low %v8445_v46, %v8444_v44  ;;  %v8446_v57 = vld [vmem:[#allocation42_spill] sm:$0xff]  ;;  %v8448_v19 = vld [vmem:[#allocation101_spill] sm:$0xff]  ;;  %v8455_v44 = vld [vmem:[#allocation155_spill] sm:$0xff] }
 0x179   : > { %v4480_v42 = vcombine.high %v8447_v13, %v8446_v57  ;;  %v4479_v39 = vcombine.low %v8447_v13, %v8446_v57 }
 0x17b   : > { %2161 = vmatpush2.bf16.msra.mxu0 %v4491_v36  ;;  %2214 = vmatpush2.bf16.msra.mxu1 %v4555_v25  ;;  %v8449_v36 = vld [vmem:[#allocation99_spill] sm:$0xff] }
 0x17c   : > { %2162 = vmatprep.subr.bf16.mxu0 %v4488_v35  ;;  %2215 = vmatprep.subr.bf16.mxu1 %v4552_v48  ;;  %v4544_v25 = vcombine.high %v8449_v36, %v8448_v19  ;;  %v4543_v12 = vcombine.low %v8449_v36, %v8448_v19  ;;  %v8450_v35 = vld [vmem:[#allocation38_spill] sm:$0xff]  ;;  %v8452_v48 = vld [vmem:[#allocation97_spill] sm:$0xff]  ;;  %v8459_v19 = vld [vmem:[#allocation151_spill] sm:$0xff] }
 0x17d   : > { %v4476_v11 = vcombine.high %v8451_v32, %v8450_v35  ;;  %v4475_v23 = vcombine.low %v8451_v32, %v8450_v35 }
 0x17f   : > { %2163 = vmatpush2.bf16.msra.mxu0 %v4487_v38  ;;  %2216 = vmatpush2.bf16.msra.mxu1 %v4551_v52  ;;  %v8453_v38 = vld [vmem:[#allocation95_spill] sm:$0xff] }
 0x180   : > { %2164 = vmatprep.subr.bf16.mxu0 %v4484_v31  ;;  %2217 = vmatprep.subr.bf16.mxu1 %v4548_v61  ;;  %v4540_v52 = vcombine.high %v8453_v38, %v8452_v48  ;;  %v4539_v29 = vcombine.low %v8453_v38, %v8452_v48  ;;  %v8454_v31 = vld [vmem:[#allocation157_spill] sm:$0xff]  ;;  %v8463_v48 = vld [vmem:[#allocation147_spill] sm:$0xff] }
 0x181   : > { %v4600_v46 = vcombine.high %v8455_v44, %v8454_v31  ;;  %v8456_v61 = vld [vmem:[#allocation221_spill] sm:$0xff]  ;;  %v4599_v57 = vcombine.low %v8455_v44, %v8454_v31  ;;  %v8467_v44 = vld [vmem:[#allocation143_spill] sm:$0xff] }
 0x182   : > { %v8466_v31 = vld [vmem:[#allocation145_spill] sm:$0xff] }
 0x183   : > { %2165 = vmatpush2.bf16.msra.mxu0 %v4483_v17  ;;  %2218 = vmatpush2.bf16.msra.mxu1 %v4547_v7  ;;  %v8457_v17 = vld [vmem:[#allocation219_spill] sm:$0xff] }
 0x184   : > { %2166 = vmatprep.subr.bf16.mxu0 %v4480_v42  ;;  %2219 = vmatprep.subr.bf16.mxu1 %v4544_v25  ;;  %v4664_v7 = vcombine.high %v8457_v17, %v8456_v61  ;;  %v4663_v13 = vcombine.low %v8457_v17, %v8456_v61  ;;  %v8458_v42 = vld [vmem:[#allocation153_spill] sm:$0xff]  ;;  %v8469_v17 = vld [vmem:[#allocation207_spill] sm:$0xff] }
 0x185   : > { %v4596_v36 = vcombine.high %v8459_v19, %v8458_v42  ;;  %v8460_v25 = vld [vmem:[#allocation217_spill] sm:$0xff]  ;;  %v4595_v35 = vcombine.low %v8459_v19, %v8458_v42 }
 0x186   : > { %v8468_v61 = vld [vmem:[#allocation209_spill] sm:$0xff] }
 0x187   : > { %2167 = vmatpush2.bf16.msra.mxu0 %v4479_v39  ;;  %2220 = vmatpush2.bf16.msra.mxu1 %v4543_v12  ;;  %v8461_v39 = vld [vmem:[#allocation215_spill] sm:$0xff]  ;;  %v8472_v19 = vld [vmem:[#allocation205_spill] sm:$0xff] }
 0x188   : > { %2168 = vmatprep.subr.bf16.mxu0 %v4476_v11  ;;  %2221 = vmatprep.subr.bf16.mxu1 %v4540_v52  ;;  %v4660_v12 = vcombine.high %v8461_v39, %v8460_v25  ;;  %v4659_v32 = vcombine.low %v8461_v39, %v8460_v25  ;;  %v8462_v11 = vld [vmem:[#allocation149_spill] sm:$0xff] }
 0x189   : > { %v4592_v38 = vcombine.high %v8463_v48, %v8462_v11  ;;  %v8464_v52 = vld [vmem:[#allocation213_spill] sm:$0xff] }
 0x18a   : > { %v8474_v39 = vld [vmem:[#allocation137_spill] sm:$0xff] }
 0x18b   : > { %2169 = vmatpush2.bf16.msra.mxu0 %v4475_v23  ;;  %2222 = vmatpush2.bf16.msra.mxu1 %v4539_v29  ;;  %v8465_v23 = vld [vmem:[#allocation211_spill] sm:$0xff] }
 0x18c   : > { %2244 = vmatprep.subr.bf16.mxu0 %v4600_v46  ;;  %2297 = vmatprep.subr.bf16.mxu1 %v4664_v7  ;;  %v4656_v29 = vcombine.high %v8465_v23, %v8464_v52  ;;  %v4588_v46 = vcombine.high %v8467_v44, %v8466_v31  ;;  %v4652_v7 = vcombine.high %v8469_v17, %v8468_v61 }
 0x18e   : > { %2171 = vmatmul.mubr.bf16.vlgmr.msra.gmra.mxu0 %v6413_v21  ;;  %2224 = vmatmul.mubr.bf16.vlgmr.msra.gmra.mxu1 %v6417_v55  ;;  %v4591_v21 = vcombine.low %v8463_v48, %v8462_v11  ;;  %v4655_v55 = vcombine.low %v8465_v23, %v8464_v52  ;;  %v8477_v11 = vld [vmem:[#allocation199_spill] sm:$0xff] }
 0x18f   : > { %2245 = vmatpush1.bf16.msra.mxu0 %v4599_v57  ;;  %2298 = vmatpush1.bf16.msra.mxu1 %v4663_v13  ;;  %v8470_v57 = vld [vmem:[#allocation141_spill] sm:$0xff]  ;;  %v8471_v13 = vld [vmem:[#allocation139_spill] sm:$0xff] }
 0x190   : > { %2246 = vmatprep.subr.bf16.mxu0 %v4596_v36  ;;  %2299 = vmatprep.subr.bf16.mxu1 %v4660_v12  ;;  %v4584_v42 = vcombine.high %v8471_v13, %v8470_v57  ;;  %v8473_v36 = vld [vmem:[#allocation203_spill] sm:$0xff] }
 0x191   : > { %2180 = vmatprep.mubr.bf16.mxu0 %v6430_v59  ;;  %2233 = vmatprep.mubr.bf16.mxu1 %v6432_v3  ;;  %v4587_v59 = vcombine.low %v8467_v44, %v8466_v31  ;;  %v4651_v3 = vcombine.low %v8469_v17, %v8468_v61  ;;  %v4648_v25 = vcombine.high %v8473_v36, %v8472_v19  ;;  %v8475_v12 = vld [vmem:[#allocation135_spill] sm:$0xff] }
 0x192   : > { %v8479_v52 = vld [vmem:[#allocation131_spill] sm:$0xff] }
 0x193   : > { %2247 = vmatpush1.bf16.msra.mxu0 %v4595_v35  ;;  %2300 = vmatpush1.bf16.msra.mxu1 %v4659_v32  ;;  %v4580_v35 = vcombine.high %v8475_v12, %v8474_v39  ;;  %v8476_v32 = vld [vmem:[#allocation201_spill] sm:$0xff]  ;;  %v8483_v61 = vld [vmem:[#allocation127_spill] sm:$0xff] }
 0x194   : > { %2248 = vmatprep.subr.bf16.mxu0 %v4592_v38  ;;  %2301 = vmatprep.subr.bf16.mxu1 %v4656_v29  ;;  %v4644_v48 = vcombine.high %v8477_v11, %v8476_v32  ;;  %v8478_v38 = vld [vmem:[#allocation133_spill] sm:$0xff] }
 0x195   : > { %v4576_v23 = vcombine.high %v8479_v52, %v8478_v38  ;;  %v8480_v29 = vld [vmem:[#allocation197_spill] sm:$0xff]  ;;  %v4575_v31 = vcombine.low %v8479_v52, %v8478_v38 }
 0x196   : > { %2181 = vmatmul.mubr.bf16.gmra.mxu0 %v6448_v40  ;;  %2234 = vmatmul.mubr.bf16.gmra.mxu1 %v6450_v34  ;;  %v4583_v40 = vcombine.low %v8471_v13, %v8470_v57  ;;  %v4647_v34 = vcombine.low %v8473_v36, %v8472_v19  ;;  %v8487_v19 = vld [vmem:[#allocation187_spill] sm:$0xff] }
 0x197   : > { %2249 = vmatpush1.bf16.msra.mxu0 %v4591_v21  ;;  %2302 = vmatpush1.bf16.msra.mxu1 %v4655_v55  ;;  %v8481_v21 = vld [vmem:[#allocation195_spill] sm:$0xff] }
 0x198   : > { %2250 = vmatprep.subr.bf16.mxu0 %v4588_v46  ;;  %2303 = vmatprep.subr.bf16.mxu1 %v4652_v7  ;;  %v4640_v55 = vcombine.high %v8481_v21, %v8480_v29  ;;  %v4639_v44 = vcombine.low %v8481_v21, %v8480_v29  ;;  %v8482_v46 = vld [vmem:[#allocation129_spill] sm:$0xff]  ;;  %v8495_v29 = vld [vmem:[#allocation179_spill] sm:$0xff] }
 0x199   : > { %2276 = vmatprep.mubr.bf16.mxu0 %v6468_v15  ;;  %2329 = vmatprep.mubr.bf16.mxu1 %v6472_v50  ;;  %v4579_v15 = vcombine.low %v8475_v12, %v8474_v39  ;;  %v4643_v50 = vcombine.low %v8477_v11, %v8476_v32  ;;  %v4572_v17 = vcombine.high %v8483_v61, %v8482_v46  ;;  %v8484_v7 = vld [vmem:[#allocation193_spill] sm:$0xff]  ;;  %v8491_v32 = vld [vmem:[#allocation183_spill] sm:$0xff] }
 0x19a   : > { %v4571_v57 = vcombine.low %v8483_v61, %v8482_v46 }
 0x19b   : > { %2251 = vmatpush1.bf16.msra.mxu0 %v4587_v59  ;;  %2304 = vmatpush1.bf16.msra.mxu1 %v4651_v3  ;;  %v8485_v59 = vld [vmem:[#allocation191_spill] sm:$0xff] }
 0x19c   : > { %2252 = vmatprep.subr.bf16.mxu0 %v4584_v42  ;;  %2305 = vmatprep.subr.bf16.mxu1 %v4648_v25  ;;  %v4636_v3 = vcombine.high %v8485_v59, %v8484_v7  ;;  %v4635_v13 = vcombine.low %v8485_v59, %v8484_v7  ;;  %v8486_v42 = vld [vmem:[#allocation189_spill] sm:$0xff]  ;;  %v8499_v7 = vld [vmem:[#allocation175_spill] sm:$0xff] }
 0x19d   : > { %v4632_v36 = vcombine.high %v8487_v19, %v8486_v42  ;;  %v8488_v25 = vld [vmem:[#allocation253_spill] sm:$0xff]  ;;  %v4631_v39 = vcombine.low %v8487_v19, %v8486_v42 }
 0x19f   : > { %2253 = vmatpush1.bf16.msra.mxu0 %v4583_v40  ;;  %2306 = vmatpush1.bf16.msra.mxu1 %v4647_v34  ;;  %v8489_v40 = vld [vmem:[#allocation251_spill] sm:$0xff] }
 0x1a0   : > { %2254 = vmatprep.subr.bf16.mxu0 %v4580_v35  ;;  %2307 = vmatprep.subr.bf16.mxu1 %v4644_v48  ;;  %v4696_v34 = vcombine.high %v8489_v40, %v8488_v25  ;;  %v4695_v12 = vcombine.low %v8489_v40, %v8488_v25  ;;  %v8490_v35 = vld [vmem:[#allocation185_spill] sm:$0xff]  ;;  %v8503_v25 = vld [vmem:[#allocation171_spill] sm:$0xff] }
 0x1a1   : > { %v4628_v11 = vcombine.high %v8491_v32, %v8490_v35  ;;  %v8492_v48 = vld [vmem:[#allocation249_spill] sm:$0xff]  ;;  %v4627_v38 = vcombine.low %v8491_v32, %v8490_v35 }
 0x1a3   : > { %2255 = vmatpush1.bf16.msra.mxu0 %v4579_v15  ;;  %2308 = vmatpush1.bf16.msra.mxu1 %v4643_v50  ;;  %v8493_v15 = vld [vmem:[#allocation247_spill] sm:$0xff] }
 0x1a4   : > { %2256 = vmatprep.subr.bf16.mxu0 %v4576_v23  ;;  %2309 = vmatprep.subr.bf16.mxu1 %v4640_v55  ;;  %v4692_v50 = vcombine.high %v8493_v15, %v8492_v48  ;;  %v4691_v52 = vcombine.low %v8493_v15, %v8492_v48  ;;  %v8494_v23 = vld [vmem:[#allocation181_spill] sm:$0xff]  ;;  %v8507_v48 = vld [vmem:[#allocation167_spill] sm:$0xff] }
 0x1a5   : > { %v4624_v21 = vcombine.high %v8495_v29, %v8494_v23  ;;  %v8496_v55 = vld [vmem:[#allocation245_spill] sm:$0xff]  ;;  %v4623_v46 = vcombine.low %v8495_v29, %v8494_v23 }
 0x1a7   : > { %2257 = vmatpush1.bf16.msra.mxu0 %v4575_v31  ;;  %2310 = vmatpush1.bf16.msra.mxu1 %v4639_v44  ;;  %v8497_v31 = vld [vmem:[#allocation243_spill] sm:$0xff] }
 0x1a8   : > { %2258 = vmatprep.subr.bf16.mxu0 %v4572_v17  ;;  %2311 = vmatprep.subr.bf16.mxu1 %v4636_v3  ;;  %v4688_v44 = vcombine.high %v8497_v31, %v8496_v55  ;;  %v4687_v61 = vcombine.low %v8497_v31, %v8496_v55  ;;  %v8498_v17 = vld [vmem:[#allocation177_spill] sm:$0xff]  ;;  %v8511_v55 = vld [vmem:[#allocation163_spill] sm:$0xff] }
 0x1a9   : > { %v4620_v59 = vcombine.high %v8499_v7, %v8498_v17  ;;  %v8500_v3 = vld [vmem:[#allocation241_spill] sm:$0xff]  ;;  %v4619_v42 = vcombine.low %v8499_v7, %v8498_v17 }
 0x1ab   : > { %2259 = vmatpush1.bf16.msra.mxu0 %v4571_v57  ;;  %2312 = vmatpush1.bf16.msra.mxu1 %v4635_v13  ;;  %v8501_v57 = vld [vmem:[#allocation239_spill] sm:$0xff] }
 0x1ac   : > { %2260 = vmatprep.subr.bf16.mxu0 %v4632_v36  ;;  %2313 = vmatprep.subr.bf16.mxu1 %v4696_v34  ;;  %v4684_v13 = vcombine.high %v8501_v57, %v8500_v3  ;;  %v4683_v19 = vcombine.low %v8501_v57, %v8500_v3  ;;  %v8502_v36 = vld [vmem:[#allocation173_spill] sm:$0xff]  ;;  %v8515_v3 = vld [vmem:[#allocation159_spill] sm:$0xff] }
 0x1ad   : > { %v4616_v40 = vcombine.high %v8503_v25, %v8502_v36  ;;  %v8504_v34 = vld [vmem:[#allocation237_spill] sm:$0xff]  ;;  %v4615_v35 = vcombine.low %v8503_v25, %v8502_v36 }
 0x1af   : > { %2261 = vmatpush2.bf16.msra.mxu0 %v4631_v39  ;;  %2314 = vmatpush2.bf16.msra.mxu1 %v4695_v12  ;;  %v8505_v39 = vld [vmem:[#allocation235_spill] sm:$0xff] }
 0x1b0   : > { %2262 = vmatprep.subr.bf16.mxu0 %v4628_v11  ;;  %2315 = vmatprep.subr.bf16.mxu1 %v4692_v50  ;;  %v4680_v12 = vcombine.high %v8505_v39, %v8504_v34  ;;  %v4679_v32 = vcombine.low %v8505_v39, %v8504_v34  ;;  %v8506_v11 = vld [vmem:[#allocation169_spill] sm:$0xff] }
 0x1b1   : > { %v4612_v15 = vcombine.high %v8507_v48, %v8506_v11  ;;  %v8508_v50 = vld [vmem:[#allocation233_spill] sm:$0xff]  ;;  %v4611_v23 = vcombine.low %v8507_v48, %v8506_v11 }
 0x1b3   : > { %2263 = vmatpush2.bf16.msra.mxu0 %v4627_v38  ;;  %2316 = vmatpush2.bf16.msra.mxu1 %v4691_v52  ;;  %v8509_v38 = vld [vmem:[#allocation231_spill] sm:$0xff] }
 0x1b4   : > { %2264 = vmatprep.subr.bf16.mxu0 %v4624_v21  ;;  %2317 = vmatprep.subr.bf16.mxu1 %v4688_v44  ;;  %v4676_v52 = vcombine.high %v8509_v38, %v8508_v50  ;;  %v4675_v29 = vcombine.low %v8509_v38, %v8508_v50  ;;  %v8510_v21 = vld [vmem:[#allocation165_spill] sm:$0xff]  ;;  %v6874_v38 = vpop.permute.xlu1 %548 }
 0x1b5   : > { %v4608_v31 = vcombine.high %v8511_v55, %v8510_v21  ;;  %v8512_v44 = vld [vmem:[#allocation229_spill] sm:$0xff]  ;;  %v4607_v17 = vcombine.low %v8511_v55, %v8510_v21 }
 0x1b7   : > { %2265 = vmatpush2.bf16.msra.mxu0 %v4623_v46  ;;  %2318 = vmatpush2.bf16.msra.mxu1 %v4687_v61  ;;  %v8513_v46 = vld [vmem:[#allocation227_spill] sm:$0xff] }
 0x1b8   : > { %2266 = vmatprep.subr.bf16.mxu0 %v4620_v59  ;;  %2319 = vmatprep.subr.bf16.mxu1 %v4684_v13  ;;  %v4672_v61 = vcombine.high %v8513_v46, %v8512_v44  ;;  %v4671_v7 = vcombine.low %v8513_v46, %v8512_v44  ;;  %v8514_v59 = vld [vmem:[#allocation161_spill] sm:$0xff]  ;;  %v6878_v44 = vpop.permute.xlu1 %553 }
 0x1b9   : > { %v4604_v57 = vcombine.high %v8515_v3, %v8514_v59  ;;  %v8516_v13 = vld [vmem:[#allocation225_spill] sm:$0xff]  ;;  %v4603_v36 = vcombine.low %v8515_v3, %v8514_v59 }
 0x1bb   : > { %2267 = vmatpush2.bf16.msra.mxu0 %v4619_v42  ;;  %2320 = vmatpush2.bf16.msra.mxu1 %v4683_v19  ;;  %v8517_v42 = vld [vmem:[#allocation223_spill] sm:$0xff] }
 0x1bc   : > { %2268 = vmatprep.subr.bf16.mxu0 %v4616_v40  ;;  %2321 = vmatprep.subr.bf16.mxu1 %v4680_v12  ;;  %v4668_v19 = vcombine.high %v8517_v42, %v8516_v13  ;;  %v4667_v25 = vcombine.low %v8517_v42, %v8516_v13  ;;  %v8518_v40 = vmov 0  }
 0x1bf   : > { %2269 = vmatpush2.bf16.msra.mxu0 %v4615_v35  ;;  %2322 = vmatpush2.bf16.msra.mxu1 %v4679_v32 }
 0x1c0   : > { %2270 = vmatprep.subr.bf16.mxu0 %v4612_v15  ;;  %2323 = vmatprep.subr.bf16.mxu1 %v4676_v52 }
 0x1c3   : > { %2271 = vmatpush2.bf16.msra.mxu0 %v4611_v23  ;;  %2324 = vmatpush2.bf16.msra.mxu1 %v4675_v29 }
 0x1c4   : > { %2272 = vmatprep.subr.bf16.mxu0 %v4608_v31  ;;  %2325 = vmatprep.subr.bf16.mxu1 %v4672_v61 }
 0x1c7   : > { %2273 = vmatpush2.bf16.msra.mxu0 %v4607_v17  ;;  %2326 = vmatpush2.bf16.msra.mxu1 %v4671_v7 }
 0x1c8   : > { %2274 = vmatprep.subr.bf16.mxu0 %v4604_v57  ;;  %2327 = vmatprep.subr.bf16.mxu1 %v4668_v19 }
 0x1cb   : > { %2275 = vmatpush2.bf16.msra.mxu0 %v4603_v36  ;;  %2328 = vmatpush2.bf16.msra.mxu1 %v4667_v25 }
 0x1ce   : > { %2277 = vmatmul.mubr.bf16.vlgmr.msra.gmra.mxu0 %v6584_v47  ;;  %2330 = vmatmul.mubr.bf16.vlgmr.msra.gmra.mxu1 %v6588_v56  ;;  %v1960_v34 = vpop.f32.mrf.mxu0  ;;  %v2013_v39 = vpop.f32.mrf.mxu1 }
 0x1cf   : > { %2286 = vmatprep.mubr.bf16.mxu0 %v6598_v27  ;;  %2339 = vmatprep.mubr.bf16.mxu1 %v6600_v58 }
 0x1d0   : > { %v1962_v12 = vpop.f32.mrf.mxu0  ;;  %v2015_v35 = vpop.f32.mrf.mxu1 }
 0x1d1   : > { %v1963_v42 = vadd.f32 %v1962_v12, %v6874_v38 }
 0x1d2   : > { %v1964_v32 = vpop.f32.mrf.mxu0  ;;  %v2017_v47 = vpop.f32.mrf.mxu1 }
 0x1d3   : > { %v1965_v36 = vadd.f32 %v1964_v32, %v6878_v44 }
 0x1d4   : > { %v1966_v11 = vpop.f32.mrf.mxu0  ;;  %v2019_v56 = vpop.f32.mrf.mxu1 }
 0x1d5   : > { %v1967_v7 = vadd.f32 %v1966_v11, %v6878_v44  ;;  %v1961_v11 = vadd.f32 %v1960_v34, %v6874_v38  ;;  %v2018_v12 = vadd.f32 %v2017_v47, %v1965_v36 }
 0x1d6   : > { %2287 = vmatmul.mubr.bf16.gmra.mxu0 %v6614_v54  ;;  %2340 = vmatmul.mubr.bf16.gmra.mxu1 %v6616_v63  ;;  %v1970_v48 = vpop.f32.mrf.mxu0  ;;  %v2023_v27 = vpop.f32.mrf.mxu1 }
 0x1d7   : > { %2417 = vmatprep.mubr.bf16.mxu0 %v8518_v40  ;;  %2460 = vmatprep.mubr.bf16.mxu1 %v8518_v40  ;;  %v6876_v63 = vpop.permute.xlu0 %558  ;;  %v2020_v60 = vadd.f32 %v2019_v56, %v1967_v7  ;;  %v2014_v56 = vadd.f32 %v2013_v39, %v1961_v11 }
 0x1d8   : > { %v1972_v15 = vpop.f32.mrf.mxu0  ;;  %v2025_v58 = vpop.f32.mrf.mxu1  ;;  %v1971_v3 = vadd.f32 %v1970_v48, %v6876_v63  ;;  %v2016_v48 = vadd.f32 %v2015_v35, %v1963_v42 }
 0x1d9   : > { %v1973_v59 = vadd.f32 %v1972_v15, %v6876_v63 }
 0x1da   : > { %v1974_v50 = vpop.f32.mrf.mxu0  ;;  %v2027_v54 = vpop.f32.mrf.mxu1  ;;  %v2024_v37 = vadd.f32 %v2023_v27, %v1971_v3 }
 0x1db   : > { %v6880_v46 = vpop.permute.xlu0 %563  ;;  %v2026_v62 = vadd.f32 %v2025_v58, %v1973_v59 }
 0x1dc   : > { %v1976_v52 = vpop.f32.mrf.mxu0  ;;  %v2029_v23 = vpop.f32.mrf.mxu1  ;;  %v1975_v19 = vadd.f32 %v1974_v50, %v6880_v46 }
 0x1dd   : > { %v1977_v33 = vadd.f32 %v1976_v52, %v6880_v46 }
 0x1de   : > { %v2028_v2 = vadd.f32 %v2027_v54, %v1975_v19 }
 0x1df   : > { %v2030_v32 = vadd.f32 %v2029_v23, %v1977_v33 }
 0x20e   : > { %v2066_v29 = vpop.f32.mrf.mxu0  ;;  %v2119_v21 = vpop.f32.mrf.mxu1 }
 0x20f   : > { %v2067_v8 = vadd.f32 %v2066_v29, %v2014_v56 }
 0x210   : > { %v2068_v55 = vpop.f32.mrf.mxu0  ;;  %v2121_v31 = vpop.f32.mrf.mxu1 }
 0x211   : > { %v2069_v49 = vadd.f32 %v2068_v55, %v2016_v48  ;;  %v2120_v33 = vadd.f32 %v2119_v21, %v2067_v8 }
 0x212   : > { %v2070_v61 = vpop.f32.mrf.mxu0  ;;  %v2123_v17 = vpop.f32.mrf.mxu1 }
 0x213   : > { %v2071_v58 = vadd.f32 %v2070_v61, %v2018_v12  ;;  %v2122_v54 = vadd.f32 %v2121_v31, %v2069_v49 }
 0x214   : > { %v2072_v57 = vpop.f32.mrf.mxu0  ;;  %v2125_v13 = vpop.f32.mrf.mxu1 }
 0x215   : > { %v2073_v41 = vadd.f32 %v2072_v57, %v2020_v60 }
 0x216   : > { %v2076_v25 = vpop.f32.mrf.mxu0  ;;  %v2129_v40 = vpop.f32.mrf.mxu1 }
 0x217   : > { %v2077_v4 = vadd.f32 %v2076_v25, %v2024_v37  ;;  %v2126_v59 = vadd.f32 %v2125_v13, %v2073_v41 }
 0x218   : > { %v2078_v15 = vpop.f32.mrf.mxu0  ;;  %v2131_v0 = vpop.f32.mrf.mxu1 }
 0x219   : > { %v2079_v45 = vadd.f32 %v2078_v15, %v2026_v62  ;;  %v2130_v35 = vadd.f32 %v2129_v40, %v2077_v4  ;;  %v2124_v62 = vadd.f32 %v2123_v17, %v2071_v58  ;;  %v2355_v37 = vmax.f32 %v2126_v59, 0.0  ;;  %v6890_v4 = vld [vmem:[#allocation8] sm:$0xff]  }
 0x21a   : > { %v2080_v50 = vpop.f32.mrf.mxu0  ;;  %v2133_v6 = vpop.f32.mrf.mxu1 }
 0x21b   : > { %v2081_v53 = vadd.f32 %v2080_v50, %v2028_v2  ;;  %v2132_v34 = vadd.f32 %v2131_v0, %v2079_v45  ;;  %v2358_v23 = vmax.f32 %v2130_v35, 0.0  ;;  %v2351_v2 = vmax.f32 %v2122_v54, 0.0 }
 0x21c   : > { %v2082_v7 = vpop.f32.mrf.mxu0  ;;  %v2135_v52 = vpop.f32.mrf.mxu1  ;;  %v2354_v55 = vmax.f32 %v2124_v62, 0.0  ;;  %v2350_v0 = vmax.f32 %v2120_v33, 0.0 }
 0x21d   : > { %v2083_v27 = vadd.f32 %v2082_v7, %v2030_v32  ;;  %v2134_v3 = vadd.f32 %v2133_v6, %v2081_v53  ;;  %v2359_v57 = vmax.f32 %v2132_v34, 0.0  ;;  %v2367_v19 = vpack.c.bf16 %v2355_v37, %v2351_v2 }
 0x21e   : > { %v2366_v6 = vpack.c.bf16 %v2354_v55, %v2350_v0 }
 0x21f   : > { %v2136_v60 = vadd.f32 %v2135_v52, %v2083_v27  ;;  %v2362_v47 = vmax.f32 %v2134_v3, 0.0 }
 0x221   : > { %v2363_v42 = vmax.f32 %v2136_v60, 0.0  ;;  %v2370_v61 = vpack.c.bf16 %v2362_v47, %v2358_v23 }
 0x223   : > { %v2371_v39 = vpack.c.bf16 %v2363_v42, %v2359_v57 }
 0x225   : > { %2397 = vmatprep.subr.bf16.mxu0 %v2371_v39 }
 0x226   : > { %2398 = vmatpush1.bf16.msra.mxu0 %v2370_v61 }
 0x227   : > { %2399 = vmatprep.subr.bf16.mxu0 %v2367_v19 }
 0x22a   : > { %2400 = vmatpush1.bf16.msra.mxu0 %v2366_v6 }
 0x22d   : > { %4698 = vmatmul.mubr.msk.bf16.vlgmr.msra.gmra.mxu0 %vm2381_vm0, %v6890_v4 }
 0x24e   : > { %v2172_v41 = vpop.f32.mrf.mxu0  ;;  %v2225_v8 = vpop.f32.mrf.mxu1 }
 0x24f   : > { %v2173_v33 = vadd.f32 %v2172_v41, %v6874_v38 }
 0x250   : > { %v2174_v45 = vpop.f32.mrf.mxu0  ;;  %v2227_v49 = vpop.f32.mrf.mxu1 }
 0x251   : > { %v2175_v35 = vadd.f32 %v2174_v45, %v6874_v38 }
 0x252   : > { %v2176_v53 = vpop.f32.mrf.mxu0  ;;  %v2229_v29 = vpop.f32.mrf.mxu1 }
 0x253   : > { %v2177_v60 = vadd.f32 %v2176_v53, %v6878_v44 }
 0x254   : > { %v2178_v21 = vpop.f32.mrf.mxu0  ;;  %v2231_v31 = vpop.f32.mrf.mxu1 }
 0x255   : > { %v2179_v52 = vadd.f32 %v2178_v21, %v6878_v44  ;;  %v2230_v0 = vadd.f32 %v2229_v29, %v2177_v60 }
 0x256   : > { %v2182_v17 = vpop.f32.mrf.mxu0  ;;  %v2235_v13 = vpop.f32.mrf.mxu1 }
 0x257   : > { %v2183_v34 = vadd.f32 %v2182_v17, %v6876_v63  ;;  %v2232_v37 = vadd.f32 %v2231_v31, %v2179_v52  ;;  %v2226_v31 = vadd.f32 %v2225_v8, %v2173_v33 }
 0x258   : > { %v2184_v36 = vpop.f32.mrf.mxu0  ;;  %v2237_v25 = vpop.f32.mrf.mxu1 }
 0x259   : > { %v2185_v59 = vadd.f32 %v2184_v36, %v6876_v63  ;;  %v2236_v23 = vadd.f32 %v2235_v13, %v2183_v34  ;;  %v2228_v63 = vadd.f32 %v2227_v49, %v2175_v35 }
 0x25a   : > { %v2186_v40 = vpop.f32.mrf.mxu0  ;;  %v2239_v11 = vpop.f32.mrf.mxu1 }
 0x25b   : > { %v2187_v54 = vadd.f32 %v2186_v40, %v6880_v46  ;;  %v2238_v57 = vadd.f32 %v2237_v25, %v2185_v59 }
 0x25c   : > { %v2188_v15 = vpop.f32.mrf.mxu0  ;;  %v2241_v48 = vpop.f32.mrf.mxu1 }
 0x25d   : > { %v2189_v42 = vadd.f32 %v2188_v15, %v6880_v46  ;;  %v2240_v55 = vadd.f32 %v2239_v11, %v2187_v54 }
 0x25f   : > { %v2242_v44 = vadd.f32 %v2241_v48, %v2189_v42 }
 0x28e   : > { %v2278_v12 = vpop.f32.mrf.mxu0  ;;  %v2331_v50 = vpop.f32.mrf.mxu1 }
 0x28f   : > { %v2279_v13 = vadd.f32 %v2278_v12, %v2226_v31 }
 0x290   : > { %v2280_v32 = vpop.f32.mrf.mxu0  ;;  %v2333_v56 = vpop.f32.mrf.mxu1 }
 0x291   : > { %v2281_v53 = vadd.f32 %v2280_v32, %v2228_v63  ;;  %v2332_v48 = vadd.f32 %v2331_v50, %v2279_v13 }
 0x292   : > { %v2282_v58 = vpop.f32.mrf.mxu0  ;;  %v2335_v7 = vpop.f32.mrf.mxu1 }
 0x293   : > { %v2283_v36 = vadd.f32 %v2282_v58, %v2230_v0  ;;  %v2334_v11 = vadd.f32 %v2333_v56, %v2281_v53  ;;  %v2352_v12 = vmax.f32 %v2332_v48, 0.0 }
 0x294   : > { %v2284_v27 = vpop.f32.mrf.mxu0  ;;  %v2337_v3 = vpop.f32.mrf.mxu1 }
 0x295   : > { %v2285_v61 = vadd.f32 %v2284_v27, %v2232_v37  ;;  %v2336_v59 = vadd.f32 %v2335_v7, %v2283_v36  ;;  %v2353_v8 = vmax.f32 %v2334_v11, 0.0 }
 0x296   : > { %v2288_v62 = vpop.f32.mrf.mxu0  ;;  %v2341_v47 = vpop.f32.mrf.mxu1 }
 0x297   : > { %v2289_v6 = vadd.f32 %v2288_v62, %v2236_v23  ;;  %v2338_v46 = vadd.f32 %v2337_v3, %v2285_v61  ;;  %v2356_v3 = vmax.f32 %v2336_v59, 0.0 }
 0x298   : > { %v2290_v2 = vpop.f32.mrf.mxu0  ;;  %v2343_v39 = vpop.f32.mrf.mxu1 }
 0x299   : > { %v2291_v19 = vadd.f32 %v2290_v2, %v2238_v57  ;;  %v2342_v15 = vadd.f32 %v2341_v47, %v2289_v6  ;;  %v2357_v34 = vmax.f32 %v2338_v46, 0.0  ;;  %v2368_v56 = vpack.c.bf16 %v2356_v3, %v2352_v12 }
 0x29a   : > { %v2292_v45 = vpop.f32.mrf.mxu0  ;;  %v2345_v21 = vpop.f32.mrf.mxu1 }
 0x29b   : > { %v2293_v17 = vadd.f32 %v2292_v45, %v2240_v55  ;;  %v2344_v40 = vadd.f32 %v2343_v39, %v2291_v19  ;;  %v2360_v32 = vmax.f32 %v2342_v15, 0.0  ;;  %v2369_v60 = vpack.c.bf16 %v2357_v34, %v2353_v8 }
 0x29c   : > { %v2294_v25 = vpop.f32.mrf.mxu0  ;;  %v2347_v49 = vpop.f32.mrf.mxu1 }
 0x29d   : > { %v2346_v38 = vadd.f32 %v2345_v21, %v2293_v17  ;;  %v2295_v41 = vadd.f32 %v2294_v25, %v2242_v44  ;;  %v2361_v27 = vmax.f32 %v2344_v40, 0.0 }
 0x29f   : > { %v2348_v52 = vadd.f32 %v2347_v49, %v2295_v41  ;;  %v2364_v29 = vmax.f32 %v2346_v38, 0.0 }
 0x2a1   : > { %v2365_v35 = vmax.f32 %v2348_v52, 0.0  ;;  %v2372_v54 = vpack.c.bf16 %v2364_v29, %v2360_v32 }
 0x2a3   : > { %v2373_v58 = vpack.c.bf16 %v2365_v35, %v2361_v27 }
 0x2a5   : > { %2440 = vmatprep.subr.bf16.mxu1 %v2373_v58 }
 0x2a6   : > { %2441 = vmatpush1.bf16.msra.mxu1 %v2372_v54 }
 0x2a7   : > { %2442 = vmatprep.subr.bf16.mxu1 %v2369_v60 }
 0x2aa   : > { %2443 = vmatpush1.bf16.msra.mxu1 %v2368_v56 }
 0x2ad   : > { %4699 = vmatmul.mubr.msk.bf16.vlgmr.msra.gmra.mxu1 %vm2381_vm0, %v6890_v4 }
 0x2ed   : > { %v2419_v50 = vpop.f32.mrf.mxu0 }
 0x2ee   : > { %2501 = vst [vmem:[%s6247_s10] sm:$0xff] %v2419_v50 }
 0x2ef   : > { %v2421_v7 = vpop.f32.mrf.mxu0 }
 0x2f0   : > { %v4975_v62 = vpack.c.bf16 %v2421_v7, %v2419_v50  ;;  %2502 = vst [vmem:[%s6247_s10 + $0x8] sm:$0xff] %v2421_v7 }
 0x2f1   : > { %v2423_v47 = vpop.f32.mrf.mxu0 }
 0x2f2   : > { %2497 = vst [vmem:[%s2496_s13] sm:$0xff] %v4975_v62  ;;  %2505 = vst [vmem:[%s6247_s10 + $0x20] sm:$0xff] %v2423_v47 }
 0x2f3   : > { %v2425_v37 = vpop.f32.mrf.mxu0 }
 0x2f4   : > { %v4977_v57 = vpack.c.bf16 %v2425_v37, %v2423_v47  ;;  %2506 = vst [vmem:[%s6247_s10 + $0x28] sm:$0xff] %v2425_v37 }
 0x2f6   : > { %2499 = vst [vmem:[%s2496_s13 + $0x20] sm:$0xff] %v4977_v57 }
 0x36d   : > { %v2462_v42 = vpop.f32.mrf.mxu1 }
 0x36e   : > { %2503 = vst [vmem:[%s6247_s10 + $0x10] sm:$0xff] %v2462_v42 }
 0x36f   : > { %v2464_v4 = vpop.f32.mrf.mxu1 }
 0x370   : > { %v4976_v33 = vpack.c.bf16 %v2464_v4, %v2462_v42  ;;  %2504 = vst [vmem:[%s6247_s10 + $0x18] sm:$0xff] %v2464_v4 }
 0x371   : > { %v2466_v23 = vpop.f32.mrf.mxu1 }
 0x372   : > { %2498 = vst [vmem:[%s2496_s13 + $0x8] sm:$0xff] %v4976_v33  ;;  %2507 = vst [vmem:[%s6247_s10 + $0x30] sm:$0xff] %v2466_v23 }
 0x373   : > { %v2468_v2 = vpop.f32.mrf.mxu1 }
 0x374   : > { %v4978_v39 = vpack.c.bf16 %v2468_v2, %v2466_v23  ;;  %2508 = vst [vmem:[%s6247_s10 + $0x38] sm:$0xff] %v2468_v2 }
 0x376   : > { %2500 = vst [vmem:[%s2496_s13 + $0x28] sm:$0xff] %v4978_v39 }
 0x377 PF: > { %p4705_p12 = scmp.ne.s32.totalorder %s5285_s22, 1 }
 0x379   : > { %2512 = sbr.rel (%p4705_p12) target bundleno = 1421 (0x58d), region = 60 }
 0x37e   : > { %v4743_v63 = vcombine.high %v5563_v28, %v5569_v30  ;;  %v8519_v55 = vld [vmem:[#allocation92_spill] sm:$0xff]  ;;  %v8520_v61 = vld [vmem:[#allocation90_spill] sm:$0xff]  ;;  %v4742_v0 = vcombine.low %v5563_v28, %v5569_v30  ;;  %v4739_v45 = vcombine.high %v5551_v24, %v5557_v26  ;;  %v4803_v21 = vcombine.high %v5743_v51, %v5749_v9  ;;  %v2522_v25 = vld [vmem:[%s7584_s4 + $0x8] sm:$0xff] }
 0x37f   : > { %v4807_v19 = vcombine.high %v8520_v61, %v8519_v55  ;;  %v4806_v6 = vcombine.low %v8520_v61, %v8519_v55  ;;  %v4738_v44 = vcombine.low %v5551_v24, %v5557_v26  ;;  %v4802_v53 = vcombine.low %v5743_v51, %v5749_v9  ;;  %v2521_v17 = vld [vmem:[%s7584_s4] sm:$0xff]  ;;  %v8521_v51 = vld [vmem:[#allocation83_spill] sm:$0xff]  ;;  %v8523_v46 = vld [vmem:[#allocation81_spill] sm:$0xff] }
 0x380   : > { %3853 = vmatprep.subr.bf16.mxu0 %v4743_v63  ;;  %v4735_v28 = vcombine.high %v5539_v20, %v5545_v22  ;;  %v4799_v30 = vcombine.high %v5731_v43, %v5737_v5  ;;  %v5307_v31 = vmov 0   ;;  %v4734_v9 = vcombine.low %v5539_v20, %v5545_v22  ;;  %v8522_v22 = vld [vmem:[#allocation24_spill] sm:$0xff]  ;;  %v8524_v40 = vld [vmem:[#allocation79_spill] sm:$0xff]  ;;  %v8526_v49 = vld [vmem:[#allocation77_spill] sm:$0xff] }
 0x381   : > { %3896 = vmatprep.subr.bf16.mxu1 %v4807_v19  ;;  %3854 = vmatpush1.bf16.msra.mxu0 %v4742_v0  ;;  %v4798_v24 = vcombine.low %v5731_v43, %v5737_v5  ;;  %v4731_v26 = vcombine.high %v5527_v16, %v5533_v18  ;;  %v4795_v36 = vcombine.high %v8521_v51, %v5725_v1  ;;  %v8527_v11 = vld [vmem:[#allocation75_spill] sm:$0xff]  ;;  %v6969_v59 = vld [vmem:[#allocation2 + $0x8] sm:$0xff]  ;;  %v8538_v23 = vld [vmem:[#allocation124_spill] sm:$0xff] }
 0x382   : > { %3897 = vmatpush1.bf16.msra.mxu1 %v4806_v6  ;;  %3855 = vmatprep.subr.bf16.mxu0 %v4739_v45  ;;  %v4730_v20 = vcombine.low %v5527_v16, %v5533_v18  ;;  %v4794_v5 = vcombine.low %v8521_v51, %v5725_v1  ;;  %v4727_v43 = vcombine.high %v8522_v22, %v5521_v14  ;;  %v6961_v16 = vld [vmem:[#allocation2] sm:$0xff]  ;;  %v8525_v1 = vld [vmem:[#allocation21_spill] sm:$0xff]  ;;  %v8528_v48 = vld [vmem:[#allocation19_spill] sm:$0xff] }
 0x383   : > { %3898 = vmatprep.subr.bf16.mxu1 %v4803_v21  ;;  %5094 = vset.pattern.permute.xlu0 %v5307_v31  ;;  %v4791_v38 = vcombine.high %v8524_v40, %v8523_v46  ;;  %v4726_v41 = vcombine.low %v8522_v22, %v5521_v14  ;;  %v4790_v13 = vcombine.low %v8524_v40, %v8523_v46  ;;  %v6963_v18 = vld [vmem:[#allocation2 + $0x20] sm:$0xff]  ;;  %v6971_v29 = vld [vmem:[#allocation2 + $0x28] sm:$0xff]  ;;  %v8531_v3 = vld [vmem:[#allocation71_spill] sm:$0xff] }
 0x384   : > { %2525 = vperm.xlu0 %5094, %v2521_v17   ;;  %v4723_v15 = vcombine.high %v8525_v1, %v5509_v10  ;;  %v4787_v52 = vcombine.high %v8527_v11, %v8526_v49  ;;  %v6975_v14 = vcombine.high %v6961_v16, %v6963_v18  ;;  %v4722_v34 = vcombine.low %v8525_v1, %v5509_v10  ;;  %v8529_v32 = vld [vmem:[#allocation17_spill] sm:$0xff]  ;;  %v8532_v12 = vld [vmem:[#allocation15_spill] sm:$0xff]  ;;  %v8539_v2 = vld [vmem:[#allocation122_spill] sm:$0xff] }
 0x385   : > { %3856 = vmatpush1.bf16.msra.mxu0 %v4738_v44  ;;  %v4786_v27 = vcombine.low %v8527_v11, %v8526_v49  ;;  %v6983_v35 = vcombine.high %v6969_v59, %v6971_v29  ;;  %v4719_v8 = vcombine.high %v8529_v32, %v8528_v48  ;;  %v8530_v58 = vld [vmem:[#allocation73_spill] sm:$0xff]  ;;  %v4718_v10 = vcombine.low %v8529_v32, %v8528_v48  ;;  %v8535_v62 = vld [vmem:[#allocation67_spill] sm:$0xff]  ;;  %v8542_v6 = vld [vmem:[#allocation120_spill] sm:$0xff] }
 0x386   : > { %3899 = vmatpush1.bf16.msra.mxu1 %v4802_v53  ;;  %3857 = vmatprep.subr.bf16.mxu0 %v4735_v28  ;;  %v4783_v54 = vcombine.high %v8531_v3, %v8530_v58  ;;  %v4782_v60 = vcombine.low %v8531_v3, %v8530_v58  ;;  %v8533_v56 = vld [vmem:[#allocation13_spill] sm:$0xff]  ;;  %v8537_v4 = vld [vmem:[#allocation63_spill] sm:$0xff]  ;;  %v4839_v39 = vcombine.high %v8539_v2, %v8538_v23  ;;  %v8543_v45 = vld [vmem:[#allocation118_spill] sm:$0xff] }
 0x387   : > { %3900 = vmatprep.subr.bf16.mxu1 %v4799_v30  ;;  %3885 = vmatprep.mubr.bf16.mxu0 %v6975_v14  ;;  %v4715_v50 = vcombine.high %v8533_v56, %v8532_v12  ;;  %v8534_v7 = vld [vmem:[#allocation69_spill] sm:$0xff]  ;;  %v4714_v37 = vcombine.low %v8533_v56, %v8532_v12  ;;  %v4838_v55 = vcombine.low %v8539_v2, %v8538_v23  ;;  %v8541_v19 = vld [vmem:[#allocation59_spill] sm:$0xff]  ;;  %v8546_v31 = vld [vmem:[#allocation116_spill] sm:$0xff] }
 0x388   : > { %2530 = vperm.xlu0 %5094, %v2522_v25   ;;  %3928 = vmatprep.mubr.bf16.mxu1 %v6983_v35  ;;  %v4779_v47 = vcombine.high %v8535_v62, %v8534_v7  ;;  %v4778_v57 = vcombine.low %v8535_v62, %v8534_v7  ;;  %v8536_v42 = vld [vmem:[#allocation65_spill] sm:$0xff]  ;;  %v4835_v21 = vcombine.high %v8543_v45, %v8542_v6  ;;  %v8545_v30 = vld [vmem:[#allocation55_spill] sm:$0xff]  ;;  %v8551_v22 = vld [vmem:[#allocation110_spill] sm:$0xff] }
 0x389   : > { %3858 = vmatpush1.bf16.msra.mxu0 %v4734_v9  ;;  %v4775_v33 = vcombine.high %v8537_v4, %v8536_v42  ;;  %v4774_v63 = vcombine.low %v8537_v4, %v8536_v42  ;;  %v8540_v61 = vld [vmem:[#allocation61_spill] sm:$0xff]  ;;  %v4834_v53 = vcombine.low %v8543_v45, %v8542_v6  ;;  %v8547_v9 = vld [vmem:[#allocation114_spill] sm:$0xff]  ;;  %v8549_v25 = vld [vmem:[#allocation51_spill] sm:$0xff] }
 0x38a   : > { %3901 = vmatpush1.bf16.msra.mxu1 %v4798_v24  ;;  %3859 = vmatprep.subr.bf16.mxu0 %v4731_v26  ;;  %v4771_v0 = vcombine.high %v8541_v19, %v8540_v61  ;;  %v4770_v44 = vcombine.low %v8541_v19, %v8540_v61  ;;  %v8544_v28 = vld [vmem:[#allocation57_spill] sm:$0xff]  ;;  %v4831_v24 = vcombine.high %v8547_v9, %v8546_v31  ;;  %v8554_v1 = vld [vmem:[#allocation108_spill] sm:$0xff]  ;;  %v7071_v45 = vld [vmem:[#allocation2 + $0x10] sm:$0xff] }
 0x38b   : > { %3902 = vmatprep.subr.bf16.mxu1 %v4795_v36  ;;  %v4767_v17 = vcombine.high %v8545_v30, %v8544_v28  ;;  %v4766_v26 = vcombine.low %v8545_v30, %v8544_v28  ;;  %v4830_v51 = vcombine.low %v8547_v9, %v8546_v31  ;;  %v8548_v36 = vld [vmem:[#allocation53_spill] sm:$0xff]  ;;  %v8558_v32 = vld [vmem:[#allocation104_spill] sm:$0xff]  ;;  %v7083_v28 = vld [vmem:[#allocation2 + $0x18] sm:$0xff] }
 0x38c   : > { %v4762_v46 = vcombine.low %v8549_v25, %v8548_v36  ;;  %v8562_v56 = vld [vmem:[#allocation100_spill] sm:$0xff]  ;;  %v7085_v30 = vld [vmem:[#allocation2 + $0x38] sm:$0xff]  ;;  %v8575_v9 = vld [vmem:[#allocation214_spill] sm:$0xff] }
 0x38d   : > { %3860 = vmatpush1.bf16.msra.mxu0 %v4730_v20  ;;  %v4763_v20 = vcombine.high %v8549_v25, %v8548_v36  ;;  %v8566_v4 = vld [vmem:[#allocation96_spill] sm:$0xff] }
 0x38e   : > { %3903 = vmatpush1.bf16.msra.mxu1 %v4794_v5  ;;  %3861 = vmatprep.subr.bf16.mxu0 %v4727_v43  ;;  %v8550_v5 = vld [vmem:[#allocation112_spill] sm:$0xff] }
 0x38f   : > { %3904 = vmatprep.subr.bf16.mxu1 %v4791_v38  ;;  %v4827_v43 = vcombine.high %v8551_v22, %v8550_v5  ;;  %v4826_v40 = vcombine.low %v8551_v22, %v8550_v5  ;;  %v8552_v38 = vld [vmem:[#allocation49_spill] sm:$0xff]  ;;  %v8570_v19 = vld [vmem:[#allocation220_spill] sm:$0xff]  ;;  %v8577_v5 = vld [vmem:[#allocation146_spill] sm:$0xff] }
 0x391   : > { %3862 = vmatpush1.bf16.msra.mxu0 %v4726_v41  ;;  %v8553_v41 = vld [vmem:[#allocation47_spill] sm:$0xff] }
 0x392   : > { %3905 = vmatpush1.bf16.msra.mxu1 %v4790_v13  ;;  %3863 = vmatprep.subr.bf16.mxu0 %v4723_v15  ;;  %v4759_v13 = vcombine.high %v8553_v41, %v8552_v38  ;;  %v8555_v15 = vld [vmem:[#allocation106_spill] sm:$0xff]  ;;  %v4758_v11 = vcombine.low %v8553_v41, %v8552_v38 }
 0x393   : > { %3906 = vmatprep.subr.bf16.mxu1 %v4787_v52  ;;  %v4823_v49 = vcombine.high %v8555_v15, %v8554_v1  ;;  %v4822_v52 = vcombine.low %v8555_v15, %v8554_v1  ;;  %v8581_v1 = vld [vmem:[#allocation142_spill] sm:$0xff] }
 0x395   : > { %3864 = vmatpush1.bf16.msra.mxu0 %v4722_v34  ;;  %v8556_v34 = vld [vmem:[#allocation45_spill] sm:$0xff] }
 0x396   : > { %3907 = vmatpush1.bf16.msra.mxu1 %v4786_v27  ;;  %3865 = vmatprep.subr.bf16.mxu0 %v4719_v8  ;;  %v8557_v27 = vld [vmem:[#allocation43_spill] sm:$0xff]  ;;  %v8559_v8 = vld [vmem:[#allocation102_spill] sm:$0xff] }
 0x397   : > { %3908 = vmatprep.subr.bf16.mxu1 %v4783_v54  ;;  %v4755_v48 = vcombine.high %v8557_v27, %v8556_v34  ;;  %v4819_v58 = vcombine.high %v8559_v8, %v8558_v32  ;;  %v4754_v3 = vcombine.low %v8557_v27, %v8556_v34  ;;  %v4818_v54 = vcombine.low %v8559_v8, %v8558_v32  ;;  %v8585_v32 = vld [vmem:[#allocation138_spill] sm:$0xff] }
 0x399   : > { %3866 = vmatpush1.bf16.msra.mxu0 %v4718_v10  ;;  %v8560_v10 = vld [vmem:[#allocation41_spill] sm:$0xff] }
 0x39a   : > { %3909 = vmatpush1.bf16.msra.mxu1 %v4782_v60  ;;  %3867 = vmatprep.subr.bf16.mxu0 %v4715_v50  ;;  %v8561_v60 = vld [vmem:[#allocation39_spill] sm:$0xff]  ;;  %v8563_v50 = vld [vmem:[#allocation98_spill] sm:$0xff] }
 0x39b   : > { %3910 = vmatprep.subr.bf16.mxu1 %v4779_v47  ;;  %v4751_v12 = vcombine.high %v8561_v60, %v8560_v10  ;;  %v4815_v7 = vcombine.high %v8563_v50, %v8562_v56  ;;  %v4750_v62 = vcombine.low %v8561_v60, %v8560_v10  ;;  %v4814_v47 = vcombine.low %v8563_v50, %v8562_v56  ;;  %v8589_v56 = vld [vmem:[#allocation134_spill] sm:$0xff] }
 0x39d   : > { %3868 = vmatpush1.bf16.msra.mxu0 %v4714_v37  ;;  %v8564_v37 = vld [vmem:[#allocation37_spill] sm:$0xff] }
 0x39e   : > { %3911 = vmatpush1.bf16.msra.mxu1 %v4778_v57  ;;  %3869 = vmatprep.subr.bf16.mxu0 %v4775_v33  ;;  %v8565_v57 = vld [vmem:[#allocation35_spill] sm:$0xff]  ;;  %v8567_v33 = vld [vmem:[#allocation94_spill] sm:$0xff] }
 0x39f   : > { %3912 = vmatprep.subr.bf16.mxu1 %v4839_v39  ;;  %v4747_v42 = vcombine.high %v8565_v57, %v8564_v37  ;;  %v4811_v23 = vcombine.high %v8567_v33, %v8566_v4  ;;  %v4746_v2 = vcombine.low %v8565_v57, %v8564_v37  ;;  %v4810_v39 = vcombine.low %v8567_v33, %v8566_v4  ;;  %v8593_v4 = vld [vmem:[#allocation130_spill] sm:$0xff] }
 0x3a1   : > { %3870 = vmatpush2.bf16.msra.mxu0 %v4774_v63  ;;  %v8568_v63 = vld [vmem:[#allocation156_spill] sm:$0xff] }
 0x3a2   : > { %3913 = vmatpush2.bf16.msra.mxu1 %v4838_v55  ;;  %3871 = vmatprep.subr.bf16.mxu0 %v4771_v0  ;;  %v8569_v55 = vld [vmem:[#allocation154_spill] sm:$0xff] }
 0x3a3   : > { %3914 = vmatprep.subr.bf16.mxu1 %v4835_v21  ;;  %v4871_v61 = vcombine.high %v8569_v55, %v8568_v63  ;;  %v8571_v0 = vld [vmem:[#allocation218_spill] sm:$0xff]  ;;  %v7075_v21 = vcombine.low %v6961_v16, %v6963_v18  ;;  %v8572_v16 = vld [vmem:[#allocation152_spill] sm:$0xff] }
 0x3a4   : > { %v4935_v6 = vcombine.high %v8571_v0, %v8570_v19  ;;  %v4934_v31 = vcombine.low %v8571_v0, %v8570_v19  ;;  %v8573_v18 = vld [vmem:[#allocation150_spill] sm:$0xff] }
 0x3a5   : > { %3872 = vmatpush2.bf16.msra.mxu0 %v4770_v44  ;;  %v7079_v44 = vcombine.low %v6969_v59, %v6971_v29  ;;  %v4867_v59 = vcombine.high %v8573_v18, %v8572_v16  ;;  %v8574_v29 = vld [vmem:[#allocation216_spill] sm:$0xff]  ;;  %v4866_v36 = vcombine.low %v8573_v18, %v8572_v16  ;;  %v8597_v19 = vld [vmem:[#allocation126_spill] sm:$0xff] }
 0x3a6   : > { %3915 = vmatpush2.bf16.msra.mxu1 %v4834_v53  ;;  %3873 = vmatprep.subr.bf16.mxu0 %v4767_v17  ;;  %v7081_v53 = vld [vmem:[#allocation2 + $0x30] sm:$0xff]  ;;  %v4870_v17 = vcombine.low %v8569_v55, %v8568_v63  ;;  %v4930_v25 = vcombine.low %v8575_v9, %v8574_v29 }
 0x3a7   : > { %3916 = vmatprep.subr.bf16.mxu1 %v4831_v24  ;;  %v4931_v24 = vcombine.high %v8575_v9, %v8574_v29  ;;  %v8601_v29 = vld [vmem:[#allocation186_spill] sm:$0xff] }
 0x3a9   : > { %3874 = vmatpush2.bf16.msra.mxu0 %v4766_v26  ;;  %v7097_v26 = vcombine.high %v7071_v45, %v7081_v53 }
 0x3aa   : > { %3917 = vmatpush2.bf16.msra.mxu1 %v4830_v51  ;;  %3875 = vmatprep.subr.bf16.mxu0 %v4763_v20  ;;  %v7101_v51 = vcombine.high %v7083_v28, %v7085_v30  ;;  %v8576_v20 = vld [vmem:[#allocation148_spill] sm:$0xff] }
 0x3ab   : > { %3918 = vmatprep.subr.bf16.mxu1 %v4827_v43  ;;  %v4863_v22 = vcombine.high %v8577_v5, %v8576_v20  ;;  %v8578_v43 = vld [vmem:[#allocation212_spill] sm:$0xff]  ;;  %v4862_v38 = vcombine.low %v8577_v5, %v8576_v20 }
 0x3ad   : > { %3876 = vmatpush2.bf16.msra.mxu0 %v4762_v46  ;;  %v8579_v46 = vld [vmem:[#allocation210_spill] sm:$0xff] }
 0x3ae   : > { %3919 = vmatpush2.bf16.msra.mxu1 %v4826_v40  ;;  %3877 = vmatprep.subr.bf16.mxu0 %v4759_v13  ;;  %v4927_v40 = vcombine.high %v8579_v46, %v8578_v43  ;;  %v4926_v41 = vcombine.low %v8579_v46, %v8578_v43  ;;  %v8580_v13 = vld [vmem:[#allocation144_spill] sm:$0xff]  ;;  %v8605_v43 = vld [vmem:[#allocation182_spill] sm:$0xff] }
 0x3af   : > { %3920 = vmatprep.subr.bf16.mxu1 %v4823_v49  ;;  %v4859_v15 = vcombine.high %v8581_v1, %v8580_v13  ;;  %v8582_v49 = vld [vmem:[#allocation208_spill] sm:$0xff]  ;;  %v4858_v34 = vcombine.low %v8581_v1, %v8580_v13 }
 0x3b1   : > { %3878 = vmatpush2.bf16.msra.mxu0 %v4758_v11  ;;  %v8583_v11 = vld [vmem:[#allocation206_spill] sm:$0xff] }
 0x3b2   : > { %3921 = vmatpush2.bf16.msra.mxu1 %v4822_v52  ;;  %3879 = vmatprep.subr.bf16.mxu0 %v4755_v48  ;;  %v4923_v52 = vcombine.high %v8583_v11, %v8582_v49  ;;  %v4922_v27 = vcombine.low %v8583_v11, %v8582_v49  ;;  %v8584_v48 = vld [vmem:[#allocation140_spill] sm:$0xff]  ;;  %v8609_v49 = vld [vmem:[#allocation178_spill] sm:$0xff] }
 0x3b3   : > { %3922 = vmatprep.subr.bf16.mxu1 %v4819_v58  ;;  %v4855_v8 = vcombine.high %v8585_v32, %v8584_v48  ;;  %v8586_v58 = vld [vmem:[#allocation204_spill] sm:$0xff]  ;;  %v4854_v10 = vcombine.low %v8585_v32, %v8584_v48 }
 0x3b5   : > { %3880 = vmatpush2.bf16.msra.mxu0 %v4754_v3  ;;  %v8587_v3 = vld [vmem:[#allocation202_spill] sm:$0xff] }
 0x3b6   : > { %3923 = vmatpush2.bf16.msra.mxu1 %v4818_v54  ;;  %3881 = vmatprep.subr.bf16.mxu0 %v4751_v12  ;;  %v4919_v54 = vcombine.high %v8587_v3, %v8586_v58  ;;  %v4918_v60 = vcombine.low %v8587_v3, %v8586_v58  ;;  %v8588_v12 = vld [vmem:[#allocation136_spill] sm:$0xff]  ;;  %v8613_v58 = vld [vmem:[#allocation174_spill] sm:$0xff] }
 0x3b7   : > { %3924 = vmatprep.subr.bf16.mxu1 %v4815_v7  ;;  %v4851_v50 = vcombine.high %v8589_v56, %v8588_v12  ;;  %v8590_v7 = vld [vmem:[#allocation200_spill] sm:$0xff]  ;;  %v4850_v37 = vcombine.low %v8589_v56, %v8588_v12 }
 0x3b9   : > { %3882 = vmatpush2.bf16.msra.mxu0 %v4750_v62  ;;  %v8591_v62 = vld [vmem:[#allocation198_spill] sm:$0xff] }
 0x3ba   : > { %3925 = vmatpush2.bf16.msra.mxu1 %v4814_v47  ;;  %3883 = vmatprep.subr.bf16.mxu0 %v4747_v42  ;;  %v4915_v47 = vcombine.high %v8591_v62, %v8590_v7  ;;  %v4914_v57 = vcombine.low %v8591_v62, %v8590_v7  ;;  %v8592_v42 = vld [vmem:[#allocation132_spill] sm:$0xff]  ;;  %v8617_v7 = vld [vmem:[#allocation170_spill] sm:$0xff] }
 0x3bb   : > { %3926 = vmatprep.subr.bf16.mxu1 %v4811_v23  ;;  %v4847_v33 = vcombine.high %v8593_v4, %v8592_v42  ;;  %v8594_v23 = vld [vmem:[#allocation196_spill] sm:$0xff]  ;;  %v4846_v63 = vcombine.low %v8593_v4, %v8592_v42 }
 0x3bd   : > { %3884 = vmatpush2.bf16.msra.mxu0 %v4746_v2  ;;  %v8595_v2 = vld [vmem:[#allocation194_spill] sm:$0xff] }
 0x3be   : > { %3927 = vmatpush2.bf16.msra.mxu1 %v4810_v39  ;;  %3939 = vmatprep.subr.bf16.mxu0 %v4871_v61  ;;  %v4911_v39 = vcombine.high %v8595_v2, %v8594_v23  ;;  %v4910_v55 = vcombine.low %v8595_v2, %v8594_v23  ;;  %v8596_v61 = vld [vmem:[#allocation128_spill] sm:$0xff]  ;;  %v8621_v23 = vld [vmem:[#allocation166_spill] sm:$0xff] }
 0x3bf   : > { %3982 = vmatprep.subr.bf16.mxu1 %v4935_v6  ;;  %v4843_v0 = vcombine.high %v8597_v19, %v8596_v61  ;;  %v8598_v6 = vld [vmem:[#allocation192_spill] sm:$0xff]  ;;  %v4842_v16 = vcombine.low %v8597_v19, %v8596_v61 }
 0x3c0   : > { %3886 = vmatmul.mubr.bf16.vlgmr.msra.gmra.mxu0 %v7075_v21 }
 0x3c1   : > { %3929 = vmatmul.mubr.bf16.vlgmr.msra.gmra.mxu1 %v7079_v44  ;;  %3940 = vmatpush1.bf16.msra.mxu0 %v4870_v17  ;;  %v8599_v17 = vld [vmem:[#allocation190_spill] sm:$0xff] }
 0x3c2   : > { %3983 = vmatpush1.bf16.msra.mxu1 %v4934_v31  ;;  %3941 = vmatprep.subr.bf16.mxu0 %v4867_v59  ;;  %v4907_v31 = vcombine.high %v8599_v17, %v8598_v6  ;;  %v4906_v18 = vcombine.low %v8599_v17, %v8598_v6  ;;  %v8600_v59 = vld [vmem:[#allocation188_spill] sm:$0xff]  ;;  %v8625_v6 = vld [vmem:[#allocation162_spill] sm:$0xff] }
 0x3c3   : > { %3984 = vmatprep.subr.bf16.mxu1 %v4931_v24  ;;  %3971 = vmatprep.mubr.bf16.mxu0 %v7097_v26  ;;  %v4903_v9 = vcombine.high %v8601_v29, %v8600_v59  ;;  %v8602_v24 = vld [vmem:[#allocation252_spill] sm:$0xff]  ;;  %v4902_v20 = vcombine.low %v8601_v29, %v8600_v59 }
 0x3c4   : > { %4014 = vmatprep.mubr.bf16.mxu1 %v7101_v51 }
 0x3c5   : > { %3942 = vmatpush1.bf16.msra.mxu0 %v4866_v36  ;;  %v8603_v36 = vld [vmem:[#allocation250_spill] sm:$0xff] }
 0x3c6   : > { %3985 = vmatpush1.bf16.msra.mxu1 %v4930_v25  ;;  %3943 = vmatprep.subr.bf16.mxu0 %v4863_v22  ;;  %v4967_v25 = vcombine.high %v8603_v36, %v8602_v24  ;;  %v4966_v5 = vcombine.low %v8603_v36, %v8602_v24  ;;  %v8604_v22 = vld [vmem:[#allocation184_spill] sm:$0xff]  ;;  %v8629_v24 = vld [vmem:[#allocation158_spill] sm:$0xff] }
 0x3c7   : > { %3986 = vmatprep.subr.bf16.mxu1 %v4927_v40  ;;  %v4899_v46 = vcombine.high %v8605_v43, %v8604_v22  ;;  %v8606_v40 = vld [vmem:[#allocation248_spill] sm:$0xff]  ;;  %v4898_v13 = vcombine.low %v8605_v43, %v8604_v22 }
 0x3c9   : > { %3944 = vmatpush1.bf16.msra.mxu0 %v4862_v38  ;;  %v8607_v38 = vld [vmem:[#allocation246_spill] sm:$0xff] }
 0x3ca   : > { %3987 = vmatpush1.bf16.msra.mxu1 %v4926_v41  ;;  %3945 = vmatprep.subr.bf16.mxu0 %v4859_v15  ;;  %v4963_v41 = vcombine.high %v8607_v38, %v8606_v40  ;;  %v4962_v1 = vcombine.low %v8607_v38, %v8606_v40  ;;  %v8608_v15 = vld [vmem:[#allocation180_spill] sm:$0xff]  ;;  %v8633_v40 = vld [vmem:[#allocation33_spill] sm:$0xff] }
 0x3cb   : > { %3988 = vmatprep.subr.bf16.mxu1 %v4923_v52  ;;  %v4895_v11 = vcombine.high %v8609_v49, %v8608_v15  ;;  %v8610_v52 = vld [vmem:[#allocation244_spill] sm:$0xff]  ;;  %v4894_v48 = vcombine.low %v8609_v49, %v8608_v15  ;;  %v7229_v15 = vcombine.low %v7071_v45, %v7081_v53  ;;  %v7233_v49 = vcombine.low %v7083_v28, %v7085_v30 }
 0x3cc   : > { %v8639_v45 = vld [vmem:[#allocation88_spill] sm:$0xff] }
 0x3cd   : > { %3946 = vmatpush1.bf16.msra.mxu0 %v4858_v34  ;;  %v8611_v34 = vld [vmem:[#allocation242_spill] sm:$0xff] }
 0x3ce   : > { %3989 = vmatpush1.bf16.msra.mxu1 %v4922_v27  ;;  %3947 = vmatprep.subr.bf16.mxu0 %v4855_v8  ;;  %v4959_v27 = vcombine.high %v8611_v34, %v8610_v52  ;;  %v4958_v32 = vcombine.low %v8611_v34, %v8610_v52  ;;  %v8612_v8 = vld [vmem:[#allocation176_spill] sm:$0xff] }
 0x3cf   : > { %3990 = vmatprep.subr.bf16.mxu1 %v4919_v54  ;;  %v4891_v3 = vcombine.high %v8613_v58, %v8612_v8  ;;  %v8614_v54 = vld [vmem:[#allocation240_spill] sm:$0xff]  ;;  %v4890_v12 = vcombine.low %v8613_v58, %v8612_v8  ;;  %v8640_v8 = vld [vmem:[#allocation30_spill] sm:$0xff]  ;;  %v8641_v58 = vld [vmem:[#allocation29_spill] sm:$0xff] }
 0x3d0   : > { %v8636_v34 = vld [vmem:[#allocation32_spill] sm:$0xff] }
 0x3d1   : > { %3948 = vmatpush1.bf16.msra.mxu0 %v4854_v10  ;;  %v8615_v10 = vld [vmem:[#allocation238_spill] sm:$0xff] }
 0x3d2   : > { %3991 = vmatpush1.bf16.msra.mxu1 %v4918_v60  ;;  %3949 = vmatprep.subr.bf16.mxu0 %v4851_v50  ;;  %v4955_v60 = vcombine.high %v8615_v10, %v8614_v54  ;;  %v4954_v56 = vcombine.low %v8615_v10, %v8614_v54  ;;  %v8616_v50 = vld [vmem:[#allocation172_spill] sm:$0xff]  ;;  %v8642_v54 = vld [vmem:[#allocation87_spill] sm:$0xff]  ;;  %v8643_v10 = vld [vmem:[#allocation86_spill] sm:$0xff] }
 0x3d3   : > { %3992 = vmatprep.subr.bf16.mxu1 %v4915_v47  ;;  %v4887_v62 = vcombine.high %v8617_v7, %v8616_v50  ;;  %v8618_v47 = vld [vmem:[#allocation236_spill] sm:$0xff]  ;;  %v4886_v42 = vcombine.low %v8617_v7, %v8616_v50  ;;  %v8645_v7 = vld [vmem:[#allocation27_spill] sm:$0xff] }
 0x3d4   : > { %v8644_v50 = vld [vmem:[#allocation28_spill] sm:$0xff] }
 0x3d5   : > { %3950 = vmatpush1.bf16.msra.mxu0 %v4850_v37  ;;  %v8619_v37 = vld [vmem:[#allocation234_spill] sm:$0xff] }
 0x3d6   : > { %3993 = vmatpush1.bf16.msra.mxu1 %v4914_v57  ;;  %3951 = vmatprep.subr.bf16.mxu0 %v4847_v33  ;;  %v4951_v57 = vcombine.high %v8619_v37, %v8618_v47  ;;  %v4950_v4 = vcombine.low %v8619_v37, %v8618_v47  ;;  %v8620_v33 = vld [vmem:[#allocation168_spill] sm:$0xff]  ;;  %v8646_v47 = vld [vmem:[#allocation85_spill] sm:$0xff] }
 0x3d7   : > { %3994 = vmatprep.subr.bf16.mxu1 %v4911_v39  ;;  %v4883_v2 = vcombine.high %v8621_v23, %v8620_v33  ;;  %v8622_v39 = vld [vmem:[#allocation232_spill] sm:$0xff]  ;;  %v4882_v61 = vcombine.low %v8621_v23, %v8620_v33  ;;  %v8650_v23 = vld [vmem:[#allocation82_spill] sm:$0xff] }
 0x3d8   : > { %v8647_v37 = vld [vmem:[#allocation84_spill] sm:$0xff] }
 0x3d9   : > { %3952 = vmatpush1.bf16.msra.mxu0 %v4846_v63  ;;  %v8623_v63 = vld [vmem:[#allocation230_spill] sm:$0xff] }
 0x3da   : > { %3995 = vmatpush1.bf16.msra.mxu1 %v4910_v55  ;;  %3953 = vmatprep.subr.bf16.mxu0 %v4843_v0  ;;  %v4947_v55 = vcombine.high %v8623_v63, %v8622_v39  ;;  %v4946_v19 = vcombine.low %v8623_v63, %v8622_v39  ;;  %v8624_v0 = vld [vmem:[#allocation164_spill] sm:$0xff] }
 0x3db   : > { %3996 = vmatprep.subr.bf16.mxu1 %v4907_v31  ;;  %v4879_v17 = vcombine.high %v8625_v6, %v8624_v0  ;;  %v8626_v31 = vld [vmem:[#allocation228_spill] sm:$0xff]  ;;  %v4878_v59 = vcombine.low %v8625_v6, %v8624_v0  ;;  %v8654_v6 = vld [vmem:[#allocation78_spill] sm:$0xff] }
 0x3dd   : > { %3954 = vmatpush1.bf16.msra.mxu0 %v4842_v16  ;;  %v8627_v16 = vld [vmem:[#allocation226_spill] sm:$0xff] }
 0x3de   : > { %3997 = vmatpush1.bf16.msra.mxu1 %v4906_v18  ;;  %3955 = vmatprep.subr.bf16.mxu0 %v4903_v9  ;;  %v4943_v18 = vcombine.high %v8627_v16, %v8626_v31  ;;  %v4942_v29 = vcombine.low %v8627_v16, %v8626_v31  ;;  %v8628_v9 = vld [vmem:[#allocation160_spill] sm:$0xff] }
 0x3df   : > { %3998 = vmatprep.subr.bf16.mxu1 %v4967_v25  ;;  %v4875_v36 = vcombine.high %v8629_v24, %v8628_v9  ;;  %v8630_v25 = vld [vmem:[#allocation224_spill] sm:$0xff]  ;;  %v4874_v22 = vcombine.low %v8629_v24, %v8628_v9  ;;  %v8658_v24 = vld [vmem:[#allocation74_spill] sm:$0xff] }
 0x3e1   : > { %3956 = vmatpush2.bf16.msra.mxu0 %v4902_v20  ;;  %v8631_v20 = vld [vmem:[#allocation222_spill] sm:$0xff] }
 0x3e2   : > { %3999 = vmatpush2.bf16.msra.mxu1 %v4966_v5  ;;  %3957 = vmatprep.subr.bf16.mxu0 %v4899_v46  ;;  %v4939_v5 = vcombine.high %v8631_v20, %v8630_v25  ;;  %v4938_v43 = vcombine.low %v8631_v20, %v8630_v25  ;;  %v8632_v46 = vld [vmem:[#allocation34_spill] sm:$0xff] }
 0x3e3   : > { %4000 = vmatprep.subr.bf16.mxu1 %v4963_v41  ;;  %v4745_v38 = vcombine.high %v8633_v40, %v8632_v46  ;;  %v8634_v41 = vld [vmem:[#allocation93_spill] sm:$0xff] }
 0x3e5   : > { %3958 = vmatpush2.bf16.msra.mxu0 %v4898_v13  ;;  %v8635_v13 = vld [vmem:[#allocation91_spill] sm:$0xff] }
 0x3e6   : > { %4001 = vmatpush2.bf16.msra.mxu1 %v4962_v1  ;;  %3959 = vmatprep.subr.bf16.mxu0 %v4895_v11  ;;  %v4809_v1 = vcombine.high %v8635_v13, %v8634_v41  ;;  %v4744_v11 = vcombine.low %v8633_v40, %v8632_v46  ;;  %v4808_v52 = vcombine.low %v8635_v13, %v8634_v41  ;;  %v8662_v40 = vld [vmem:[#allocation70_spill] sm:$0xff] }
 0x3e7   : > { %4002 = vmatprep.subr.bf16.mxu1 %v4959_v27  ;;  %v8637_v27 = vld [vmem:[#allocation31_spill] sm:$0xff] }
 0x3e8   : > { %v4740_v28 = vcombine.low %v8637_v27, %v8636_v34 }
 0x3e9   : > { %3960 = vmatpush2.bf16.msra.mxu0 %v4894_v48  ;;  %v4741_v48 = vcombine.high %v8637_v27, %v8636_v34  ;;  %v8666_v27 = vld [vmem:[#allocation125_spill] sm:$0xff] }
 0x3ea   : > { %4003 = vmatpush2.bf16.msra.mxu1 %v4958_v32  ;;  %3961 = vmatprep.subr.bf16.mxu0 %v4891_v3  ;;  %v8638_v32 = vld [vmem:[#allocation89_spill] sm:$0xff]  ;;  %v4737_v3 = vcombine.high %v8641_v58, %v8640_v8 }
 0x3eb   : > { %4004 = vmatprep.subr.bf16.mxu1 %v4955_v60  ;;  %v4805_v53 = vcombine.high %v8639_v45, %v8638_v32  ;;  %v4804_v30 = vcombine.low %v8639_v45, %v8638_v32  ;;  %v4801_v60 = vcombine.high %v8643_v10, %v8642_v54 }
 0x3ed   : > { %3962 = vmatpush2.bf16.msra.mxu0 %v4890_v12  ;;  %v4736_v12 = vcombine.low %v8641_v58, %v8640_v8  ;;  %v8670_v58 = vld [vmem:[#allocation121_spill] sm:$0xff] }
 0x3ee   : > { %4005 = vmatpush2.bf16.msra.mxu1 %v4954_v56  ;;  %3963 = vmatprep.subr.bf16.mxu0 %v4887_v62  ;;  %v4800_v56 = vcombine.low %v8643_v10, %v8642_v54  ;;  %v4733_v62 = vcombine.high %v8645_v7, %v8644_v50 }
 0x3ef   : > { %4006 = vmatprep.subr.bf16.mxu1 %v4951_v57  ;;  %v4797_v57 = vcombine.high %v8647_v37, %v8646_v47 }
 0x3f1   : > { %3964 = vmatpush2.bf16.msra.mxu0 %v4886_v42  ;;  %v8648_v42 = vld [vmem:[#allocation26_spill] sm:$0xff] }
 0x3f2   : > { %4007 = vmatpush2.bf16.msra.mxu1 %v4950_v4  ;;  %3965 = vmatprep.subr.bf16.mxu0 %v4883_v2  ;;  %v8649_v4 = vld [vmem:[#allocation25_spill] sm:$0xff]  ;;  %v8651_v2 = vld [vmem:[#allocation80_spill] sm:$0xff] }
 0x3f3   : > { %4008 = vmatprep.subr.bf16.mxu1 %v4947_v55  ;;  %v4729_v33 = vcombine.high %v8649_v4, %v8648_v42  ;;  %v4793_v39 = vcombine.high %v8651_v2, %v8650_v23  ;;  %v4728_v63 = vcombine.low %v8649_v4, %v8648_v42  ;;  %v4792_v55 = vcombine.low %v8651_v2, %v8650_v23  ;;  %v8678_v4 = vld [vmem:[#allocation113_spill] sm:$0xff] }
 0x3f5   : > { %3966 = vmatpush2.bf16.msra.mxu0 %v4882_v61  ;;  %v8652_v61 = vld [vmem:[#allocation23_spill] sm:$0xff] }
 0x3f6   : > { %4009 = vmatpush2.bf16.msra.mxu1 %v4946_v19  ;;  %3967 = vmatprep.subr.bf16.mxu0 %v4879_v17  ;;  %v8653_v19 = vld [vmem:[#allocation22_spill] sm:$0xff]  ;;  %v8655_v17 = vld [vmem:[#allocation76_spill] sm:$0xff] }
 0x3f7   : > { %4010 = vmatprep.subr.bf16.mxu1 %v4943_v18  ;;  %v4725_v0 = vcombine.high %v8653_v19, %v8652_v61  ;;  %v4789_v31 = vcombine.high %v8655_v17, %v8654_v6  ;;  %v4724_v16 = vcombine.low %v8653_v19, %v8652_v61  ;;  %v4788_v18 = vcombine.low %v8655_v17, %v8654_v6  ;;  %v8682_v19 = vld [vmem:[#allocation109_spill] sm:$0xff] }
 0x3f9   : > { %3968 = vmatpush2.bf16.msra.mxu0 %v4878_v59  ;;  %v8656_v59 = vld [vmem:[#allocation20_spill] sm:$0xff] }
 0x3fa   : > { %4011 = vmatpush2.bf16.msra.mxu1 %v4942_v29  ;;  %3969 = vmatprep.subr.bf16.mxu0 %v4875_v36  ;;  %v8657_v29 = vld [vmem:[#allocation18_spill] sm:$0xff]  ;;  %v8659_v36 = vld [vmem:[#allocation72_spill] sm:$0xff] }
 0x3fb   : > { %4012 = vmatprep.subr.bf16.mxu1 %v4939_v5  ;;  %v4721_v9 = vcombine.high %v8657_v29, %v8656_v59  ;;  %v4785_v25 = vcombine.high %v8659_v36, %v8658_v24  ;;  %v4720_v20 = vcombine.low %v8657_v29, %v8656_v59  ;;  %v4784_v5 = vcombine.low %v8659_v36, %v8658_v24  ;;  %v8686_v29 = vld [vmem:[#allocation105_spill] sm:$0xff] }
 0x3fd   : > { %3970 = vmatpush2.bf16.msra.mxu0 %v4874_v22  ;;  %v8660_v22 = vld [vmem:[#allocation16_spill] sm:$0xff] }
 0x3fe   : > { %4013 = vmatpush2.bf16.msra.mxu1 %v4938_v43  ;;  %4025 = vmatprep.subr.bf16.mxu0 %v4745_v38  ;;  %v8661_v43 = vld [vmem:[#allocation14_spill] sm:$0xff]  ;;  %v8663_v38 = vld [vmem:[#allocation68_spill] sm:$0xff] }
 0x3ff   : > { %4068 = vmatprep.subr.bf16.mxu1 %v4809_v1  ;;  %v4717_v46 = vcombine.high %v8661_v43, %v8660_v22  ;;  %v4781_v41 = vcombine.high %v8663_v38, %v8662_v40  ;;  %v4716_v13 = vcombine.low %v8661_v43, %v8660_v22  ;;  %v4780_v1 = vcombine.low %v8663_v38, %v8662_v40  ;;  %v8690_v43 = vld [vmem:[#allocation101_spill] sm:$0xff] }
 0x400   : > { %3972 = vmatmul.mubr.bf16.vlgmr.msra.gmra.mxu0 %v7229_v15 }
 0x401   : > { %4015 = vmatmul.mubr.bf16.vlgmr.msra.gmra.mxu1 %v7233_v49  ;;  %4026 = vmatpush1.bf16.msra.mxu0 %v4744_v11  ;;  %v8664_v11 = vld [vmem:[#allocation66_spill] sm:$0xff] }
 0x402   : > { %4069 = vmatpush1.bf16.msra.mxu1 %v4808_v52  ;;  %4027 = vmatprep.subr.bf16.mxu0 %v4741_v48  ;;  %v8665_v52 = vld [vmem:[#allocation64_spill] sm:$0xff]  ;;  %v8667_v48 = vld [vmem:[#allocation123_spill] sm:$0xff] }
 0x403   : > { %4070 = vmatprep.subr.bf16.mxu1 %v4805_v53  ;;  %4057 = vmatprep.mubr.bf16.mxu0 %v6975_v14  ;;  %v4732_v14 = vcombine.low %v8645_v7, %v8644_v50  ;;  %v4777_v34 = vcombine.high %v8665_v52, %v8664_v11  ;;  %v4841_v32 = vcombine.high %v8667_v48, %v8666_v27  ;;  %v8674_v7 = vld [vmem:[#allocation117_spill] sm:$0xff] }
 0x404   : > { %4100 = vmatprep.mubr.bf16.mxu1 %v6983_v35  ;;  %v4796_v35 = vcombine.low %v8647_v37, %v8646_v47  ;;  %v4776_v45 = vcombine.low %v8665_v52, %v8664_v11  ;;  %v4840_v53 = vcombine.low %v8667_v48, %v8666_v27  ;;  %v8694_v52 = vld [vmem:[#allocation97_spill] sm:$0xff] }
 0x405   : > { %4028 = vmatpush1.bf16.msra.mxu0 %v4740_v28  ;;  %v8668_v28 = vld [vmem:[#allocation62_spill] sm:$0xff] }
 0x406   : > { %4071 = vmatpush1.bf16.msra.mxu1 %v4804_v30  ;;  %4029 = vmatprep.subr.bf16.mxu0 %v4737_v3  ;;  %v8669_v30 = vld [vmem:[#allocation60_spill] sm:$0xff]  ;;  %v8671_v3 = vld [vmem:[#allocation119_spill] sm:$0xff] }
 0x407   : > { %4072 = vmatprep.subr.bf16.mxu1 %v4801_v60  ;;  %v4773_v8 = vcombine.high %v8669_v30, %v8668_v28  ;;  %v4837_v54 = vcombine.high %v8671_v3, %v8670_v58  ;;  %v4772_v10 = vcombine.low %v8669_v30, %v8668_v28  ;;  %v4836_v60 = vcombine.low %v8671_v3, %v8670_v58  ;;  %v8698_v30 = vld [vmem:[#allocation221_spill] sm:$0xff] }
 0x409   : > { %4030 = vmatpush1.bf16.msra.mxu0 %v4736_v12  ;;  %v8672_v12 = vld [vmem:[#allocation58_spill] sm:$0xff] }
 0x40a   : > { %4073 = vmatpush1.bf16.msra.mxu1 %v4800_v56  ;;  %4031 = vmatprep.subr.bf16.mxu0 %v4733_v62  ;;  %v8673_v56 = vld [vmem:[#allocation56_spill] sm:$0xff]  ;;  %v8675_v62 = vld [vmem:[#allocation115_spill] sm:$0xff] }
 0x40b   : > { %4074 = vmatprep.subr.bf16.mxu1 %v4797_v57  ;;  %v4769_v50 = vcombine.high %v8673_v56, %v8672_v12  ;;  %v4833_v47 = vcombine.high %v8675_v62, %v8674_v7  ;;  %v4768_v37 = vcombine.low %v8673_v56, %v8672_v12  ;;  %v4832_v57 = vcombine.low %v8675_v62, %v8674_v7  ;;  %v8702_v56 = vld [vmem:[#allocation217_spill] sm:$0xff] }
 0x40d   : > { %4032 = vmatpush1.bf16.msra.mxu0 %v4732_v14  ;;  %v8676_v14 = vld [vmem:[#allocation54_spill] sm:$0xff] }
 0x40e   : > { %4075 = vmatpush1.bf16.msra.mxu1 %v4796_v35  ;;  %4033 = vmatprep.subr.bf16.mxu0 %v4729_v33  ;;  %v8677_v35 = vld [vmem:[#allocation52_spill] sm:$0xff]  ;;  %v8679_v33 = vld [vmem:[#allocation111_spill] sm:$0xff] }
 0x40f   : > { %4076 = vmatprep.subr.bf16.mxu1 %v4793_v39  ;;  %v4765_v42 = vcombine.high %v8677_v35, %v8676_v14  ;;  %v4829_v23 = vcombine.high %v8679_v33, %v8678_v4  ;;  %v4764_v2 = vcombine.low %v8677_v35, %v8676_v14  ;;  %v4828_v39 = vcombine.low %v8679_v33, %v8678_v4  ;;  %v8706_v35 = vld [vmem:[#allocation213_spill] sm:$0xff] }
 0x410   : > { %v8708_v33 = vld [vmem:[#allocation145_spill] sm:$0xff] }
 0x411   : > { %4034 = vmatpush1.bf16.msra.mxu0 %v4728_v63  ;;  %v8680_v63 = vld [vmem:[#allocation50_spill] sm:$0xff] }
 0x412   : > { %4077 = vmatpush1.bf16.msra.mxu1 %v4792_v55  ;;  %4035 = vmatprep.subr.bf16.mxu0 %v4725_v0  ;;  %v8681_v55 = vld [vmem:[#allocation48_spill] sm:$0xff]  ;;  %v8683_v0 = vld [vmem:[#allocation107_spill] sm:$0xff] }
 0x413   : > { %4078 = vmatprep.subr.bf16.mxu1 %v4789_v31  ;;  %v4761_v61 = vcombine.high %v8681_v55, %v8680_v63  ;;  %v4825_v6 = vcombine.high %v8683_v0, %v8682_v19  ;;  %v4760_v17 = vcombine.low %v8681_v55, %v8680_v63  ;;  %v4824_v31 = vcombine.low %v8683_v0, %v8682_v19  ;;  %v8711_v63 = vld [vmem:[#allocation207_spill] sm:$0xff] }
 0x414   : > { %v8713_v19 = vld [vmem:[#allocation139_spill] sm:$0xff] }
 0x415   : > { %4036 = vmatpush1.bf16.msra.mxu0 %v4724_v16  ;;  %v8684_v16 = vld [vmem:[#allocation46_spill] sm:$0xff] }
 0x416   : > { %4079 = vmatpush1.bf16.msra.mxu1 %v4788_v18  ;;  %4037 = vmatprep.subr.bf16.mxu0 %v4721_v9  ;;  %v8685_v18 = vld [vmem:[#allocation44_spill] sm:$0xff]  ;;  %v8687_v9 = vld [vmem:[#allocation103_spill] sm:$0xff] }
 0x417   : > { %4080 = vmatprep.subr.bf16.mxu1 %v4785_v25  ;;  %v4757_v59 = vcombine.high %v8685_v18, %v8684_v16  ;;  %v4821_v24 = vcombine.high %v8687_v9, %v8686_v29  ;;  %v4756_v36 = vcombine.low %v8685_v18, %v8684_v16  ;;  %v4820_v25 = vcombine.low %v8687_v9, %v8686_v29  ;;  %v8717_v29 = vld [vmem:[#allocation135_spill] sm:$0xff] }
 0x419   : > { %4038 = vmatpush1.bf16.msra.mxu0 %v4720_v20  ;;  %v8688_v20 = vld [vmem:[#allocation42_spill] sm:$0xff] }
 0x41a   : > { %4081 = vmatpush1.bf16.msra.mxu1 %v4784_v5  ;;  %4039 = vmatprep.subr.bf16.mxu0 %v4717_v46  ;;  %v8689_v5 = vld [vmem:[#allocation40_spill] sm:$0xff]  ;;  %v8691_v46 = vld [vmem:[#allocation99_spill] sm:$0xff] }
 0x41b   : > { %4082 = vmatprep.subr.bf16.mxu1 %v4781_v41  ;;  %v4753_v22 = vcombine.high %v8689_v5, %v8688_v20  ;;  %v4817_v40 = vcombine.high %v8691_v46, %v8690_v43  ;;  %v4752_v38 = vcombine.low %v8689_v5, %v8688_v20  ;;  %v4816_v41 = vcombine.low %v8691_v46, %v8690_v43  ;;  %v8721_v43 = vld [vmem:[#allocation131_spill] sm:$0xff] }
 0x41d   : > { %4040 = vmatpush1.bf16.msra.mxu0 %v4716_v13  ;;  %v8692_v13 = vld [vmem:[#allocation38_spill] sm:$0xff] }
 0x41e   : > { %4083 = vmatpush1.bf16.msra.mxu1 %v4780_v1  ;;  %4041 = vmatprep.subr.bf16.mxu0 %v4777_v34  ;;  %v8693_v1 = vld [vmem:[#allocation36_spill] sm:$0xff]  ;;  %v8695_v34 = vld [vmem:[#allocation95_spill] sm:$0xff] }
 0x41f   : > { %4084 = vmatprep.subr.bf16.mxu1 %v4841_v32  ;;  %v4749_v11 = vcombine.high %v8693_v1, %v8692_v13  ;;  %v4813_v27 = vcombine.high %v8695_v34, %v8694_v52  ;;  %v4748_v48 = vcombine.low %v8693_v1, %v8692_v13  ;;  %v4812_v32 = vcombine.low %v8695_v34, %v8694_v52  ;;  %v8725_v52 = vld [vmem:[#allocation127_spill] sm:$0xff] }
 0x421   : > { %4042 = vmatpush2.bf16.msra.mxu0 %v4776_v45  ;;  %v8696_v45 = vld [vmem:[#allocation157_spill] sm:$0xff] }
 0x422   : > { %4085 = vmatpush2.bf16.msra.mxu1 %v4840_v53  ;;  %4043 = vmatprep.subr.bf16.mxu0 %v4773_v8  ;;  %v8697_v53 = vld [vmem:[#allocation155_spill] sm:$0xff] }
 0x423   : > { %4086 = vmatprep.subr.bf16.mxu1 %v4837_v54  ;;  %v4873_v28 = vcombine.high %v8697_v53, %v8696_v45  ;;  %v8699_v8 = vld [vmem:[#allocation219_spill] sm:$0xff]  ;;  %v4872_v3 = vcombine.low %v8697_v53, %v8696_v45 }
 0x424   : > { %v4937_v58 = vcombine.high %v8699_v8, %v8698_v30  ;;  %v4936_v54 = vcombine.low %v8699_v8, %v8698_v30  ;;  %v8729_v30 = vld [vmem:[#allocation187_spill] sm:$0xff] }
 0x425   : > { %4044 = vmatpush2.bf16.msra.mxu0 %v4772_v10  ;;  %v8700_v10 = vld [vmem:[#allocation153_spill] sm:$0xff] }
 0x426   : > { %4087 = vmatpush2.bf16.msra.mxu1 %v4836_v60  ;;  %4045 = vmatprep.subr.bf16.mxu0 %v4769_v50  ;;  %v8701_v60 = vld [vmem:[#allocation151_spill] sm:$0xff] }
 0x427   : > { %4088 = vmatprep.subr.bf16.mxu1 %v4833_v47  ;;  %v4869_v12 = vcombine.high %v8701_v60, %v8700_v10  ;;  %v8703_v50 = vld [vmem:[#allocation215_spill] sm:$0xff]  ;;  %v4868_v62 = vcombine.low %v8701_v60, %v8700_v10 }
 0x428   : > { %v4933_v7 = vcombine.high %v8703_v50, %v8702_v56  ;;  %v4932_v47 = vcombine.low %v8703_v50, %v8702_v56  ;;  %v8733_v56 = vld [vmem:[#allocation183_spill] sm:$0xff] }
 0x429   : > { %4046 = vmatpush2.bf16.msra.mxu0 %v4768_v37  ;;  %v8704_v37 = vld [vmem:[#allocation149_spill] sm:$0xff] }
 0x42a   : > { %4089 = vmatpush2.bf16.msra.mxu1 %v4832_v57  ;;  %4047 = vmatprep.subr.bf16.mxu0 %v4765_v42  ;;  %v8705_v57 = vld [vmem:[#allocation147_spill] sm:$0xff] }
 0x42b   : > { %4090 = vmatprep.subr.bf16.mxu1 %v4829_v23  ;;  %v4865_v14 = vcombine.high %v8705_v57, %v8704_v37  ;;  %v8707_v42 = vld [vmem:[#allocation211_spill] sm:$0xff] }
 0x42c   : > { %v4929_v4 = vcombine.high %v8707_v42, %v8706_v35  ;;  %v8709_v23 = vld [vmem:[#allocation143_spill] sm:$0xff] }
 0x42d   : > { %4048 = vmatpush2.bf16.msra.mxu0 %v4764_v2  ;;  %v4861_v2 = vcombine.high %v8709_v23, %v8708_v33 }
 0x42e   : > { %4091 = vmatpush2.bf16.msra.mxu1 %v4828_v39  ;;  %4049 = vmatprep.subr.bf16.mxu0 %v4761_v61  ;;  %v8710_v39 = vld [vmem:[#allocation209_spill] sm:$0xff] }
 0x42f   : > { %4092 = vmatprep.subr.bf16.mxu1 %v4825_v6  ;;  %v4925_v55 = vcombine.high %v8711_v63, %v8710_v39  ;;  %v8712_v61 = vld [vmem:[#allocation141_spill] sm:$0xff] }
 0x430   : > { %v4857_v0 = vcombine.high %v8713_v19, %v8712_v61  ;;  %v8714_v6 = vld [vmem:[#allocation205_spill] sm:$0xff]  ;;  %v4856_v16 = vcombine.low %v8713_v19, %v8712_v61 }
 0x431   : > { %4050 = vmatpush2.bf16.msra.mxu0 %v4760_v17  ;;  %v8715_v17 = vld [vmem:[#allocation203_spill] sm:$0xff] }
 0x432   : > { %4093 = vmatpush2.bf16.msra.mxu1 %v4824_v31  ;;  %4051 = vmatprep.subr.bf16.mxu0 %v4757_v59  ;;  %v4921_v31 = vcombine.high %v8715_v17, %v8714_v6  ;;  %v4920_v18 = vcombine.low %v8715_v17, %v8714_v6  ;;  %v8716_v59 = vld [vmem:[#allocation137_spill] sm:$0xff]  ;;  %v8745_v6 = vld [vmem:[#allocation171_spill] sm:$0xff] }
 0x433   : > { %4094 = vmatprep.subr.bf16.mxu1 %v4821_v24  ;;  %v4853_v9 = vcombine.high %v8717_v29, %v8716_v59  ;;  %v8718_v24 = vld [vmem:[#allocation201_spill] sm:$0xff]  ;;  %v4852_v20 = vcombine.low %v8717_v29, %v8716_v59 }
 0x435   : > { %4052 = vmatpush2.bf16.msra.mxu0 %v4756_v36  ;;  %v8719_v36 = vld [vmem:[#allocation199_spill] sm:$0xff] }
 0x436   : > { %4095 = vmatpush2.bf16.msra.mxu1 %v4820_v25  ;;  %4053 = vmatprep.subr.bf16.mxu0 %v4753_v22  ;;  %v4917_v25 = vcombine.high %v8719_v36, %v8718_v24  ;;  %v4916_v5 = vcombine.low %v8719_v36, %v8718_v24  ;;  %v8720_v22 = vld [vmem:[#allocation133_spill] sm:$0xff]  ;;  %v8749_v24 = vld [vmem:[#allocation167_spill] sm:$0xff] }
 0x437   : > { %4096 = vmatprep.subr.bf16.mxu1 %v4817_v40  ;;  %v4849_v46 = vcombine.high %v8721_v43, %v8720_v22  ;;  %v8722_v40 = vld [vmem:[#allocation197_spill] sm:$0xff]  ;;  %v4848_v13 = vcombine.low %v8721_v43, %v8720_v22 }
 0x439   : > { %4054 = vmatpush2.bf16.msra.mxu0 %v4752_v38  ;;  %v8723_v38 = vld [vmem:[#allocation195_spill] sm:$0xff] }
 0x43a   : > { %4097 = vmatpush2.bf16.msra.mxu1 %v4816_v41  ;;  %4055 = vmatprep.subr.bf16.mxu0 %v4749_v11  ;;  %v4913_v41 = vcombine.high %v8723_v38, %v8722_v40  ;;  %v4912_v1 = vcombine.low %v8723_v38, %v8722_v40  ;;  %v8724_v11 = vld [vmem:[#allocation129_spill] sm:$0xff]  ;;  %v8753_v40 = vld [vmem:[#allocation163_spill] sm:$0xff] }
 0x43b   : > { %4098 = vmatprep.subr.bf16.mxu1 %v4813_v27  ;;  %v4845_v34 = vcombine.high %v8725_v52, %v8724_v11  ;;  %v8726_v27 = vld [vmem:[#allocation193_spill] sm:$0xff]  ;;  %v4844_v45 = vcombine.low %v8725_v52, %v8724_v11 }
 0x43d   : > { %4056 = vmatpush2.bf16.msra.mxu0 %v4748_v48  ;;  %v8727_v48 = vld [vmem:[#allocation191_spill] sm:$0xff] }
 0x43e   : > { %4099 = vmatpush2.bf16.msra.mxu1 %v4812_v32  ;;  %4111 = vmatprep.subr.bf16.mxu0 %v4873_v28  ;;  %v4909_v32 = vcombine.high %v8727_v48, %v8726_v27  ;;  %v4908_v53 = vcombine.low %v8727_v48, %v8726_v27  ;;  %v8728_v28 = vld [vmem:[#allocation189_spill] sm:$0xff]  ;;  %v8757_v27 = vld [vmem:[#allocation159_spill] sm:$0xff] }
 0x43f   : > { %4154 = vmatprep.subr.bf16.mxu1 %v4937_v58  ;;  %v4905_v8 = vcombine.high %v8729_v30, %v8728_v28  ;;  %v8730_v58 = vld [vmem:[#allocation253_spill] sm:$0xff]  ;;  %v4904_v10 = vcombine.low %v8729_v30, %v8728_v28 }
 0x440   : > { %4058 = vmatmul.mubr.bf16.vlgmr.msra.gmra.mxu0 %v7075_v21  ;;  %v4864_v21 = vcombine.low %v8705_v57, %v8704_v37 }
 0x441   : > { %4101 = vmatmul.mubr.bf16.vlgmr.msra.gmra.mxu1 %v7079_v44  ;;  %4112 = vmatpush1.bf16.msra.mxu0 %v4872_v3  ;;  %v4928_v44 = vcombine.low %v8707_v42, %v8706_v35  ;;  %v8731_v3 = vld [vmem:[#allocation251_spill] sm:$0xff] }
 0x442   : > { %4155 = vmatpush1.bf16.msra.mxu1 %v4936_v54  ;;  %4113 = vmatprep.subr.bf16.mxu0 %v4869_v12  ;;  %v4969_v54 = vcombine.high %v8731_v3, %v8730_v58  ;;  %v4968_v60 = vcombine.low %v8731_v3, %v8730_v58  ;;  %v8732_v12 = vld [vmem:[#allocation185_spill] sm:$0xff]  ;;  %v8737_v35 = vld [vmem:[#allocation179_spill] sm:$0xff]  ;;  %v7497_v3 = vpop.permute.xlu0 %2525 }
 0x443   : > { %4156 = vmatprep.subr.bf16.mxu1 %v4933_v7  ;;  %4143 = vmatprep.mubr.bf16.mxu0 %v7097_v26  ;;  %v4860_v26 = vcombine.low %v8709_v23, %v8708_v33  ;;  %v4901_v50 = vcombine.high %v8733_v56, %v8732_v12  ;;  %v8734_v7 = vld [vmem:[#allocation249_spill] sm:$0xff]  ;;  %v4900_v37 = vcombine.low %v8733_v56, %v8732_v12 }
 0x444   : > { %4186 = vmatprep.mubr.bf16.mxu1 %v7101_v51  ;;  %v4924_v51 = vcombine.low %v8711_v63, %v8710_v39  ;;  %v8741_v39 = vld [vmem:[#allocation175_spill] sm:$0xff] }
 0x445   : > { %4114 = vmatpush1.bf16.msra.mxu0 %v4868_v62  ;;  %v8735_v62 = vld [vmem:[#allocation247_spill] sm:$0xff] }
 0x446   : > { %4157 = vmatpush1.bf16.msra.mxu1 %v4932_v47  ;;  %4115 = vmatprep.subr.bf16.mxu0 %v4865_v14  ;;  %v4965_v47 = vcombine.high %v8735_v62, %v8734_v7  ;;  %v4964_v57 = vcombine.low %v8735_v62, %v8734_v7  ;;  %v8736_v14 = vld [vmem:[#allocation181_spill] sm:$0xff]  ;;  %v7499_v56 = vpop.permute.xlu0 %2530 }
 0x447   : > { %4158 = vmatprep.subr.bf16.mxu1 %v4929_v4  ;;  %v4897_v42 = vcombine.high %v8737_v35, %v8736_v14  ;;  %v8738_v4 = vld [vmem:[#allocation245_spill] sm:$0xff]  ;;  %v4896_v33 = vcombine.low %v8737_v35, %v8736_v14 }
 0x449   : > { %4116 = vmatpush1.bf16.msra.mxu0 %v4864_v21  ;;  %v8739_v21 = vld [vmem:[#allocation243_spill] sm:$0xff] }
 0x44a   : > { %4159 = vmatpush1.bf16.msra.mxu1 %v4928_v44  ;;  %4117 = vmatprep.subr.bf16.mxu0 %v4861_v2  ;;  %v4961_v44 = vcombine.high %v8739_v21, %v8738_v4  ;;  %v4960_v23 = vcombine.low %v8739_v21, %v8738_v4  ;;  %v8740_v2 = vld [vmem:[#allocation177_spill] sm:$0xff] }
 0x44b   : > { %4160 = vmatprep.subr.bf16.mxu1 %v4925_v55  ;;  %v4893_v63 = vcombine.high %v8741_v39, %v8740_v2  ;;  %v8742_v55 = vld [vmem:[#allocation241_spill] sm:$0xff]  ;;  %v4892_v61 = vcombine.low %v8741_v39, %v8740_v2 }
 0x44d   : > { %4118 = vmatpush1.bf16.msra.mxu0 %v4860_v26  ;;  %v8743_v26 = vld [vmem:[#allocation239_spill] sm:$0xff] }
 0x44e   : > { %4161 = vmatpush1.bf16.msra.mxu1 %v4924_v51  ;;  %4119 = vmatprep.subr.bf16.mxu0 %v4857_v0  ;;  %v4957_v51 = vcombine.high %v8743_v26, %v8742_v55  ;;  %v4956_v19 = vcombine.low %v8743_v26, %v8742_v55  ;;  %v8744_v0 = vld [vmem:[#allocation173_spill] sm:$0xff] }
 0x44f   : > { %4162 = vmatprep.subr.bf16.mxu1 %v4921_v31  ;;  %v4889_v17 = vcombine.high %v8745_v6, %v8744_v0  ;;  %v8746_v31 = vld [vmem:[#allocation237_spill] sm:$0xff]  ;;  %v4888_v59 = vcombine.low %v8745_v6, %v8744_v0 }
 0x451   : > { %4120 = vmatpush1.bf16.msra.mxu0 %v4856_v16  ;;  %v8747_v16 = vld [vmem:[#allocation235_spill] sm:$0xff] }
 0x452   : > { %4163 = vmatpush1.bf16.msra.mxu1 %v4920_v18  ;;  %4121 = vmatprep.subr.bf16.mxu0 %v4853_v9  ;;  %v4953_v18 = vcombine.high %v8747_v16, %v8746_v31  ;;  %v4952_v29 = vcombine.low %v8747_v16, %v8746_v31  ;;  %v8748_v9 = vld [vmem:[#allocation169_spill] sm:$0xff] }
 0x453   : > { %4164 = vmatprep.subr.bf16.mxu1 %v4917_v25  ;;  %v4885_v36 = vcombine.high %v8749_v24, %v8748_v9  ;;  %v8750_v25 = vld [vmem:[#allocation233_spill] sm:$0xff]  ;;  %v4884_v22 = vcombine.low %v8749_v24, %v8748_v9 }
 0x455   : > { %4122 = vmatpush1.bf16.msra.mxu0 %v4852_v20  ;;  %v8751_v20 = vld [vmem:[#allocation231_spill] sm:$0xff] }
 0x456   : > { %4165 = vmatpush1.bf16.msra.mxu1 %v4916_v5  ;;  %4123 = vmatprep.subr.bf16.mxu0 %v4849_v46  ;;  %v4949_v5 = vcombine.high %v8751_v20, %v8750_v25  ;;  %v4948_v43 = vcombine.low %v8751_v20, %v8750_v25  ;;  %v8752_v46 = vld [vmem:[#allocation165_spill] sm:$0xff] }
 0x457   : > { %4166 = vmatprep.subr.bf16.mxu1 %v4913_v41  ;;  %v4881_v38 = vcombine.high %v8753_v40, %v8752_v46  ;;  %v8754_v41 = vld [vmem:[#allocation229_spill] sm:$0xff]  ;;  %v4880_v11 = vcombine.low %v8753_v40, %v8752_v46 }
 0x459   : > { %4124 = vmatpush1.bf16.msra.mxu0 %v4848_v13  ;;  %v8755_v13 = vld [vmem:[#allocation227_spill] sm:$0xff] }
 0x45a   : > { %4167 = vmatpush1.bf16.msra.mxu1 %v4912_v1  ;;  %4125 = vmatprep.subr.bf16.mxu0 %v4845_v34  ;;  %v4945_v1 = vcombine.high %v8755_v13, %v8754_v41  ;;  %v4944_v52 = vcombine.low %v8755_v13, %v8754_v41  ;;  %v8756_v34 = vld [vmem:[#allocation161_spill] sm:$0xff] }
 0x45b   : > { %4168 = vmatprep.subr.bf16.mxu1 %v4909_v32  ;;  %v4877_v48 = vcombine.high %v8757_v27, %v8756_v34  ;;  %v8758_v32 = vld [vmem:[#allocation225_spill] sm:$0xff]  ;;  %v4876_v28 = vcombine.low %v8757_v27, %v8756_v34 }
 0x45d   : > { %4126 = vmatpush1.bf16.msra.mxu0 %v4844_v45  ;;  %v8759_v45 = vld [vmem:[#allocation223_spill] sm:$0xff] }
 0x45e   : > { %4169 = vmatpush1.bf16.msra.mxu1 %v4908_v53  ;;  %4127 = vmatprep.subr.bf16.mxu0 %v4905_v8  ;;  %v4941_v53 = vcombine.high %v8759_v45, %v8758_v32  ;;  %v4940_v30 = vcombine.low %v8759_v45, %v8758_v32 }
 0x45f   : > { %4170 = vmatprep.subr.bf16.mxu1 %v4969_v54 }
 0x461   : > { %4128 = vmatpush2.bf16.msra.mxu0 %v4904_v10 }
 0x462   : > { %4171 = vmatpush2.bf16.msra.mxu1 %v4968_v60  ;;  %4129 = vmatprep.subr.bf16.mxu0 %v4901_v50 }
 0x463   : > { %4172 = vmatprep.subr.bf16.mxu1 %v4965_v47 }
 0x465   : > { %4130 = vmatpush2.bf16.msra.mxu0 %v4900_v37 }
 0x466   : > { %4173 = vmatpush2.bf16.msra.mxu1 %v4964_v57  ;;  %4131 = vmatprep.subr.bf16.mxu0 %v4897_v42 }
 0x467   : > { %4174 = vmatprep.subr.bf16.mxu1 %v4961_v44 }
 0x469   : > { %4132 = vmatpush2.bf16.msra.mxu0 %v4896_v33 }
 0x46a   : > { %4175 = vmatpush2.bf16.msra.mxu1 %v4960_v23  ;;  %4133 = vmatprep.subr.bf16.mxu0 %v4893_v63 }
 0x46b   : > { %4176 = vmatprep.subr.bf16.mxu1 %v4957_v51 }
 0x46d   : > { %4134 = vmatpush2.bf16.msra.mxu0 %v4892_v61 }
 0x46e   : > { %4177 = vmatpush2.bf16.msra.mxu1 %v4956_v19  ;;  %4135 = vmatprep.subr.bf16.mxu0 %v4889_v17 }
 0x46f   : > { %4178 = vmatprep.subr.bf16.mxu1 %v4953_v18 }
 0x471   : > { %4136 = vmatpush2.bf16.msra.mxu0 %v4888_v59 }
 0x472   : > { %4179 = vmatpush2.bf16.msra.mxu1 %v4952_v29  ;;  %4137 = vmatprep.subr.bf16.mxu0 %v4885_v36 }
 0x473   : > { %4180 = vmatprep.subr.bf16.mxu1 %v4949_v5 }
 0x475   : > { %4138 = vmatpush2.bf16.msra.mxu0 %v4884_v22 }
 0x476   : > { %4181 = vmatpush2.bf16.msra.mxu1 %v4948_v43  ;;  %4139 = vmatprep.subr.bf16.mxu0 %v4881_v38 }
 0x477   : > { %4182 = vmatprep.subr.bf16.mxu1 %v4945_v1 }
 0x479   : > { %4140 = vmatpush2.bf16.msra.mxu0 %v4880_v11 }
 0x47a   : > { %4183 = vmatpush2.bf16.msra.mxu1 %v4944_v52  ;;  %4141 = vmatprep.subr.bf16.mxu0 %v4877_v48 }
 0x47b   : > { %4184 = vmatprep.subr.bf16.mxu1 %v4941_v53 }
 0x47d   : > { %4142 = vmatpush2.bf16.msra.mxu0 %v4876_v28 }
 0x47e   : > { %4185 = vmatpush2.bf16.msra.mxu1 %v4940_v30 }
 0x480   : > { %4144 = vmatmul.mubr.bf16.vlgmr.msra.gmra.mxu0 %v7229_v15  ;;  %v3887_v8 = vpop.f32.mrf.mxu0 }
 0x481   : > { %4187 = vmatmul.mubr.bf16.vlgmr.msra.gmra.mxu1 %v7233_v49  ;;  %v3930_v58 = vpop.f32.mrf.mxu1  ;;  %v3888_v50 = vadd.f32 %v3887_v8, %v7497_v3 }
 0x482   : > { %v3889_v54 = vpop.f32.mrf.mxu0 }
 0x483   : > { %v3932_v10 = vpop.f32.mrf.mxu1  ;;  %v3890_v47 = vadd.f32 %v3889_v54, %v7497_v3  ;;  %v3931_v57 = vadd.f32 %v3930_v58, %v3888_v50 }
 0x484   : > { %v3891_v60 = vpop.f32.mrf.mxu0 }
 0x485   : > { %v3934_v12 = vpop.f32.mrf.mxu1  ;;  %v3892_v15 = vadd.f32 %v3891_v60, %v7499_v56  ;;  %v3933_v4 = vadd.f32 %v3932_v10, %v3890_v47 }
 0x486   : > { %v3893_v7 = vpop.f32.mrf.mxu0 }
 0x487   : > { %v3936_v62 = vpop.f32.mrf.mxu1  ;;  %v3894_v14 = vadd.f32 %v3893_v7, %v7499_v56  ;;  %v3935_v21 = vadd.f32 %v3934_v12, %v3892_v15 }
 0x489   : > { %v3937_v2 = vadd.f32 %v3936_v62, %v3894_v14 }
 0x4c0   : > { %v3973_v37 = vpop.f32.mrf.mxu0 }
 0x4c1   : > { %v4016_v49 = vpop.f32.mrf.mxu1  ;;  %v3974_v44 = vadd.f32 %v3973_v37, %v3931_v57 }
 0x4c2   : > { %v3975_v35 = vpop.f32.mrf.mxu0 }
 0x4c3   : > { %v4018_v42 = vpop.f32.mrf.mxu1  ;;  %v3976_v39 = vadd.f32 %v3975_v35, %v3933_v4  ;;  %v4017_v26 = vadd.f32 %v4016_v49, %v3974_v44 }
 0x4c4   : > { %v3977_v33 = vpop.f32.mrf.mxu0 }
 0x4c5   : > { %v4020_v23 = vpop.f32.mrf.mxu1  ;;  %v3978_v63 = vadd.f32 %v3977_v33, %v3935_v21  ;;  %v4019_v0 = vadd.f32 %v4018_v42, %v3976_v39 }
 0x4c6   : > { %v3979_v55 = vpop.f32.mrf.mxu0 }
 0x4c7   : > { %v4021_v51 = vadd.f32 %v4020_v23, %v3978_v63  ;;  %v3980_v61 = vadd.f32 %v3979_v55, %v3937_v2  ;;  %v4022_v19 = vpop.f32.mrf.mxu1 }
 0x4c9   : > { %v4197_v6 = vmax.f32 %v4017_v26, %v4021_v51  ;;  %v4023_v17 = vadd.f32 %v4022_v19, %v3980_v61 }
 0x4cb   : > { %v4198_v31 = vrot.slane %v4197_v6, 4  ;;  %v4204_v16 = vmax.f32 %v4019_v0, %v4023_v17 }
 0x4cd   : > { %v4199_v18 = vmax.f32 %v4197_v6, %v4198_v31  ;;  %v4205_v59 = vrot.slane %v4204_v16, 4 }
 0x4cf   : > { %v4200_v29 = vrot.slane %v4199_v18, 2  ;;  %v4206_v9 = vmax.f32 %v4204_v16, %v4205_v59 }
 0x4d1   : > { %v4201_v24 = vmax.f32 %v4199_v18, %v4200_v29  ;;  %v4207_v36 = vrot.slane %v4206_v9, 2 }
 0x4d3   : > { %v4202_v25 = vrot.slane %v4201_v24, 1  ;;  %v4208_v20 = vmax.f32 %v4206_v9, %v4207_v36 }
 0x4d5   : > { %v4203_v5 = vmax.f32 %v4201_v24, %v4202_v25  ;;  %v4209_v22 = vrot.slane %v4208_v20, 1 }
 0x4d7   : > { %v4225_v43 = vsub.f32 %v4017_v26, %v4203_v5  ;;  %v4229_v46 = vsub.f32 %v4021_v51, %v4203_v5  ;;  %v4210_v40 = vmax.f32 %v4208_v20, %v4209_v22 }
 0x4d9   : > { %v4233_v38 = vmul.f32 1.442695, %v4225_v43  ;;  %v4241_v41 = vmul.f32 1.442695, %v4229_v46  ;;  %v4226_v13 = vsub.f32 %v4019_v0, %v4210_v40  ;;  %v4230_v1 = vsub.f32 %v4023_v17, %v4210_v40 }
 0x4db   : > { %5095 = vpow2.f32 %v4233_v38  ;;  %v4235_v11 = vmul.f32 1.442695, %v4226_v13  ;;  %v4243_v52 = vmul.f32 1.442695, %v4230_v1 }
 0x4dc   : > { %5097 = vpow2.f32 %v4241_v41 }
 0x4dd   : > { %5099 = vpow2.f32 %v4235_v11 }
 0x4de   : > { %5101 = vpow2.f32 %v4243_v52 }
 0x4e8   : > { %v5096_v34 = vpop.eup %5095 }
 0x4e9   : > { %v5098_v27 = vpop.eup %5097 }
 0x4ea   : > { %v5100_v48 = vpop.eup %5099  ;;  %v4249_v32 = vadd.f32 %v5098_v27, %v5096_v34 }
 0x4eb   : > { %v5102_v45 = vpop.eup %5101 }
 0x4ec   : > { %v4250_v53 = vrot.slane %v4249_v32, 4  ;;  %v4256_v28 = vadd.f32 %v5102_v45, %v5100_v48 }
 0x4ee   : > { %v4251_v30 = vadd.f32 %v4250_v53, %v4249_v32  ;;  %v4257_v8 = vrot.slane %v4256_v28, 4 }
 0x4f0   : > { %v4252_v58 = vrot.slane %v4251_v30, 2  ;;  %v4258_v54 = vadd.f32 %v4257_v8, %v4256_v28 }
 0x4f2   : > { %v4253_v10 = vadd.f32 %v4252_v58, %v4251_v30  ;;  %v4259_v60 = vrot.slane %v4258_v54, 2 }
 0x4f4   : > { %v4254_v12 = vrot.slane %v4253_v10, 1  ;;  %v4260_v50 = vadd.f32 %v4259_v60, %v4258_v54 }
 0x4f6   : > { %v4255_v7 = vadd.f32 %v4254_v12, %v4253_v10  ;;  %v4261_v62 = vrot.slane %v4260_v50, 1 }
 0x4f8   : > { %5103 = vlog2.f32 %v4255_v7  ;;  %v4262_v47 = vadd.f32 %v4261_v62, %v4260_v50 }
 0x4fa   : > { %5105 = vlog2.f32 %v4262_v47 }
 0x500   : > { %v4059_v21 = vpop.f32.mrf.mxu0 }
 0x501   : > { %v4102_v44 = vpop.f32.mrf.mxu1  ;;  %v4060_v63 = vadd.f32 %v4059_v21, %v7497_v3 }
 0x502   : > { %v4061_v33 = vpop.f32.mrf.mxu0 }
 0x503   : > { %v4104_v23 = vpop.f32.mrf.mxu1  ;;  %v4062_v51 = vadd.f32 %v4061_v33, %v7497_v3  ;;  %v4103_v6 = vadd.f32 %v4102_v44, %v4060_v63 }
 0x504   : > { %v4063_v2 = vpop.f32.mrf.mxu0 }
 0x505   : > { %v5104_v15 = vpop.eup %5103  ;;  %v4106_v39 = vpop.f32.mrf.mxu1  ;;  %v4064_v61 = vadd.f32 %v4063_v2, %v7499_v56  ;;  %v4105_v18 = vadd.f32 %v4104_v23, %v4062_v51 }
 0x506   : > { %v4278_v37 = vmul.f32 0.6931472, %v5104_v15  ;;  %v4065_v55 = vpop.f32.mrf.mxu0 }
 0x507   : > { %v5106_v49 = vpop.eup %5105  ;;  %v4108_v26 = vpop.f32.mrf.mxu1  ;;  %v4066_v17 = vadd.f32 %v4065_v55, %v7499_v56  ;;  %v4107_v59 = vadd.f32 %v4106_v39, %v4064_v61 }
 0x508   : > { %v4285_v57 = vsub.f32 %v4225_v43, %v4278_v37  ;;  %v4289_v14 = vsub.f32 %v4229_v46, %v4278_v37  ;;  %v4280_v35 = vmul.f32 0.6931472, %v5106_v49 }
 0x509   : > { %v4109_v36 = vadd.f32 %v4108_v26, %v4066_v17 }
 0x50a   : > { %4293 = vst [vmem:[%s6247_s10] sm:$0xff] %v4285_v57  ;;  %4297 = vst [vmem:[%s6247_s10 + $0x20] sm:$0xff] %v4289_v14  ;;  %v4286_v42 = vsub.f32 %v4226_v13, %v4280_v35  ;;  %v4290_v4 = vsub.f32 %v4230_v1, %v4280_v35 }
 0x50c   : > { %4294 = vst [vmem:[%s6247_s10 + $0x8] sm:$0xff] %v4286_v42  ;;  %4298 = vst [vmem:[%s6247_s10 + $0x28] sm:$0xff] %v4290_v4 }
 0x540   : > { %v4145_v19 = vpop.f32.mrf.mxu0 }
 0x541   : > { %v4188_v0 = vpop.f32.mrf.mxu1  ;;  %v4146_v29 = vadd.f32 %v4145_v19, %v4103_v6 }
 0x542   : > { %v4147_v31 = vpop.f32.mrf.mxu0 }
 0x543   : > { %v4190_v16 = vpop.f32.mrf.mxu1  ;;  %v4148_v25 = vadd.f32 %v4147_v31, %v4105_v18  ;;  %v4189_v22 = vadd.f32 %v4188_v0, %v4146_v29 }
 0x544   : > { %v4149_v9 = vpop.f32.mrf.mxu0 }
 0x545   : > { %v4192_v24 = vpop.f32.mrf.mxu1  ;;  %v4150_v20 = vadd.f32 %v4149_v9, %v4107_v59  ;;  %v4191_v40 = vadd.f32 %v4190_v16, %v4148_v25 }
 0x546   : > { %v4151_v5 = vpop.f32.mrf.mxu0 }
 0x547   : > { %v4193_v3 = vadd.f32 %v4192_v24, %v4150_v20  ;;  %v4152_v43 = vadd.f32 %v4151_v5, %v4109_v36  ;;  %v4194_v46 = vpop.f32.mrf.mxu1 }
 0x549   : > { %v4211_v38 = vmax.f32 %v4189_v22, %v4193_v3  ;;  %v4195_v41 = vadd.f32 %v4194_v46, %v4152_v43 }
 0x54b   : > { %v4212_v13 = vrot.slane %v4211_v38, 4  ;;  %v4218_v56 = vmax.f32 %v4191_v40, %v4195_v41 }
 0x54d   : > { %v4213_v1 = vmax.f32 %v4211_v38, %v4212_v13  ;;  %v4219_v11 = vrot.slane %v4218_v56, 4 }
 0x54f   : > { %v4214_v52 = vrot.slane %v4213_v1, 2  ;;  %v4220_v34 = vmax.f32 %v4218_v56, %v4219_v11 }
 0x551   : > { %v4215_v27 = vmax.f32 %v4213_v1, %v4214_v52  ;;  %v4221_v48 = vrot.slane %v4220_v34, 2 }
 0x553   : > { %v4216_v32 = vrot.slane %v4215_v27, 1  ;;  %v4222_v45 = vmax.f32 %v4220_v34, %v4221_v48 }
 0x555   : > { %v4217_v53 = vmax.f32 %v4215_v27, %v4216_v32  ;;  %v4223_v28 = vrot.slane %v4222_v45, 1 }
 0x557   : > { %v4227_v30 = vsub.f32 %v4189_v22, %v4217_v53  ;;  %v4231_v8 = vsub.f32 %v4193_v3, %v4217_v53  ;;  %v4224_v58 = vmax.f32 %v4222_v45, %v4223_v28 }
 0x559   : > { %v4237_v54 = vmul.f32 1.442695, %v4227_v30  ;;  %v4245_v10 = vmul.f32 1.442695, %v4231_v8  ;;  %v4228_v60 = vsub.f32 %v4191_v40, %v4224_v58  ;;  %v4232_v12 = vsub.f32 %v4195_v41, %v4224_v58 }
 0x55b   : > { %5107 = vpow2.f32 %v4237_v54  ;;  %v4239_v50 = vmul.f32 1.442695, %v4228_v60  ;;  %v4247_v7 = vmul.f32 1.442695, %v4232_v12 }
 0x55c   : > { %5109 = vpow2.f32 %v4245_v10 }
 0x55d   : > { %5111 = vpow2.f32 %v4239_v50 }
 0x55e   : > { %5113 = vpow2.f32 %v4247_v7 }
 0x568   : > { %v5108_v62 = vpop.eup %5107 }
 0x569   : > { %v5110_v47 = vpop.eup %5109 }
 0x56a   : > { %v5112_v15 = vpop.eup %5111  ;;  %v4263_v37 = vadd.f32 %v5110_v47, %v5108_v62 }
 0x56b   : > { %v5114_v49 = vpop.eup %5113 }
 0x56c   : > { %v4264_v57 = vrot.slane %v4263_v37, 4  ;;  %v4270_v14 = vadd.f32 %v5114_v49, %v5112_v15 }
 0x56e   : > { %v4265_v35 = vadd.f32 %v4264_v57, %v4263_v37  ;;  %v4271_v42 = vrot.slane %v4270_v14, 4 }
 0x570   : > { %v4266_v4 = vrot.slane %v4265_v35, 2  ;;  %v4272_v21 = vadd.f32 %v4271_v42, %v4270_v14 }
 0x572   : > { %v4267_v44 = vadd.f32 %v4266_v4, %v4265_v35  ;;  %v4273_v33 = vrot.slane %v4272_v21, 2 }
 0x574   : > { %v4268_v23 = vrot.slane %v4267_v44, 1  ;;  %v4274_v2 = vadd.f32 %v4273_v33, %v4272_v21 }
 0x576   : > { %v4269_v39 = vadd.f32 %v4268_v23, %v4267_v44  ;;  %v4275_v63 = vrot.slane %v4274_v2, 1 }
 0x578   : > { %5115 = vlog2.f32 %v4269_v39  ;;  %v4276_v55 = vadd.f32 %v4275_v63, %v4274_v2 }
 0x57a   : > { %5117 = vlog2.f32 %v4276_v55 }
 0x585   : > { %v5116_v26 = vpop.eup %5115 }
 0x586   : > { %v4282_v51 = vmul.f32 0.6931472, %v5116_v26 }
 0x587   : > { %v5118_v61 = vpop.eup %5117 }
 0x588   : > { %v4287_v19 = vsub.f32 %v4227_v30, %v4282_v51  ;;  %v4291_v0 = vsub.f32 %v4231_v8, %v4282_v51  ;;  %v4284_v6 = vmul.f32 0.6931472, %v5118_v61 }
 0x58a   : > { %4295 = vst [vmem:[%s6247_s10 + $0x10] sm:$0xff] %v4287_v19  ;;  %4299 = vst [vmem:[%s6247_s10 + $0x30] sm:$0xff] %v4291_v0  ;;  %v4288_v17 = vsub.f32 %v4228_v60, %v4284_v6  ;;  %v4292_v31 = vsub.f32 %v4232_v12, %v4284_v6 }
 0x58c   : > { %4296 = vst [vmem:[%s6247_s10 + $0x18] sm:$0xff] %v4288_v17  ;;  %4300 = vst [vmem:[%s6247_s10 + $0x38] sm:$0xff] %v4292_v31 }
 0x58d PF: > { %s7522_s15 = scalar_lea.hbm %s7585_s5, %s4422_s14  ;;  %s4315_s16 = sshll.u32 %s6247_s10, 4  ;;  %s7525_s16 = int_to_ptr.vmem [resolvable:$true] %s4315_s16 }
 0x58e   : > { %s7529_s11 = scalar_lea.sflag [#allocation5], %s256_s1  ;;  %s5197_s17 = scalar_lea.vmem %s7525_s16, 1024 }
 0x58f   : > { %p5198_p0 = scmp.ne.s32.totalorder %s7525_s16, %s5197_s17  ;;  %s5308_s21 = smov [#allocation9]  }
 0x590   : > { %s5201_s13 = sshll.u32 %s5308_s21, 4  ;;  %s5202_s13 = int_to_ptr.vmem [resolvable:$false] %s5201_s13 }
 0x591   : > { %p5199_p1 = pnand %p5198_p0, %p5394_p3  ;;  %s5203_s22 = scalar_lea.vmem %s5202_s13, 2048 }
 0x592   : > { %p5204_p7 = scmp.lt.s32.totalorder %s7525_s16, %s5202_s13  ;;  %p5205_p9 = scmp.lt.s32.totalorder %s5203_s22, %s5197_s17 }
 0x593   : > { %p5200_p5 = pneg %p5199_p1 }
 0x594   : > { %p5206_p10 = por %p5205_p9, %p5204_p7 }
 0x596   : > { %p5207_p13 = pnand %p5206_p10, %p5200_p5 }
 0x598   : > { %5210 = shalt.err (!%p5207_p13)
}
 0x599   : > { %s5211_s1 = scalar_lea.hbm %s7522_s15, 1024  ;;  %s5215_s26 = scalar_lea.hbm %s7585_s5, 2048 }
 0x59a   : > { %p5212_p2 = scmp.ne.s32.totalorder %s7522_s15, %s5211_s1  ;;  %p5216_p6 = scmp.lt.s32.totalorder %s7522_s15, %s7585_s5 }
 0x59b   : > { %p5217_p11 = scmp.lt.s32.totalorder %s5215_s26, %s5211_s1 }
 0x59c   : > { %p5213_p8 = pnand %p5212_p2, %p5394_p3 }
 0x59d   : > { %p5218_p12 = por %p5217_p11, %p5216_p6 }
 0x59e   : > { %p5214_p4 = pneg %p5213_p8 }
 0x5a0   : > { %p5219_p0 = pnand %p5218_p12, %p5214_p4 }
 0x5a2   : > { %5222 = shalt.err (!%p5219_p0)
}
 0x5a3   : > { %s5309_s6 = smov 512   ;;  %s5310_s12 = smov 1024  }
 0x5a4   : > { %s5311_s17 = smov 32  }
 0x5a5   : > { %4992 = dma.vmem_to_hbm [thread:$0]  (%p5394_p3), %s7525_s16, 1024, %s7522_s15, %s7529_s11, %s5309_s6, %s5310_s12, %s5311_s17  }
 0x5a6 PF: > { %p5014_p1 = scmp.ge.s32.totalorder %s5297_s25, 2  ;;  %s4330_s21 = sand.u32 1, %s5269_s18  }
 0x5a7   : > { %p8760_p5 = scmp.ne.s32.totalorder %s8072_s9, 0  ;;  %s4331_s13 = scalar_lea.sflag [#allocation5], %s4330_s21 }
 0x5a9   : > { %p5005_p7 = pnand %p5014_p1, %p8760_p5 }
 0x5ab   : > { %p5006_p9 = pneg %p5005_p7 }
 0x5ad   : > { %5264 = dma.done.wait (%p5006_p9), %s4331_s13, 1024  }
 0x5ae   : > { %5266 = vsyncadd (%p5006_p9), %s4331_s13, 4294966272  ;;  %s20_s25 = sadd.s32 1, %s5297_s25   ;;  %s8761_s18 = smov %s5273_s19 }
 0x5af   : > { %p17_p10 = scmp.ge.s32.totalorder %s20_s25, 6   ;;  %s8762_s19 = smov %s5277_s20 }
 0x5b0   : > { %s8763_s20 = smov %s5403_s8  ;;  %s8764_s21 = smov %s5289_s23 }
 0x5b1   : > { %s8765_s22 = smov %s5293_s24  ;;  %s8766_s23 = smov %s8769_s28 }
 0x5b2   : > { %s8767_s24 = smov %s8773_s29  ;;  %19 = sbr.rel (!%p17_p10) target bundleno = 9 (0x9), region = 95 }
 0x5b7   :  { %4336 = vsyncpa [#allocation4], 1 }
 0x5b8   :  { %4338 = vsyncpa [#allocation4 + $0x1], 1 }
 0x5b9   :  { %4339 = vsyncpa [#allocation7], 1 }
 0x5ba   :  { %4340 = vsyncpa [#allocation5], 1 }
 0x5bb   :  { %4342 = vsyncpa [#allocation5 + $0x1], 1 }

</bundles_post_ra>
